<compile_context>
chip_gen: v6e
topology: v6e:2x2x1
jax: 0.10.0
libtpu: 0.0.40
codegen_flags: <defaults>
</compile_context>

<pallas_src>
import functools
import math

import jax
import jax.numpy as jnp
from jax.experimental import pallas as pl
from jax.experimental.pallas import tpu as pltpu


# ------------------------------- kernel ------------------------------------ #

def _mybn_fused(h, mask, inv_n, gamma, beta, eps=1e-6):
    """Training-mode BN, batch on the lane axis; masked single-pass statistics.

    h: (10, Npad), mask: (1, Npad) with 1.0 on the n_true valid lanes.
    """
    hm = h * mask                                       # pad lanes -> exactly 0
    s1 = jnp.sum(hm, axis=1, keepdims=True)             # (10, 1) lane reduce (XLU)
    s2 = jnp.sum(hm * hm, axis=1, keepdims=True)
    m = s1 * inv_n                                      # true-N divisor
    v = s2 * inv_n - m * m                              # E[h^2] - m^2
    scale = gamma * jax.lax.rsqrt(v + eps)              # fold gamma into the scale
    bias = beta - m * scale                             # fold centering into the bias
    return h * scale + bias                             # 1 mul + 1 add per element


def _dense10(w, h, b):
    """w: (10, 10) (out, in); h: (10, N) feature-major.  w @ h + b on the VPU,
    pairwise tree sum of the 10 partial products for ILP."""
    terms = [w[:, k:k + 1] * h[k:k + 1, :] for k in range(10)]
    while len(terms) > 1:
        nxt = [terms[i] + terms[i + 1] for i in range(0, len(terms) - 1, 2)]
        if len(terms) % 2:
            nxt.append(terms[-1])
        terms = nxt
    return terms[0] + b


def net_kernel(x_ref, p_ref, o_ref, *, n_true):
    x = x_ref[...]                                      # (1, Npad), batch on lanes
    npad = x_ref.shape[1]

    # Valid-lane mask (pad lanes excluded from BN statistics).
    lane_idx = jax.lax.broadcasted_iota(jnp.int32, (1, npad), 1)
    mask = (lane_idx < n_true).astype(jnp.float32)
    inv_n = jnp.float32(1.0 / n_true)

    # Static, sublane-aligned slices of the single packed parameter blob (64, 128).
    w1 = p_ref[0:10, 0:10]
    w2 = p_ref[16:26, 0:10]
    w3 = p_ref[32:42, 0:10]
    vec = p_ref[48:58, 0:15]                            # per-feature vectors as columns
    w0, b0, g0, be0 = vec[:, 0:1], vec[:, 1:2], vec[:, 2:3], vec[:, 3:4]
    b1, g1, be1 = vec[:, 4:5], vec[:, 5:6], vec[:, 6:7]
    b2, g2, be2 = vec[:, 7:8], vec[:, 8:9], vec[:, 9:10]
    b3, g3, be3 = vec[:, 10:11], vec[:, 11:12], vec[:, 12:13]
    wp = vec[:, 13:14]
    bp = vec[0:1, 14:15]

    # fc0 (in_features=1): broadcast outer product, no MXU.
    h = jnp.tanh(_mybn_fused(w0 * x + b0, mask, inv_n, g0, be0))   # (10, Npad)

    # Three 10x10 hidden layers on the VPU (MXU would be >90% idle at this size).
    h = jnp.tanh(_mybn_fused(_dense10(w1, h, b1), mask, inv_n, g1, be1))
    h = jnp.tanh(_mybn_fused(_dense10(w2, h, b2), mask, inv_n, g2, be2))
    h = jnp.tanh(_mybn_fused(_dense10(w3, h, b3), mask, inv_n, g3, be3))

    # predict (out_features=1): elementwise mul + sublane reduce -> lane-dense store.
    o_ref[...] = jnp.sum(wp * h, axis=0, keepdims=True) + bp


# ------------------------------- wrappers ----------------------------------- #

def net_forward_fm(x_fm, param_blob):
    """Feature-major entry point. x_fm: (1, N) f32, any N. Returns (1, N) f32."""
    n = x_fm.shape[1]
    npad = max(128, ((n + 127) // 128) * 128)           # lane-dense activations/stores
    if npad != n:
        x_fm = jnp.pad(x_fm, ((0, 0), (0, npad - n)))
    vmem = pl.BlockSpec(memory_space=pltpu.MemorySpace.VMEM)
    out_fm = pl.pallas_call(
        functools.partial(net_kernel, n_true=n),
        out_shape=jax.ShapeDtypeStruct((1, npad), jnp.float32),
        in_specs=[vmem, vmem],
        out_specs=vmem,
    )(x_fm, param_blob)
    return out_fm[:, :n]


def net_forward(x, param_blob):
    """PyTorch-layout shim. x: (N, 1) f32 batch-major. Returns (N, 1) f32.
    Large-N callers should prefer net_forward_fm to avoid the relayout."""
    n = x.shape[0]
    out_fm = net_forward_fm(x.reshape(1, n), param_blob)
    return out_fm.reshape(n, 1)


# ------------------------------- parameters --------------------------------- #

def _linear_init(key, fan_in, fan_out):
    """PyTorch nn.Linear default init: U(-1/sqrt(fan_in), 1/sqrt(fan_in))."""
    kw, kb = jax.random.split(key)
    bound = 1.0 / math.sqrt(fan_in)
    w = jax.random.uniform(kw, (fan_out, fan_in), jnp.float32, -bound, bound)
    b = jax.random.uniform(kb, (fan_out,), jnp.float32, -bound, bound)
    return w, b


def init_params(key):
    keys = jax.random.split(key, 5)
    w0, b0 = _linear_init(keys[0], 1, 10)
    w1, b1 = _linear_init(keys[1], 10, 10)
    w2, b2 = _linear_init(keys[2], 10, 10)
    w3, b3 = _linear_init(keys[3], 10, 10)
    wp, bp = _linear_init(keys[4], 10, 1)
    ones = jnp.ones((10,), jnp.float32)
    zeros = jnp.zeros((10,), jnp.float32)
    return dict(
        w0=w0, b0=b0, g0=ones, be0=zeros,
        w1=w1, b1=b1, g1=ones, be1=zeros,
        w2=w2, b2=b2, g2=ones, be2=zeros,
        w3=w3, b3=b3, g3=ones, be3=zeros,
        wp=wp, bp=bp,
    )


def pack_params(p):
    """Pack all 18 parameter arrays into one sublane-aligned (64, 128) f32 blob.
    w1 at rows 0:10, w2 at 16:26, w3 at 32:42, per-feature vectors at 48:58."""
    blob = jnp.zeros((64, 128), jnp.float32)
    blob = blob.at[0:10, 0:10].set(p["w1"])
    blob = blob.at[16:26, 0:10].set(p["w2"])
    blob = blob.at[32:42, 0:10].set(p["w3"])
    cols = jnp.stack(
        [
            p["w0"][:, 0], p["b0"], p["g0"], p["be0"],
            p["b1"], p["g1"], p["be1"],
            p["b2"], p["g2"], p["be2"],
            p["b3"], p["g3"], p["be3"],
            p["wp"][0, :],
        ],
        axis=1,
    )                                                   # (10, 14)
    blob = blob.at[48:58, 0:14].set(cols)
    blob = blob.at[48, 14].set(p["bp"][0])
    return blob


# ------------------------------- reference ---------------------------------- #

def net_forward_ref(x, p):
    """Pure-JAX reference mirroring the PyTorch forward (training-mode MyBN)."""
    hi = jax.lax.Precision.HIGHEST

    def bn(h, g, be, eps=1e-6):
        m = jnp.mean(h, axis=0)
        v = jnp.mean((h - m) ** 2, axis=0)
        return g * ((h - m) / jnp.sqrt(v + eps)) + be

    h = jnp.tanh(bn(jnp.dot(x, p["w0"].T, precision=hi) + p["b0"], p["g0"], p["be0"]))
    h = jnp.tanh(bn(jnp.dot(h, p["w1"].T, precision=hi) + p["b1"], p["g1"], p["be1"]))
    h = jnp.tanh(bn(jnp.dot(h, p["w2"].T, precision=hi) + p["b2"], p["g2"], p["be2"]))
    h = jnp.tanh(bn(jnp.dot(h, p["w3"].T, precision=hi) + p["b3"], p["g3"], p["be3"]))
    return jnp.dot(h, p["wp"].T, precision=hi) + p["bp"]


# --------------------------------- main -------------------------------------- #

if __name__ == "__main__":
    key = jax.random.PRNGKey(0)

    N = 1000  # original script's batch; NOT a multiple of 128 -> exercises masked-pad path
    x = jnp.linspace(-5.0, 5.0, N, dtype=jnp.float32)[:, None]  # (N, 1)

    params = init_params(key)
    blob = pack_params(params)

    out = net_forward(x, blob)
    out = jax.block_until_ready(out)

    ref = net_forward_ref(x, params)
    assert out.shape == (N, 1)
    max_err = float(jnp.max(jnp.abs(out - ref)))
    # BN divides by per-feature std, so f32 summation-order differences between the
    # kernel and the reference are legitimately amplified; 5e-3 absolute is a sound
    # bound for this 4-layer, tanh-bounded net.
    assert max_err < 5e-3, f"max abs err {max_err}"

    print("KERNEL_OK")
</pallas_src>

<mosaic_0001>
module attributes {stable_mosaic.version = 11 : i64} {
  func.func @net_kernel(%arg0: memref<1x1024xf32, #tpu.memory_space<vmem>>, %arg1: memref<64x128xf32, #tpu.memory_space<vmem>>, %arg2: memref<1x1024xf32, #tpu.memory_space<vmem>>) attributes {dimension_semantics = [], scalar_prefetch = 0 : i64, scratch_operands = 0 : i64, tpu.core_type = #tpu.core_type<tc>} {
    %c0 = arith.constant 0 : index
    %c0_0 = arith.constant 0 : index
    %0 = vector.load %arg0[%c0, %c0_0] : memref<1x1024xf32, #tpu.memory_space<vmem>>, vector<1x1024xf32>
    %1 = tpu.iota {dimensions = array<i32: 1>} : vector<1x1024xi32>
    %c1000_i32 = arith.constant 1000 : i32
    %2 = vector.broadcast %c1000_i32 : i32 to vector<1x1024xi32>
    %3 = arith.cmpi slt, %1, %2 : vector<1x1024xi32>
    %4 = arith.extui %3 : vector<1x1024xi1> to vector<1x1024xi32>
    %5 = arith.sitofp %4 : vector<1x1024xi32> to vector<1x1024xf32>
    %c0_1 = arith.constant 0 : index
    %c0_2 = arith.constant 0 : index
    %6 = vector.load %arg1[%c0_1, %c0_2] : memref<64x128xf32, #tpu.memory_space<vmem>>, vector<10x10xf32>
    %c16 = arith.constant 16 : index
    %c0_3 = arith.constant 0 : index
    %7 = vector.load %arg1[%c16, %c0_3] : memref<64x128xf32, #tpu.memory_space<vmem>>, vector<10x10xf32>
    %c32 = arith.constant 32 : index
    %c0_4 = arith.constant 0 : index
    %8 = vector.load %arg1[%c32, %c0_4] : memref<64x128xf32, #tpu.memory_space<vmem>>, vector<10x10xf32>
    %c48 = arith.constant 48 : index
    %c0_5 = arith.constant 0 : index
    %9 = vector.load %arg1[%c48, %c0_5] : memref<64x128xf32, #tpu.memory_space<vmem>>, vector<10x15xf32>
    %10 = vector.extract_strided_slice %9 {offsets = [0, 0], sizes = [10, 1], strides = [1, 1]} : vector<10x15xf32> to vector<10x1xf32>
    %11 = vector.extract_strided_slice %9 {offsets = [0, 1], sizes = [10, 1], strides = [1, 1]} : vector<10x15xf32> to vector<10x1xf32>
    %12 = vector.extract_strided_slice %9 {offsets = [0, 2], sizes = [10, 1], strides = [1, 1]} : vector<10x15xf32> to vector<10x1xf32>
    %13 = vector.extract_strided_slice %9 {offsets = [0, 3], sizes = [10, 1], strides = [1, 1]} : vector<10x15xf32> to vector<10x1xf32>
    %14 = vector.extract_strided_slice %9 {offsets = [0, 4], sizes = [10, 1], strides = [1, 1]} : vector<10x15xf32> to vector<10x1xf32>
    %15 = vector.extract_strided_slice %9 {offsets = [0, 5], sizes = [10, 1], strides = [1, 1]} : vector<10x15xf32> to vector<10x1xf32>
    %16 = vector.extract_strided_slice %9 {offsets = [0, 6], sizes = [10, 1], strides = [1, 1]} : vector<10x15xf32> to vector<10x1xf32>
    %17 = vector.extract_strided_slice %9 {offsets = [0, 7], sizes = [10, 1], strides = [1, 1]} : vector<10x15xf32> to vector<10x1xf32>
    %18 = vector.extract_strided_slice %9 {offsets = [0, 8], sizes = [10, 1], strides = [1, 1]} : vector<10x15xf32> to vector<10x1xf32>
    %19 = vector.extract_strided_slice %9 {offsets = [0, 9], sizes = [10, 1], strides = [1, 1]} : vector<10x15xf32> to vector<10x1xf32>
    %20 = vector.extract_strided_slice %9 {offsets = [0, 10], sizes = [10, 1], strides = [1, 1]} : vector<10x15xf32> to vector<10x1xf32>
    %21 = vector.extract_strided_slice %9 {offsets = [0, 11], sizes = [10, 1], strides = [1, 1]} : vector<10x15xf32> to vector<10x1xf32>
    %22 = vector.extract_strided_slice %9 {offsets = [0, 12], sizes = [10, 1], strides = [1, 1]} : vector<10x15xf32> to vector<10x1xf32>
    %23 = vector.extract_strided_slice %9 {offsets = [0, 13], sizes = [10, 1], strides = [1, 1]} : vector<10x15xf32> to vector<10x1xf32>
    %24 = vector.extract_strided_slice %9 {offsets = [0, 14], sizes = [1, 1], strides = [1, 1]} : vector<10x15xf32> to vector<1x1xf32>
    %25 = vector.broadcast %10 : vector<10x1xf32> to vector<10x1024xf32>
    %26 = vector.broadcast %0 : vector<1x1024xf32> to vector<10x1024xf32>
    %27 = arith.mulf %25, %26 : vector<10x1024xf32>
    %28 = vector.broadcast %11 : vector<10x1xf32> to vector<10x1024xf32>
    %29 = arith.addf %27, %28 : vector<10x1024xf32>
    %30 = vector.broadcast %5 : vector<1x1024xf32> to vector<10x1024xf32>
    %31 = arith.mulf %29, %30 : vector<10x1024xf32>
    %cst = arith.constant dense<0.000000e+00> : vector<10xf32>
    %32 = vector.multi_reduction <add>, %31, %cst [1] : vector<10x1024xf32> to vector<10xf32>
    %33 = vector.shape_cast %32 : vector<10xf32> to vector<10x1xf32>
    %34 = arith.mulf %31, %31 : vector<10x1024xf32>
    %cst_6 = arith.constant dense<0.000000e+00> : vector<10xf32>
    %35 = vector.multi_reduction <add>, %34, %cst_6 [1] : vector<10x1024xf32> to vector<10xf32>
    %36 = vector.shape_cast %35 : vector<10xf32> to vector<10x1xf32>
    %cst_7 = arith.constant 1.000000e-03 : f32
    %37 = vector.broadcast %cst_7 : f32 to vector<10x1xf32>
    %38 = arith.mulf %33, %37 : vector<10x1xf32>
    %cst_8 = arith.constant 1.000000e-03 : f32
    %39 = vector.broadcast %cst_8 : f32 to vector<10x1xf32>
    %40 = arith.mulf %36, %39 : vector<10x1xf32>
    %41 = arith.mulf %38, %38 : vector<10x1xf32>
    %42 = arith.subf %40, %41 : vector<10x1xf32>
    %cst_9 = arith.constant 9.99999997E-7 : f32
    %43 = vector.broadcast %cst_9 : f32 to vector<10x1xf32>
    %44 = arith.addf %42, %43 : vector<10x1xf32>
    %45 = math.rsqrt %44 : vector<10x1xf32>
    %46 = arith.mulf %12, %45 : vector<10x1xf32>
    %47 = arith.mulf %38, %46 : vector<10x1xf32>
    %48 = arith.subf %13, %47 : vector<10x1xf32>
    %49 = vector.broadcast %46 : vector<10x1xf32> to vector<10x1024xf32>
    %50 = arith.mulf %29, %49 : vector<10x1024xf32>
    %51 = vector.broadcast %48 : vector<10x1xf32> to vector<10x1024xf32>
    %52 = arith.addf %50, %51 : vector<10x1024xf32>
    %53 = math.tanh %52 : vector<10x1024xf32>
    %54 = vector.extract_strided_slice %6 {offsets = [0, 0], sizes = [10, 1], strides = [1, 1]} : vector<10x10xf32> to vector<10x1xf32>
    %55 = vector.extract_strided_slice %53 {offsets = [0, 0], sizes = [1, 1024], strides = [1, 1]} : vector<10x1024xf32> to vector<1x1024xf32>
    %56 = vector.broadcast %54 : vector<10x1xf32> to vector<10x1024xf32>
    %57 = vector.broadcast %55 : vector<1x1024xf32> to vector<10x1024xf32>
    %58 = arith.mulf %56, %57 : vector<10x1024xf32>
    %59 = vector.extract_strided_slice %6 {offsets = [0, 1], sizes = [10, 1], strides = [1, 1]} : vector<10x10xf32> to vector<10x1xf32>
    %60 = vector.extract_strided_slice %53 {offsets = [1, 0], sizes = [1, 1024], strides = [1, 1]} : vector<10x1024xf32> to vector<1x1024xf32>
    %61 = vector.broadcast %59 : vector<10x1xf32> to vector<10x1024xf32>
    %62 = vector.broadcast %60 : vector<1x1024xf32> to vector<10x1024xf32>
    %63 = arith.mulf %61, %62 : vector<10x1024xf32>
    %64 = vector.extract_strided_slice %6 {offsets = [0, 2], sizes = [10, 1], strides = [1, 1]} : vector<10x10xf32> to vector<10x1xf32>
    %65 = vector.extract_strided_slice %53 {offsets = [2, 0], sizes = [1, 1024], strides = [1, 1]} : vector<10x1024xf32> to vector<1x1024xf32>
    %66 = vector.broadcast %64 : vector<10x1xf32> to vector<10x1024xf32>
    %67 = vector.broadcast %65 : vector<1x1024xf32> to vector<10x1024xf32>
    %68 = arith.mulf %66, %67 : vector<10x1024xf32>
    %69 = vector.extract_strided_slice %6 {offsets = [0, 3], sizes = [10, 1], strides = [1, 1]} : vector<10x10xf32> to vector<10x1xf32>
    %70 = vector.extract_strided_slice %53 {offsets = [3, 0], sizes = [1, 1024], strides = [1, 1]} : vector<10x1024xf32> to vector<1x1024xf32>
    %71 = vector.broadcast %69 : vector<10x1xf32> to vector<10x1024xf32>
    %72 = vector.broadcast %70 : vector<1x1024xf32> to vector<10x1024xf32>
    %73 = arith.mulf %71, %72 : vector<10x1024xf32>
    %74 = vector.extract_strided_slice %6 {offsets = [0, 4], sizes = [10, 1], strides = [1, 1]} : vector<10x10xf32> to vector<10x1xf32>
    %75 = vector.extract_strided_slice %53 {offsets = [4, 0], sizes = [1, 1024], strides = [1, 1]} : vector<10x1024xf32> to vector<1x1024xf32>
    %76 = vector.broadcast %74 : vector<10x1xf32> to vector<10x1024xf32>
    %77 = vector.broadcast %75 : vector<1x1024xf32> to vector<10x1024xf32>
    %78 = arith.mulf %76, %77 : vector<10x1024xf32>
    %79 = vector.extract_strided_slice %6 {offsets = [0, 5], sizes = [10, 1], strides = [1, 1]} : vector<10x10xf32> to vector<10x1xf32>
    %80 = vector.extract_strided_slice %53 {offsets = [5, 0], sizes = [1, 1024], strides = [1, 1]} : vector<10x1024xf32> to vector<1x1024xf32>
    %81 = vector.broadcast %79 : vector<10x1xf32> to vector<10x1024xf32>
    %82 = vector.broadcast %80 : vector<1x1024xf32> to vector<10x1024xf32>
    %83 = arith.mulf %81, %82 : vector<10x1024xf32>
    %84 = vector.extract_strided_slice %6 {offsets = [0, 6], sizes = [10, 1], strides = [1, 1]} : vector<10x10xf32> to vector<10x1xf32>
    %85 = vector.extract_strided_slice %53 {offsets = [6, 0], sizes = [1, 1024], strides = [1, 1]} : vector<10x1024xf32> to vector<1x1024xf32>
    %86 = vector.broadcast %84 : vector<10x1xf32> to vector<10x1024xf32>
    %87 = vector.broadcast %85 : vector<1x1024xf32> to vector<10x1024xf32>
    %88 = arith.mulf %86, %87 : vector<10x1024xf32>
    %89 = vector.extract_strided_slice %6 {offsets = [0, 7], sizes = [10, 1], strides = [1, 1]} : vector<10x10xf32> to vector<10x1xf32>
    %90 = vector.extract_strided_slice %53 {offsets = [7, 0], sizes = [1, 1024], strides = [1, 1]} : vector<10x1024xf32> to vector<1x1024xf32>
    %91 = vector.broadcast %89 : vector<10x1xf32> to vector<10x1024xf32>
    %92 = vector.broadcast %90 : vector<1x1024xf32> to vector<10x1024xf32>
    %93 = arith.mulf %91, %92 : vector<10x1024xf32>
    %94 = vector.extract_strided_slice %6 {offsets = [0, 8], sizes = [10, 1], strides = [1, 1]} : vector<10x10xf32> to vector<10x1xf32>
    %95 = vector.extract_strided_slice %53 {offsets = [8, 0], sizes = [1, 1024], strides = [1, 1]} : vector<10x1024xf32> to vector<1x1024xf32>
    %96 = vector.broadcast %94 : vector<10x1xf32> to vector<10x1024xf32>
    %97 = vector.broadcast %95 : vector<1x1024xf32> to vector<10x1024xf32>
    %98 = arith.mulf %96, %97 : vector<10x1024xf32>
    %99 = vector.extract_strided_slice %6 {offsets = [0, 9], sizes = [10, 1], strides = [1, 1]} : vector<10x10xf32> to vector<10x1xf32>
    %100 = vector.extract_strided_slice %53 {offsets = [9, 0], sizes = [1, 1024], strides = [1, 1]} : vector<10x1024xf32> to vector<1x1024xf32>
    %101 = vector.broadcast %99 : vector<10x1xf32> to vector<10x1024xf32>
    %102 = vector.broadcast %100 : vector<1x1024xf32> to vector<10x1024xf32>
    %103 = arith.mulf %101, %102 : vector<10x1024xf32>
    %104 = arith.addf %58, %63 : vector<10x1024xf32>
    %105 = arith.addf %68, %73 : vector<10x1024xf32>
    %106 = arith.addf %78, %83 : vector<10x1024xf32>
    %107 = arith.addf %88, %93 : vector<10x1024xf32>
    %108 = arith.addf %98, %103 : vector<10x1024xf32>
    %109 = arith.addf %104, %105 : vector<10x1024xf32>
    %110 = arith.addf %106, %107 : vector<10x1024xf32>
    %111 = arith.addf %109, %110 : vector<10x1024xf32>
    %112 = arith.addf %111, %108 : vector<10x1024xf32>
    %113 = vector.broadcast %14 : vector<10x1xf32> to vector<10x1024xf32>
    %114 = arith.addf %112, %113 : vector<10x1024xf32>
    %115 = vector.broadcast %5 : vector<1x1024xf32> to vector<10x1024xf32>
    %116 = arith.mulf %114, %115 : vector<10x1024xf32>
    %cst_10 = arith.constant dense<0.000000e+00> : vector<10xf32>
    %117 = vector.multi_reduction <add>, %116, %cst_10 [1] : vector<10x1024xf32> to vector<10xf32>
    %118 = vector.shape_cast %117 : vector<10xf32> to vector<10x1xf32>
    %119 = arith.mulf %116, %116 : vector<10x1024xf32>
    %cst_11 = arith.constant dense<0.000000e+00> : vector<10xf32>
    %120 = vector.multi_reduction <add>, %119, %cst_11 [1] : vector<10x1024xf32> to vector<10xf32>
    %121 = vector.shape_cast %120 : vector<10xf32> to vector<10x1xf32>
    %cst_12 = arith.constant 1.000000e-03 : f32
    %122 = vector.broadcast %cst_12 : f32 to vector<10x1xf32>
    %123 = arith.mulf %118, %122 : vector<10x1xf32>
    %cst_13 = arith.constant 1.000000e-03 : f32
    %124 = vector.broadcast %cst_13 : f32 to vector<10x1xf32>
    %125 = arith.mulf %121, %124 : vector<10x1xf32>
    %126 = arith.mulf %123, %123 : vector<10x1xf32>
    %127 = arith.subf %125, %126 : vector<10x1xf32>
    %cst_14 = arith.constant 9.99999997E-7 : f32
    %128 = vector.broadcast %cst_14 : f32 to vector<10x1xf32>
    %129 = arith.addf %127, %128 : vector<10x1xf32>
    %130 = math.rsqrt %129 : vector<10x1xf32>
    %131 = arith.mulf %15, %130 : vector<10x1xf32>
    %132 = arith.mulf %123, %131 : vector<10x1xf32>
    %133 = arith.subf %16, %132 : vector<10x1xf32>
    %134 = vector.broadcast %131 : vector<10x1xf32> to vector<10x1024xf32>
    %135 = arith.mulf %114, %134 : vector<10x1024xf32>
    %136 = vector.broadcast %133 : vector<10x1xf32> to vector<10x1024xf32>
    %137 = arith.addf %135, %136 : vector<10x1024xf32>
    %138 = math.tanh %137 : vector<10x1024xf32>
    %139 = vector.extract_strided_slice %7 {offsets = [0, 0], sizes = [10, 1], strides = [1, 1]} : vector<10x10xf32> to vector<10x1xf32>
    %140 = vector.extract_strided_slice %138 {offsets = [0, 0], sizes = [1, 1024], strides = [1, 1]} : vector<10x1024xf32> to vector<1x1024xf32>
    %141 = vector.broadcast %139 : vector<10x1xf32> to vector<10x1024xf32>
    %142 = vector.broadcast %140 : vector<1x1024xf32> to vector<10x1024xf32>
    %143 = arith.mulf %141, %142 : vector<10x1024xf32>
    %144 = vector.extract_strided_slice %7 {offsets = [0, 1], sizes = [10, 1], strides = [1, 1]} : vector<10x10xf32> to vector<10x1xf32>
    %145 = vector.extract_strided_slice %138 {offsets = [1, 0], sizes = [1, 1024], strides = [1, 1]} : vector<10x1024xf32> to vector<1x1024xf32>
    %146 = vector.broadcast %144 : vector<10x1xf32> to vector<10x1024xf32>
    %147 = vector.broadcast %145 : vector<1x1024xf32> to vector<10x1024xf32>
    %148 = arith.mulf %146, %147 : vector<10x1024xf32>
    %149 = vector.extract_strided_slice %7 {offsets = [0, 2], sizes = [10, 1], strides = [1, 1]} : vector<10x10xf32> to vector<10x1xf32>
    %150 = vector.extract_strided_slice %138 {offsets = [2, 0], sizes = [1, 1024], strides = [1, 1]} : vector<10x1024xf32> to vector<1x1024xf32>
    %151 = vector.broadcast %149 : vector<10x1xf32> to vector<10x1024xf32>
    %152 = vector.broadcast %150 : vector<1x1024xf32> to vector<10x1024xf32>
    %153 = arith.mulf %151, %152 : vector<10x1024xf32>
    %154 = vector.extract_strided_slice %7 {offsets = [0, 3], sizes = [10, 1], strides = [1, 1]} : vector<10x10xf32> to vector<10x1xf32>
    %155 = vector.extract_strided_slice %138 {offsets = [3, 0], sizes = [1, 1024], strides = [1, 1]} : vector<10x1024xf32> to vector<1x1024xf32>
    %156 = vector.broadcast %154 : vector<10x1xf32> to vector<10x1024xf32>
    %157 = vector.broadcast %155 : vector<1x1024xf32> to vector<10x1024xf32>
    %158 = arith.mulf %156, %157 : vector<10x1024xf32>
    %159 = vector.extract_strided_slice %7 {offsets = [0, 4], sizes = [10, 1], strides = [1, 1]} : vector<10x10xf32> to vector<10x1xf32>
    %160 = vector.extract_strided_slice %138 {offsets = [4, 0], sizes = [1, 1024], strides = [1, 1]} : vector<10x1024xf32> to vector<1x1024xf32>
    %161 = vector.broadcast %159 : vector<10x1xf32> to vector<10x1024xf32>
    %162 = vector.broadcast %160 : vector<1x1024xf32> to vector<10x1024xf32>
    %163 = arith.mulf %161, %162 : vector<10x1024xf32>
    %164 = vector.extract_strided_slice %7 {offsets = [0, 5], sizes = [10, 1], strides = [1, 1]} : vector<10x10xf32> to vector<10x1xf32>
    %165 = vector.extract_strided_slice %138 {offsets = [5, 0], sizes = [1, 1024], strides = [1, 1]} : vector<10x1024xf32> to vector<1x1024xf32>
    %166 = vector.broadcast %164 : vector<10x1xf32> to vector<10x1024xf32>
    %167 = vector.broadcast %165 : vector<1x1024xf32> to vector<10x1024xf32>
    %168 = arith.mulf %166, %167 : vector<10x1024xf32>
    %169 = vector.extract_strided_slice %7 {offsets = [0, 6], sizes = [10, 1], strides = [1, 1]} : vector<10x10xf32> to vector<10x1xf32>
    %170 = vector.extract_strided_slice %138 {offsets = [6, 0], sizes = [1, 1024], strides = [1, 1]} : vector<10x1024xf32> to vector<1x1024xf32>
    %171 = vector.broadcast %169 : vector<10x1xf32> to vector<10x1024xf32>
    %172 = vector.broadcast %170 : vector<1x1024xf32> to vector<10x1024xf32>
    %173 = arith.mulf %171, %172 : vector<10x1024xf32>
    %174 = vector.extract_strided_slice %7 {offsets = [0, 7], sizes = [10, 1], strides = [1, 1]} : vector<10x10xf32> to vector<10x1xf32>
    %175 = vector.extract_strided_slice %138 {offsets = [7, 0], sizes = [1, 1024], strides = [1, 1]} : vector<10x1024xf32> to vector<1x1024xf32>
    %176 = vector.broadcast %174 : vector<10x1xf32> to vector<10x1024xf32>
    %177 = vector.broadcast %175 : vector<1x1024xf32> to vector<10x1024xf32>
    %178 = arith.mulf %176, %177 : vector<10x1024xf32>
    %179 = vector.extract_strided_slice %7 {offsets = [0, 8], sizes = [10, 1], strides = [1, 1]} : vector<10x10xf32> to vector<10x1xf32>
    %180 = vector.extract_strided_slice %138 {offsets = [8, 0], sizes = [1, 1024], strides = [1, 1]} : vector<10x1024xf32> to vector<1x1024xf32>
    %181 = vector.broadcast %179 : vector<10x1xf32> to vector<10x1024xf32>
    %182 = vector.broadcast %180 : vector<1x1024xf32> to vector<10x1024xf32>
    %183 = arith.mulf %181, %182 : vector<10x1024xf32>
    %184 = vector.extract_strided_slice %7 {offsets = [0, 9], sizes = [10, 1], strides = [1, 1]} : vector<10x10xf32> to vector<10x1xf32>
    %185 = vector.extract_strided_slice %138 {offsets = [9, 0], sizes = [1, 1024], strides = [1, 1]} : vector<10x1024xf32> to vector<1x1024xf32>
    %186 = vector.broadcast %184 : vector<10x1xf32> to vector<10x1024xf32>
    %187 = vector.broadcast %185 : vector<1x1024xf32> to vector<10x1024xf32>
    %188 = arith.mulf %186, %187 : vector<10x1024xf32>
    %189 = arith.addf %143, %148 : vector<10x1024xf32>
    %190 = arith.addf %153, %158 : vector<10x1024xf32>
    %191 = arith.addf %163, %168 : vector<10x1024xf32>
    %192 = arith.addf %173, %178 : vector<10x1024xf32>
    %193 = arith.addf %183, %188 : vector<10x1024xf32>
    %194 = arith.addf %189, %190 : vector<10x1024xf32>
    %195 = arith.addf %191, %192 : vector<10x1024xf32>
    %196 = arith.addf %194, %195 : vector<10x1024xf32>
    %197 = arith.addf %196, %193 : vector<10x1024xf32>
    %198 = vector.broadcast %17 : vector<10x1xf32> to vector<10x1024xf32>
    %199 = arith.addf %197, %198 : vector<10x1024xf32>
    %200 = vector.broadcast %5 : vector<1x1024xf32> to vector<10x1024xf32>
    %201 = arith.mulf %199, %200 : vector<10x1024xf32>
    %cst_15 = arith.constant dense<0.000000e+00> : vector<10xf32>
    %202 = vector.multi_reduction <add>, %201, %cst_15 [1] : vector<10x1024xf32> to vector<10xf32>
    %203 = vector.shape_cast %202 : vector<10xf32> to vector<10x1xf32>
    %204 = arith.mulf %201, %201 : vector<10x1024xf32>
    %cst_16 = arith.constant dense<0.000000e+00> : vector<10xf32>
    %205 = vector.multi_reduction <add>, %204, %cst_16 [1] : vector<10x1024xf32> to vector<10xf32>
    %206 = vector.shape_cast %205 : vector<10xf32> to vector<10x1xf32>
    %cst_17 = arith.constant 1.000000e-03 : f32
    %207 = vector.broadcast %cst_17 : f32 to vector<10x1xf32>
    %208 = arith.mulf %203, %207 : vector<10x1xf32>
    %cst_18 = arith.constant 1.000000e-03 : f32
    %209 = vector.broadcast %cst_18 : f32 to vector<10x1xf32>
    %210 = arith.mulf %206, %209 : vector<10x1xf32>
    %211 = arith.mulf %208, %208 : vector<10x1xf32>
    %212 = arith.subf %210, %211 : vector<10x1xf32>
    %cst_19 = arith.constant 9.99999997E-7 : f32
    %213 = vector.broadcast %cst_19 : f32 to vector<10x1xf32>
    %214 = arith.addf %212, %213 : vector<10x1xf32>
    %215 = math.rsqrt %214 : vector<10x1xf32>
    %216 = arith.mulf %18, %215 : vector<10x1xf32>
    %217 = arith.mulf %208, %216 : vector<10x1xf32>
    %218 = arith.subf %19, %217 : vector<10x1xf32>
    %219 = vector.broadcast %216 : vector<10x1xf32> to vector<10x1024xf32>
    %220 = arith.mulf %199, %219 : vector<10x1024xf32>
    %221 = vector.broadcast %218 : vector<10x1xf32> to vector<10x1024xf32>
    %222 = arith.addf %220, %221 : vector<10x1024xf32>
    %223 = math.tanh %222 : vector<10x1024xf32>
    %224 = vector.extract_strided_slice %8 {offsets = [0, 0], sizes = [10, 1], strides = [1, 1]} : vector<10x10xf32> to vector<10x1xf32>
    %225 = vector.extract_strided_slice %223 {offsets = [0, 0], sizes = [1, 1024], strides = [1, 1]} : vector<10x1024xf32> to vector<1x1024xf32>
    %226 = vector.broadcast %224 : vector<10x1xf32> to vector<10x1024xf32>
    %227 = vector.broadcast %225 : vector<1x1024xf32> to vector<10x1024xf32>
    %228 = arith.mulf %226, %227 : vector<10x1024xf32>
    %229 = vector.extract_strided_slice %8 {offsets = [0, 1], sizes = [10, 1], strides = [1, 1]} : vector<10x10xf32> to vector<10x1xf32>
    %230 = vector.extract_strided_slice %223 {offsets = [1, 0], sizes = [1, 1024], strides = [1, 1]} : vector<10x1024xf32> to vector<1x1024xf32>
    %231 = vector.broadcast %229 : vector<10x1xf32> to vector<10x1024xf32>
    %232 = vector.broadcast %230 : vector<1x1024xf32> to vector<10x1024xf32>
    %233 = arith.mulf %231, %232 : vector<10x1024xf32>
    %234 = vector.extract_strided_slice %8 {offsets = [0, 2], sizes = [10, 1], strides = [1, 1]} : vector<10x10xf32> to vector<10x1xf32>
    %235 = vector.extract_strided_slice %223 {offsets = [2, 0], sizes = [1, 1024], strides = [1, 1]} : vector<10x1024xf32> to vector<1x1024xf32>
    %236 = vector.broadcast %234 : vector<10x1xf32> to vector<10x1024xf32>
    %237 = vector.broadcast %235 : vector<1x1024xf32> to vector<10x1024xf32>
    %238 = arith.mulf %236, %237 : vector<10x1024xf32>
    %239 = vector.extract_strided_slice %8 {offsets = [0, 3], sizes = [10, 1], strides = [1, 1]} : vector<10x10xf32> to vector<10x1xf32>
    %240 = vector.extract_strided_slice %223 {offsets = [3, 0], sizes = [1, 1024], strides = [1, 1]} : vector<10x1024xf32> to vector<1x1024xf32>
    %241 = vector.broadcast %239 : vector<10x1xf32> to vector<10x1024xf32>
    %242 = vector.broadcast %240 : vector<1x1024xf32> to vector<10x1024xf32>
    %243 = arith.mulf %241, %242 : vector<10x1024xf32>
    %244 = vector.extract_strided_slice %8 {offsets = [0, 4], sizes = [10, 1], strides = [1, 1]} : vector<10x10xf32> to vector<10x1xf32>
    %245 = vector.extract_strided_slice %223 {offsets = [4, 0], sizes = [1, 1024], strides = [1, 1]} : vector<10x1024xf32> to vector<1x1024xf32>
    %246 = vector.broadcast %244 : vector<10x1xf32> to vector<10x1024xf32>
    %247 = vector.broadcast %245 : vector<1x1024xf32> to vector<10x1024xf32>
    %248 = arith.mulf %246, %247 : vector<10x1024xf32>
    %249 = vector.extract_strided_slice %8 {offsets = [0, 5], sizes = [10, 1], strides = [1, 1]} : vector<10x10xf32> to vector<10x1xf32>
    %250 = vector.extract_strided_slice %223 {offsets = [5, 0], sizes = [1, 1024], strides = [1, 1]} : vector<10x1024xf32> to vector<1x1024xf32>
    %251 = vector.broadcast %249 : vector<10x1xf32> to vector<10x1024xf32>
    %252 = vector.broadcast %250 : vector<1x1024xf32> to vector<10x1024xf32>
    %253 = arith.mulf %251, %252 : vector<10x1024xf32>
    %254 = vector.extract_strided_slice %8 {offsets = [0, 6], sizes = [10, 1], strides = [1, 1]} : vector<10x10xf32> to vector<10x1xf32>
    %255 = vector.extract_strided_slice %223 {offsets = [6, 0], sizes = [1, 1024], strides = [1, 1]} : vector<10x1024xf32> to vector<1x1024xf32>
    %256 = vector.broadcast %254 : vector<10x1xf32> to vector<10x1024xf32>
    %257 = vector.broadcast %255 : vector<1x1024xf32> to vector<10x1024xf32>
    %258 = arith.mulf %256, %257 : vector<10x1024xf32>
    %259 = vector.extract_strided_slice %8 {offsets = [0, 7], sizes = [10, 1], strides = [1, 1]} : vector<10x10xf32> to vector<10x1xf32>
    %260 = vector.extract_strided_slice %223 {offsets = [7, 0], sizes = [1, 1024], strides = [1, 1]} : vector<10x1024xf32> to vector<1x1024xf32>
    %261 = vector.broadcast %259 : vector<10x1xf32> to vector<10x1024xf32>
    %262 = vector.broadcast %260 : vector<1x1024xf32> to vector<10x1024xf32>
    %263 = arith.mulf %261, %262 : vector<10x1024xf32>
    %264 = vector.extract_strided_slice %8 {offsets = [0, 8], sizes = [10, 1], strides = [1, 1]} : vector<10x10xf32> to vector<10x1xf32>
    %265 = vector.extract_strided_slice %223 {offsets = [8, 0], sizes = [1, 1024], strides = [1, 1]} : vector<10x1024xf32> to vector<1x1024xf32>
    %266 = vector.broadcast %264 : vector<10x1xf32> to vector<10x1024xf32>
    %267 = vector.broadcast %265 : vector<1x1024xf32> to vector<10x1024xf32>
    %268 = arith.mulf %266, %267 : vector<10x1024xf32>
    %269 = vector.extract_strided_slice %8 {offsets = [0, 9], sizes = [10, 1], strides = [1, 1]} : vector<10x10xf32> to vector<10x1xf32>
    %270 = vector.extract_strided_slice %223 {offsets = [9, 0], sizes = [1, 1024], strides = [1, 1]} : vector<10x1024xf32> to vector<1x1024xf32>
    %271 = vector.broadcast %269 : vector<10x1xf32> to vector<10x1024xf32>
    %272 = vector.broadcast %270 : vector<1x1024xf32> to vector<10x1024xf32>
    %273 = arith.mulf %271, %272 : vector<10x1024xf32>
    %274 = arith.addf %228, %233 : vector<10x1024xf32>
    %275 = arith.addf %238, %243 : vector<10x1024xf32>
    %276 = arith.addf %248, %253 : vector<10x1024xf32>
    %277 = arith.addf %258, %263 : vector<10x1024xf32>
    %278 = arith.addf %268, %273 : vector<10x1024xf32>
    %279 = arith.addf %274, %275 : vector<10x1024xf32>
    %280 = arith.addf %276, %277 : vector<10x1024xf32>
    %281 = arith.addf %279, %280 : vector<10x1024xf32>
    %282 = arith.addf %281, %278 : vector<10x1024xf32>
    %283 = vector.broadcast %20 : vector<10x1xf32> to vector<10x1024xf32>
    %284 = arith.addf %282, %283 : vector<10x1024xf32>
    %285 = vector.broadcast %5 : vector<1x1024xf32> to vector<10x1024xf32>
    %286 = arith.mulf %284, %285 : vector<10x1024xf32>
    %cst_20 = arith.constant dense<0.000000e+00> : vector<10xf32>
    %287 = vector.multi_reduction <add>, %286, %cst_20 [1] : vector<10x1024xf32> to vector<10xf32>
    %288 = vector.shape_cast %287 : vector<10xf32> to vector<10x1xf32>
    %289 = arith.mulf %286, %286 : vector<10x1024xf32>
    %cst_21 = arith.constant dense<0.000000e+00> : vector<10xf32>
    %290 = vector.multi_reduction <add>, %289, %cst_21 [1] : vector<10x1024xf32> to vector<10xf32>
    %291 = vector.shape_cast %290 : vector<10xf32> to vector<10x1xf32>
    %cst_22 = arith.constant 1.000000e-03 : f32
    %292 = vector.broadcast %cst_22 : f32 to vector<10x1xf32>
    %293 = arith.mulf %288, %292 : vector<10x1xf32>
    %cst_23 = arith.constant 1.000000e-03 : f32
    %294 = vector.broadcast %cst_23 : f32 to vector<10x1xf32>
    %295 = arith.mulf %291, %294 : vector<10x1xf32>
    %296 = arith.mulf %293, %293 : vector<10x1xf32>
    %297 = arith.subf %295, %296 : vector<10x1xf32>
    %cst_24 = arith.constant 9.99999997E-7 : f32
    %298 = vector.broadcast %cst_24 : f32 to vector<10x1xf32>
    %299 = arith.addf %297, %298 : vector<10x1xf32>
    %300 = math.rsqrt %299 : vector<10x1xf32>
    %301 = arith.mulf %21, %300 : vector<10x1xf32>
    %302 = arith.mulf %293, %301 : vector<10x1xf32>
    %303 = arith.subf %22, %302 : vector<10x1xf32>
    %304 = vector.broadcast %301 : vector<10x1xf32> to vector<10x1024xf32>
    %305 = arith.mulf %284, %304 : vector<10x1024xf32>
    %306 = vector.broadcast %303 : vector<10x1xf32> to vector<10x1024xf32>
    %307 = arith.addf %305, %306 : vector<10x1024xf32>
    %308 = math.tanh %307 : vector<10x1024xf32>
    %309 = vector.broadcast %23 : vector<10x1xf32> to vector<10x1024xf32>
    %310 = arith.mulf %309, %308 : vector<10x1024xf32>
    %cst_25 = arith.constant dense<0.000000e+00> : vector<1024xf32>
    %311 = vector.multi_reduction <add>, %310, %cst_25 [0] : vector<10x1024xf32> to vector<1024xf32>
    %312 = vector.shape_cast %311 : vector<1024xf32> to vector<1x1024xf32>
    %313 = vector.broadcast %24 : vector<1x1xf32> to vector<1x1024xf32>
    %314 = arith.addf %312, %313 : vector<1x1024xf32>
    %c0_26 = arith.constant 0 : index
    %c0_27 = arith.constant 0 : index
    %315 = vector.load %arg2[%c0_26, %c0_27] : memref<1x1024xf32, #tpu.memory_space<vmem>>, vector<1x1024xf32>
    tpu.vector_store %arg2[%c0_26, %c0_27], %314 {strides = array<i32>} : memref<1x1024xf32, #tpu.memory_space<vmem>>, vector<1x1024xf32>,
    return
  }
}

</mosaic_0001>

<bundles_post_ra>
// kernel: tpu_custom_call.1
= control target key start
LH: loop header
LB: loop body
LE: loop exit
PB: predicated region body
PF: predicated region fallthrough
CT: control target
= control target key end

     0   :  { %7 = vsyncpa [#allocation3], 0  ;;  %s6801_s0 = inlined_call_operand.hbm [shape: f32[1,1024], index: 0, kind: input, shape index: {}]   ;;  %s6802_s1 = inlined_call_operand.hbm [shape: f32[64,128], index: 1, kind: input, shape index: {}]   ;;  %s6803_s2 = inlined_call_operand.hbm [shape: f32[1,1024], index: 2, kind: output, shape index: {}]  }
   0x1   :  { %8 = vsyncpa [#allocation6], 0 }
   0x2   :  { %9 = vsyncpa [#allocation4], 0  ;;  %s3570_s9 = smov [#allocation2]   ;;  %s3571_s11 = smov [#allocation5]  }
   0x3   :  { %s16_s10 = sshll.u32 %s3570_s9, 4  ;;  %s25_s12 = sshll.u32 %s3571_s11, 4  ;;  %s17_s10 = int_to_ptr.vmem [resolvable:$true] %s16_s10  ;;  %s26_s12 = int_to_ptr.vmem [resolvable:$true] %s25_s12 }
   0x4   :  { %s3512_s13 = scalar_lea.vmem %s17_s10, 128  ;;  %p3517_p1 = scmp.lt.s32.totalorder %s17_s10, %s17_s10 }
   0x5   :  { %p3513_p0 = scmp.ne.s32.totalorder %s17_s10, %s3512_s13  ;;  %p3518_p2 = scmp.lt.s32.totalorder %s3512_s13, %s3512_s13 }
   0x7   :  { %p3519_p3 = por %p3518_p2, %p3517_p1 }
   0x9   :  { %p3520_p4 = pnand %p3519_p3, %p3513_p0 }
   0xb   :  { %3523 = shalt.err (!%p3520_p4)
}
   0xc   :  { %19 = dma.hbm_to_vmem [thread:$0]  %s6801_s0, 128, %s17_s10, [#allocation3]  }
   0xd   :  { %s3532_s16 = scalar_lea.vmem %s26_s12, 1024  ;;  %p3537_p6 = scmp.lt.s32.totalorder %s26_s12, %s26_s12 }
   0xe   :  { %p3533_p5 = scmp.ne.s32.totalorder %s26_s12, %s3532_s16  ;;  %p3538_p7 = scmp.lt.s32.totalorder %s3532_s16, %s3532_s16 }
  0x10   :  { %p3539_p8 = por %p3538_p7, %p3537_p6 }
  0x12   :  { %p3540_p9 = pnand %p3539_p8, %p3533_p5 }
  0x14   :  { %3543 = shalt.err (!%p3540_p9)
}
  0x15   :  { %s3572_s17 = smov 128   ;;  %s3573_s18 = smov 8  }
  0x16   :  { %31 = dma.hbm_to_vmem [thread:$0]  %s6802_s1, 1024, %s26_s12, [#allocation6], %s3572_s17, %s3572_s17, %s3573_s18  }
  0x17   :  { %3564 = dma.done.wait [#allocation3], 128  }
  0x18   :  { %3565 = vsyncadd [#allocation3], 4294967168 }
  0x19   :  { %3566 = dma.done.wait [#allocation6], 1024  }
  0x1a   :  { %3567 = vsyncadd [#allocation6], 4294966272  ;;  %v6822_v0 = vmov 0   ;;  %v3616_v1 = vld [vmem:[#allocation5 + $0x38] sm:$0x3]  ;;  %v3618_v2 = vld [vmem:[#allocation5 + $0x30] sm:$0xff]  ;;  %v39_v4 = vlaneseq }
  0x1b   :  { %3275 = vset.pattern.permute.xlu1 %v6822_v0  ;;  %3273 = vset.pattern.permute.xlu0 %v6822_v0  ;;  %v6812_v3 = vmov 1   ;;  %v38_v10 = vld [vmem:[#allocation2] sm:$0xff]  ;;  %v3576_v29 = vmov 0.0   ;;  %vm196_vm1 = vcmask 1041408   ;;  %s3578_s0 = smov 1   ;;  %s3592_s1 = smov [#allocation7]  }
  0x1c   :  { %87 = vperm.xlu1 %3275, %v3616_v1   ;;  %82 = vperm.xlu0 %3273, %v3618_v2   ;;  %v3627_v5 = vshrl.u32 %v39_v4, 7  ;;  %v40_v6 = vand.u32 127, %v39_v4  ;;  %s3239_s21 = sshll.u32 %s3592_s1, 4  ;;  %s3240_s21 = int_to_ptr.vmem [resolvable:$true] %s3239_s21 }
  0x1d   :  { %s3544_s22 = scalar_lea.vmem %s3240_s21, 128  ;;  %p3549_p11 = scmp.lt.s32.totalorder %s3240_s21, %s3240_s21 }
  0x1e   :  { %7101 = vst [vmem:[#allocation11_spill] sm:$0xff] %v3627_v5  ;;  %v3630_v7 = vsub.s32 0, %v3627_v5  ;;  %v3633_v8 = vsub.s32 1, %v3627_v5  ;;  %v3636_v9 = vsub.s32 2, %v3627_v5  ;;  %v47_v11 = vadd.s32 896, %v40_v6  ;;  %p3545_p10 = scmp.ne.s32.totalorder %s3240_s21, %s3544_s22  ;;  %p3550_p12 = scmp.lt.s32.totalorder %s3544_s22, %s3544_s22 }
  0x1f   :  { %v3639_v12 = vsub.s32 3, %v3627_v5  ;;  %v3642_v13 = vsub.s32 4, %v3627_v5  ;;  %v3645_v14 = vsub.s32 5, %v3627_v5  ;;  %v3648_v15 = vsub.s32 6, %v3627_v5 }
  0x20   :  { %3276 = vset.pattern.permute.xlu1 %v6812_v3  ;;  %3274 = vset.pattern.permute.xlu0 %v6812_v3  ;;  %7102 = vst [vmem:[#allocation12_spill] sm:$0xff] %v3630_v7  ;;  %7103 = vst [vmem:[#allocation13_spill] sm:$0xff] %v3633_v8  ;;  %v3651_v16 = vsub.s32 7, %v3627_v5  ;;  %v94_v17 = vrot.slane %v38_v10, %v3630_v7  ;;  %v98_v18 = vrot.slane %v38_v10, %v3633_v8  ;;  %p3551_p13 = por %p3550_p12, %p3549_p11 }
  0x21   :  { %152 = vperm.xlu1 %3276, %v3616_v1   ;;  %148 = vperm.xlu0 %3274, %v3618_v2   ;;  %7104 = vst [vmem:[#allocation14_spill] sm:$0xff] %v3636_v9  ;;  %7105 = vst [vmem:[#allocation15_spill] sm:$0xff] %v3639_v12  ;;  %v102_v19 = vrot.slane %v38_v10, %v3636_v9  ;;  %vm55_vm0 = vcmp.lt.s32.totalorder %v47_v11, 1000  ;;  %v106_v21 = vrot.slane %v38_v10, %v3639_v12 }
  0x22   :  { %7106 = vst [vmem:[#allocation16_spill] sm:$0xff] %v3642_v13  ;;  %7107 = vst [vmem:[#allocation17_spill] sm:$0xff] %v3645_v14  ;;  %v110_v22 = vrot.slane %v38_v10, %v3642_v13  ;;  %v114_v23 = vrot.slane %v38_v10, %v3645_v14  ;;  %v118_v25 = vrot.slane %v38_v10, %v3648_v15  ;;  %v3661_v30 = vsel %vm55_vm0, 1.0, %v3576_v29  ;;  %p3552_p0 = pnand %p3551_p13, %p3545_p10 }
  0x23   :  { %7108 = vst [vmem:[#allocation18_spill] sm:$0xff] %v3648_v15  ;;  %7109 = vst [vmem:[#allocation19_spill] sm:$0xff] %v3651_v16  ;;  %v122_v26 = vrot.slane %v38_v10, %v3651_v16 }
  0x24   :  { %7110 = vst [vmem:[#allocation20_spill] sm:$0xff] %v3661_v30 }
  0x25   :  { %3278 = vset.pattern.permute.xlu0 %v6822_v0 }
  0x97   :  { %v83_v20 = vpop.permute.xlu0 %82  ;;  %v88_v24 = vpop.permute.xlu1 %87 }
  0x98   :  { %v131_v27 = vmul.f32 %v94_v17, %v83_v20  ;;  %v132_v28 = vmul.f32 %v98_v18, %v83_v20  ;;  %v133_v31 = vmul.f32 %v102_v19, %v83_v20  ;;  %v134_v32 = vmul.f32 %v106_v21, %v83_v20 }
  0x99   :  { %v135_v33 = vmul.f32 %v110_v22, %v83_v20  ;;  %v136_v34 = vmul.f32 %v114_v23, %v83_v20  ;;  %v137_v36 = vmul.f32 %v118_v25, %v83_v20  ;;  %v138_v37 = vmul.f32 %v122_v26, %v83_v20 }
  0x9a   :  { %v139_v38 = vmul.f32 %v94_v17, %v88_v24  ;;  %v140_v39 = vmul.f32 %v98_v18, %v88_v24  ;;  %v141_v43 = vmul.f32 %v102_v19, %v88_v24  ;;  %v142_v46 = vmul.f32 %v106_v21, %v88_v24 }
  0x9b   :  { %v143_v47 = vmul.f32 %v110_v22, %v88_v24  ;;  %v144_v48 = vmul.f32 %v114_v23, %v88_v24  ;;  %v145_v55 = vmul.f32 %v118_v25, %v88_v24  ;;  %v146_v56 = vmul.f32 %v122_v26, %v88_v24 }
  0x9c   :  { %v149_v35 = vpop.permute.xlu0 %148  ;;  %v153_v44 = vpop.permute.xlu1 %152 }
  0x9d   :  { %v3663_v40 = vadd.f32 %v149_v35, %v131_v27  ;;  %v3665_v41 = vadd.f32 %v149_v35, %v132_v28  ;;  %v3667_v42 = vadd.f32 %v149_v35, %v133_v31  ;;  %v3669_v45 = vadd.f32 %v149_v35, %v134_v32 }
  0x9e   :  { %v3671_v49 = vadd.f32 %v149_v35, %v138_v37  ;;  %v3679_v53 = vadd.f32 %v149_v35, %v135_v33  ;;  %v3681_v54 = vadd.f32 %v149_v35, %v136_v34  ;;  %v3686_v60 = vadd.f32 %v153_v44, %v139_v38 }
  0x9f   :  { %v187_v50 = vadd.f32 %v3665_v41, %v3663_v40  ;;  %v214_v51 = vmul.f32 %v3663_v40, %v3663_v40  ;;  %v215_v52 = vmul.f32 %v3665_v41, %v3665_v41  ;;  %v216_v58 = vmul.f32 %v3667_v42, %v3667_v42 }
  0xa0   :  { %v3688_v61 = vadd.f32 %v149_v35, %v137_v36  ;;  %v3690_v62 = vadd.f32 %v153_v44, %v140_v39  ;;  %v3692_v63 = vadd.f32 %v153_v44, %v141_v43  ;;  %v3694_v4 = vadd.f32 %v153_v44, %v142_v46 }
  0xa1   :  { %v188_v57 = vadd.f32 %v187_v50, %v3667_v42  ;;  %v230_v59 = vadd.f32 %v215_v52, %v214_v51  ;;  %v178_v6 = vmul.f32 %v3661_v30, %v3671_v49  ;;  %v217_v11 = vmul.f32 %v3669_v45, %v3669_v45 }
  0xa2   :  { %v218_v18 = vmul.f32 %v3679_v53, %v3679_v53  ;;  %v3703_v19 = vadd.f32 %v153_v44, %v143_v47  ;;  %v222_v20 = vmul.f32 %v3686_v60, %v3686_v60  ;;  %v223_v21 = vmul.f32 %v3690_v62, %v3690_v62 }
  0xa3   :  { %v189_v10 = vadd.f32 %v188_v57, %v3669_v45  ;;  %v231_v17 = vadd.f32 %v230_v59, %v216_v58  ;;  %v3710_v24 = vadd.f32 %v153_v44, %v146_v56  ;;  %v224_v25 = vmul.f32 %v3692_v63, %v3692_v63 }
  0xa4   :  { %v219_v26 = vmul.f32 %v3681_v54, %v3681_v54  ;;  %v220_v27 = vmul.f32 %v3688_v61, %v3688_v61  ;;  %v3718_v28 = vadd.f32 %v153_v44, %v144_v48  ;;  %v225_v29 = vmul.f32 %v3694_v4, %v3694_v4 }
  0xa5   :  { %v190_v22 = vadd.f32 %v189_v10, %v3679_v53  ;;  %v232_v23 = vadd.f32 %v231_v17, %v217_v11  ;;  %v239_v33 = vsel %vm196_vm1, %v222_v20, 0.0  ;;  %v240_v34 = vsel %vm196_vm1, %v223_v21, 0.0 }
  0xa6   :  { %v221_v35 = vmul.f32 %v178_v6, %v178_v6  ;;  %v3725_v36 = vadd.f32 %v153_v44, %v145_v55  ;;  %v241_v37 = vadd.f32 %v240_v34, %v239_v33  ;;  %v242_v38 = vsel %vm196_vm1, %v224_v25, 0.0 }
  0xa7   :  { %v191_v31 = vadd.f32 %v190_v22, %v3681_v54  ;;  %v233_v32 = vadd.f32 %v232_v23, %v218_v18  ;;  %v186_v46 = vmul.f32 %v3661_v30, %v3710_v24  ;;  %v226_v47 = vmul.f32 %v3703_v19, %v3703_v19 }
  0xa8   :  { %v227_v48 = vmul.f32 %v3718_v28, %v3718_v28  ;;  %v243_v50 = vadd.f32 %v242_v38, %v241_v37  ;;  %v244_v51 = vsel %vm196_vm1, %v225_v29, 0.0  ;;  %v197_v44 = vsel %vm196_vm1, %v3686_v60, 0.0 }
  0xa9   :  { %v192_v39 = vadd.f32 %v191_v31, %v3688_v61  ;;  %v234_v43 = vadd.f32 %v233_v32, %v219_v26  ;;  %v198_v56 = vsel %vm196_vm1, %v3690_v62, 0.0  ;;  %v200_v57 = vsel %vm196_vm1, %v3692_v63, 0.0 }
  0xaa   :  { %v245_v58 = vadd.f32 %v244_v51, %v243_v50  ;;  %v199_v59 = vadd.f32 %v198_v56, %v197_v44  ;;  %v228_v11 = vmul.f32 %v3725_v36, %v3725_v36  ;;  %v246_v17 = vsel %vm196_vm1, %v226_v47, 0.0 }
  0xab   :  { %v193_v52 = vadd.f32 %v192_v39, %v178_v6  ;;  %v235_v55 = vadd.f32 %v234_v43, %v220_v27  ;;  %v229_v6 = vmul.f32 %v186_v46, %v186_v46  ;;  %v248_v21 = vsel %vm196_vm1, %v227_v48, 0.0 }
  0xac   :  { %v247_v18 = vadd.f32 %v246_v17, %v245_v58  ;;  %v201_v20 = vadd.f32 %v200_v57, %v199_v59  ;;  %v202_v22 = vsel %vm196_vm1, %v3694_v4, 0.0  ;;  %v250_v26 = vsel %vm196_vm1, %v228_v11, 0.0 }
  0xad   :  { %194 = vadd.xlane.f32.xlu1 %v193_v52  ;;  %v236_v10 = vadd.f32 %v235_v55, %v221_v35  ;;  %v204_v27 = vsel %vm196_vm1, %v3703_v19, 0.0  ;;  %v252_v32 = vsel %vm196_vm1, %v229_v6, 0.0  ;;  %v206_v33 = vsel %vm196_vm1, %v3718_v28, 0.0 }
  0xae   :  { %v249_v23 = vadd.f32 %v248_v21, %v247_v18  ;;  %v203_v25 = vadd.f32 %v202_v22, %v201_v20  ;;  %v208_v37 = vsel %vm196_vm1, %v3725_v36, 0.0  ;;  %v210_v39 = vsel %vm196_vm1, %v186_v46, 0.0  ;;  %v72_v21 = vld [vmem:[#allocation5] sm:$0xff] }
  0xaf   :  { %237 = vadd.xlane.f32.xlu0 %v236_v10  ;;  %v6820_v47 = vmov 2  }
  0xb0   :  { %v251_v29 = vadd.f32 %v250_v26, %v249_v23  ;;  %v205_v31 = vadd.f32 %v204_v27, %v203_v25  ;;  %3277 = vset.pattern.permute.xlu1 %v6820_v47  ;;  %v6814_v23 = vmov 6   ;;  %v73_v27 = vld [vmem:[#allocation5 + $0x8] sm:$0x3] }
  0xb2   :  { %v253_v34 = vadd.f32 %v252_v32, %v251_v29  ;;  %v207_v35 = vadd.f32 %v206_v33, %v205_v31  ;;  %v6818_v29 = vmov 3   ;;  %v6810_v31 = vmov 4  }
  0xb3   :  { %v6816_v32 = vmov 5   ;;  %v6808_v33 = vmov 7  }
  0xb4   :  { %254 = vadd.xlane.f32.xlu1 %v253_v34  ;;  %v209_v38 = vadd.f32 %v208_v37, %v207_v35 }
  0xb6   :  { %v211_v43 = vadd.f32 %v210_v39, %v209_v38  ;;  %v6806_v39 = vmov 8  }
  0xb8   :  { %212 = vadd.xlane.f32.xlu0 %v211_v43  ;;  %v6804_v43 = vmov 9  }
 0x136   :  { %v195_v48 = vpop.xlane.xlu1 %194 }
 0x137   :  { %v256_v50 = vmul.f32 0.001, %v195_v48 }
 0x138   :  { %v238_v51 = vpop.xlane.xlu0 %237 }
 0x139   :  { %v260_v44 = vmul.f32 %v256_v50, %v256_v50  ;;  %v258_v52 = vmul.f32 0.001, %v238_v51 }
 0x13b   :  { %v262_v55 = vsub.f32 %v258_v52, %v260_v44 }
 0x13d   :  { %v264_v56 = vadd.f32 1e-06, %v262_v55  ;;  %v255_v57 = vpop.xlane.xlu1 %254 }
 0x13e   :  { %v259_v10 = vmul.f32 0.001, %v255_v57 }
 0x13f   :  { %3354 = vrsqrt.f32 %v264_v56 }
 0x141   :  { %v213_v58 = vpop.xlane.xlu0 %212 }
 0x142   :  { %v257_v59 = vmul.f32 0.001, %v213_v58 }
 0x144   :  { %v261_v11 = vmul.f32 %v257_v59, %v257_v59 }
 0x146   :  { %v263_v17 = vsub.f32 %v259_v10, %v261_v11 }
 0x148   :  { %v265_v46 = vadd.f32 1e-06, %v263_v17 }
 0x14a   :  { %3356 = vrsqrt.f32 %v265_v46 }
 0x14c   :  { %v3355_v18 = vpop.eup %3354 }
 0x14d   :  { %v268_v20 = vmul.f32 %v3355_v18, %v3618_v2 }
 0x14f   :  { %v270_v6 = vmul.f32 %v268_v20, %v256_v50 }
 0x151   :  { %274 = vrot.lane.b32.xlu0 %v270_v6, %s3578_s0 }
 0x155   :  { %352 = vperm.xlu0 %3278, %v72_v21  }
 0x157   :  { %v3357_v22 = vpop.eup %3356 }
 0x158   :  { %v269_v25 = vmul.f32 %v3357_v22, %v3616_v1 }
 0x159   :  { %3283 = vset.pattern.permute.xlu0 %v6814_v23 }
 0x15a   :  { %689 = vperm.xlu0 %3283, %v72_v21   ;;  %v271_v26 = vmul.f32 %v269_v25, %v257_v59 }
 0x15c   :  { %276 = vrot.lane.b32.xlu1 %v271_v26, %s3578_s0 }
 0x15e   :  { %3286 = vset.pattern.permute.xlu0 %v6812_v3 }
 0x15f   :  { %413 = vperm.xlu0 %3286, %v73_v27  }
 0x160   :  { %284 = vperm.xlu1 %3277, %v268_v20  }
 0x163   :  { %3287 = vset.pattern.permute.xlu0 %v6818_v29 }
 0x164   :  { %521 = vperm.xlu0 %3287, %v72_v21   ;;  %289 = vperm.xlu1 %3277, %v269_v25  }
 0x168   :  { %3279 = vset.pattern.permute.xlu1 %v6812_v3 }
 0x169   :  { %409 = vperm.xlu1 %3279, %v72_v21  }
 0x16d   :  { %3280 = vset.pattern.permute.xlu1 %v6820_v47 }
 0x16e   :  { %465 = vperm.xlu1 %3280, %v72_v21  }
 0x172   :  { %3281 = vset.pattern.permute.xlu1 %v6810_v31 }
 0x173   :  { %577 = vperm.xlu1 %3281, %v72_v21  }
 0x177   :  { %3282 = vset.pattern.permute.xlu1 %v6816_v32 }
 0x178   :  { %633 = vperm.xlu1 %3282, %v72_v21  }
 0x17c   :  { %3284 = vset.pattern.permute.xlu1 %v6808_v33 }
 0x17d   :  { %745 = vperm.xlu1 %3284, %v72_v21  }
 0x181   :  { %3285 = vset.pattern.permute.xlu1 %v6822_v0 }
 0x182   :  { %357 = vperm.xlu1 %3285, %v73_v27  }
 0x186   :  { %3288 = vset.pattern.permute.xlu1 %v6820_v47 }
 0x187   :  { %469 = vperm.xlu1 %3288, %v73_v27  }
 0x18b   :  { %3289 = vset.pattern.permute.xlu1 %v6818_v29 }
 0x18c   :  { %525 = vperm.xlu1 %3289, %v73_v27  }
 0x1c3   :  { %v275_v34 = vpop.permute.xlu0 %274 }
 0x1c4   :  { %v280_v35 = vsub.f32 %v3618_v2, %v275_v34 }
 0x1c6   :  { %310 = vperm.xlu0 %3287, %v280_v35  }
 0x1ca   :  { %3290 = vset.pattern.permute.xlu0 %v6810_v31 }
 0x1cb   :  { %581 = vperm.xlu0 %3290, %v73_v27  }
 0x1ce   :  { %v277_v37 = vpop.permute.xlu1 %276 }
 0x1cf   :  { %3293 = vset.pattern.permute.xlu0 %v6808_v33  ;;  %v281_v38 = vsub.f32 %v3616_v1, %v277_v37 }
 0x1d0   :  { %749 = vperm.xlu0 %3293, %v73_v27   ;;  %v3792_v44 = vpop.permute.xlu0 %352 }
 0x1d1   :  { %315 = vperm.xlu1 %3289, %v281_v38  }
 0x1d4   :  { %3296 = vset.pattern.permute.xlu0 %v6806_v39 }
 0x1d5   :  { %805 = vperm.xlu0 %3296, %v73_v27   ;;  %3291 = vset.pattern.permute.xlu1 %v6816_v32  ;;  %v3796_v55 = vpop.permute.xlu0 %689 }
 0x1d6   :  { %637 = vperm.xlu1 %3291, %v73_v27   ;;  %7111 = vst [vmem:[#allocation21_spill] sm:$0xff] %v3796_v55 }
 0x1d9   :  { %3298 = vset.pattern.permute.xlu0 %v6810_v31 }
 0x1da   :  { %1061 = vperm.xlu0 %3298, %v3616_v1   ;;  %3292 = vset.pattern.permute.xlu1 %v6814_v23  ;;  %v3800_v57 = vpop.permute.xlu0 %413 }
 0x1db   :  { %693 = vperm.xlu1 %3292, %v73_v27   ;;  %v285_v1 = vpop.permute.xlu1 %284  ;;  %7112 = vst [vmem:[#allocation22_spill] sm:$0xff] %v3800_v57 }
 0x1dc   :  { %v292_v10 = vmul.f32 %v285_v1, %v3663_v40  ;;  %v293_v11 = vmul.f32 %v285_v1, %v3665_v41  ;;  %v294_v17 = vmul.f32 %v285_v1, %v3667_v42  ;;  %v295_v18 = vmul.f32 %v285_v1, %v3669_v45 }
 0x1dd   :  { %v296_v6 = vmul.f32 %v285_v1, %v3679_v53  ;;  %v297_v26 = vmul.f32 %v285_v1, %v3681_v54  ;;  %v298_v42 = vmul.f32 %v285_v1, %v3688_v61  ;;  %v299_v45 = vmul.f32 %v285_v1, %v3671_v49 }
 0x1de   :  { %3300 = vset.pattern.permute.xlu0 %v6816_v32 }
 0x1df   :  { %3294 = vset.pattern.permute.xlu1 %v6806_v39  ;;  %v290_v48 = vpop.permute.xlu1 %289 }
 0x1e0   :  { %801 = vperm.xlu1 %3294, %v72_v21   ;;  %v300_v37 = vmul.f32 %v290_v48, %v3686_v60  ;;  %v301_v54 = vmul.f32 %v290_v48, %v3690_v62  ;;  %v302_v38 = vmul.f32 %v290_v48, %v3692_v63  ;;  %v306_v61 = vmul.f32 %v290_v48, %v3725_v36 }
 0x1e1   :  { %v307_v1 = vmul.f32 %v290_v48, %v3710_v24 }
 0x1e4   :  { %3295 = vset.pattern.permute.xlu1 %v6804_v43  ;;  %v3788_v50 = vpop.permute.xlu1 %409 }
 0x1e5   :  { %857 = vperm.xlu1 %3295, %v72_v21  }
 0x1e9   :  { %861 = vperm.xlu1 %3295, %v73_v27   ;;  %v3790_v51 = vpop.permute.xlu1 %465 }
 0x1ed   :  { %3297 = vset.pattern.permute.xlu1 %v6810_v31 }
 0x1ee   :  { %1057 = vperm.xlu1 %3297, %v3618_v2   ;;  %v3794_v52 = vpop.permute.xlu1 %577  ;;  %v3804_v2 = vpop.permute.xlu0 %521 }
 0x1f2   :  { %3299 = vset.pattern.permute.xlu1 %v6816_v32 }
 0x1f3   :  { %v3798_v56 = vpop.permute.xlu1 %633 }
 0x1f8   :  { %v3802_v58 = vpop.permute.xlu1 %745 }
 0x1fd   :  { %v3806_v59 = vpop.permute.xlu1 %357 }
 0x1fe   :  { %7113 = vst [vmem:[#allocation23_spill] sm:$0xff] %v3806_v59 }
 0x202   :  { %v3812_v20 = vpop.permute.xlu1 %469 }
 0x203   :  { %7114 = vst [vmem:[#allocation24_spill] sm:$0xff] %v3812_v20 }
 0x207   :  { %v3816_v41 = vpop.permute.xlu1 %525 }
 0x208   :  { %7115 = vst [vmem:[#allocation25_spill] sm:$0xff] %v3816_v41 }
 0x241   :  { %v311_v46 = vpop.permute.xlu0 %310 }
 0x242   :  { %v318_v21 = vadd.f32 %v311_v46, %v292_v10  ;;  %v319_v22 = vadd.f32 %v311_v46, %v293_v11  ;;  %v320_v25 = vadd.f32 %v311_v46, %v294_v17  ;;  %v321_v27 = vadd.f32 %v311_v46, %v295_v18 }
 0x243   :  { %v322_v34 = vadd.f32 %v311_v46, %v296_v6  ;;  %v323_v40 = vadd.f32 %v311_v46, %v297_v26  ;;  %v324_v53 = vadd.f32 %v311_v46, %v298_v42  ;;  %v325_v35 = vadd.f32 %v311_v46, %v299_v45 }
 0x244   :  { %3358 = vtanh.f32 %v318_v21  ;;  %v303_v10 = vmul.f32 %v290_v48, %v3694_v4  ;;  %v304_v11 = vmul.f32 %v290_v48, %v3703_v19  ;;  %v305_v17 = vmul.f32 %v290_v48, %v3718_v28 }
 0x245   :  { %3360 = vtanh.f32 %v319_v22 }
 0x246   :  { %3362 = vtanh.f32 %v320_v25 }
 0x247   :  { %3364 = vtanh.f32 %v321_v27 }
 0x248   :  { %3366 = vtanh.f32 %v322_v34 }
 0x249   :  { %3368 = vtanh.f32 %v323_v40 }
 0x24a   :  { %3370 = vtanh.f32 %v324_v53 }
 0x24b   :  { %3372 = vtanh.f32 %v325_v35 }
 0x24c   :  { %v316_v18 = vpop.permute.xlu1 %315 }
 0x24d   :  { %v326_v6 = vadd.f32 %v316_v18, %v300_v37  ;;  %v327_v49 = vadd.f32 %v316_v18, %v301_v54  ;;  %v328_v60 = vadd.f32 %v316_v18, %v302_v38  ;;  %v329_v62 = vadd.f32 %v316_v18, %v303_v10 }
 0x24e   :  { %v330_v63 = vadd.f32 %v316_v18, %v304_v11  ;;  %v331_v21 = vadd.f32 %v316_v18, %v305_v17  ;;  %v332_v4 = vadd.f32 %v316_v18, %v306_v61  ;;  %v333_v36 = vadd.f32 %v316_v18, %v307_v1 }
 0x24f   :  { %3374 = vtanh.f32 %v326_v6 }
 0x250   :  { %3376 = vtanh.f32 %v327_v49  ;;  %v3892_v49 = vpop.permute.xlu0 %581 }
 0x251   :  { %v3828_v46 = vpop.eup %3358  ;;  %3378 = vtanh.f32 %v328_v60  ;;  %7120 = vst [vmem:[#allocation30_spill] sm:$0xff] %v3892_v49 }
 0x252   :  { %v3830_v22 = vpop.eup %3360  ;;  %v3834_v19 = vrot.slane %v3828_v46, %v3636_v9  ;;  %v3838_v28 = vrot.slane %v3828_v46, %v3639_v12  ;;  %v587_v26 = vrot.slane %v3828_v46, %v3642_v13  ;;  %3380 = vtanh.f32 %v329_v62 }
 0x253   :  { %v3840_v24 = vpop.eup %3362  ;;  %v3844_v48 = vrot.slane %v3830_v22, %v3636_v9  ;;  %v3848_v25 = vrot.slane %v3830_v22, %v3639_v12  ;;  %3382 = vtanh.f32 %v330_v63  ;;  %v591_v38 = vrot.slane %v3830_v22, %v3642_v13  ;;  %v3903_v63 = vpop.permute.xlu1 %637 }
 0x254   :  { %v3852_v27 = vpop.eup %3364  ;;  %v512_v34 = vmul.f32 %v3834_v19, %v3812_v20  ;;  %v3858_v40 = vrot.slane %v3840_v24, %v3639_v12  ;;  %v568_v42 = vmul.f32 %v3838_v28, %v3816_v41  ;;  %v595_v10 = vrot.slane %v3840_v24, %v3642_v13  ;;  %7121 = vst [vmem:[#allocation31_spill] sm:$0xff] %v3903_v63 }
 0x255   :  { %v3862_v45 = vpop.eup %3366  ;;  %v513_v53 = vmul.f32 %v3844_v48, %v3812_v20  ;;  %v3868_v35 = vrot.slane %v3852_v27, %v3639_v12  ;;  %v569_v37 = vmul.f32 %v3848_v25, %v3816_v41  ;;  %3384 = vtanh.f32 %v331_v21 }
 0x256   :  { %v3872_v54 = vpop.eup %3368  ;;  %v3880_v11 = vmul.f32 %v3858_v40, %v3816_v41  ;;  %v599_v17 = vrot.slane %v3852_v27, %v3642_v13  ;;  %v3888_v61 = vadd.f32 %v568_v42, %v512_v34  ;;  %3386 = vtanh.f32 %v332_v4 }
 0x257   :  { %v3886_v18 = vmul.f32 %v3868_v35, %v3816_v41  ;;  %v3890_v6 = vadd.f32 %v569_v37, %v513_v53  ;;  %3388 = vtanh.f32 %v333_v36  ;;  %v3896_v1 = vrot.slane %v3862_v45, %v3642_v13  ;;  %v3922_v39 = vpop.eup %3370  ;;  %v3967_v20 = vpop.permute.xlu1 %693 }
 0x258   :  { %7116 = vst [vmem:[#allocation26_spill] sm:$0xff] %v3880_v11  ;;  %7118 = vst [vmem:[#allocation28_spill] sm:$0xff] %v3888_v61  ;;  %v3900_v60 = vrot.slane %v3872_v54, %v3642_v13  ;;  %v616_v62 = vmul.f32 %v587_v26, %v3794_v52  ;;  %v617_v21 = vmul.f32 %v591_v38, %v3794_v52  ;;  %v3933_v3 = vpop.eup %3372 }
 0x259   :  { %7117 = vst [vmem:[#allocation27_spill] sm:$0xff] %v3886_v18  ;;  %7119 = vst [vmem:[#allocation29_spill] sm:$0xff] %v3890_v6  ;;  %v3907_v34 = vmul.f32 %v595_v10, %v3794_v52  ;;  %v3910_v4 = vmul.f32 %v599_v17, %v3794_v52  ;;  %v624_v36 = vmul.f32 %v587_v26, %v3892_v49 }
 0x25a   :  { %v625_v42 = vmul.f32 %v591_v38, %v3892_v49  ;;  %v643_v53 = vrot.slane %v3828_v46, %v3645_v14  ;;  %v647_v37 = vrot.slane %v3830_v22, %v3645_v14  ;;  %v3920_v43 = vrot.slane %v3840_v24, %v3645_v14  ;;  %7130 = vst [vmem:[#allocation40_spill] sm:$0xff] %v3967_v20 }
 0x25b   :  { %7122 = vst [vmem:[#allocation32_spill] sm:$0xff] %v3907_v34  ;;  %7123 = vst [vmem:[#allocation33_spill] sm:$0xff] %v3910_v4  ;;  %v626_v33 = vmul.f32 %v595_v10, %v3892_v49  ;;  %v3927_v31 = vrot.slane %v3852_v27, %v3645_v14  ;;  %v699_v26 = vrot.slane %v3828_v46, %v3648_v15 }
 0x25c   :  { %v703_v38 = vrot.slane %v3830_v22, %v3648_v15  ;;  %v672_v23 = vmul.f32 %v643_v53, %v3798_v56  ;;  %v673_v32 = vmul.f32 %v647_v37, %v3798_v56  ;;  %v680_v29 = vmul.f32 %v643_v53, %v3903_v63  ;;  %v3950_v61 = vpop.eup %3374 }
 0x25d   :  { %v681_v10 = vmul.f32 %v647_v37, %v3903_v63  ;;  %v627_v47 = vmul.f32 %v599_v17, %v3892_v49  ;;  %v3942_v0 = vmul.f32 %v3896_v1, %v3892_v49  ;;  %v3946_v5 = vmul.f32 %v3900_v60, %v3892_v49  ;;  %v3377_v18 = vpop.eup %3376 }
 0x25e   :  { %v682_v6 = vmul.f32 %v3920_v43, %v3903_v63  ;;  %v683_v53 = vmul.f32 %v3927_v31, %v3903_v63  ;;  %v3956_v37 = vrot.slane %v3840_v24, %v3648_v15  ;;  %v3960_v17 = vrot.slane %v3852_v27, %v3648_v15  ;;  %v3969_v63 = vpop.permute.xlu0 %749  ;;  %v3971_v57 = vpop.eup %3378 }
 0x25f   :  { %7124 = vst [vmem:[#allocation34_spill] sm:$0xff] %v3942_v0  ;;  %7125 = vst [vmem:[#allocation35_spill] sm:$0xff] %v3946_v5  ;;  %v728_v0 = vmul.f32 %v699_v26, %v3796_v55  ;;  %v3963_v5 = vadd.f32 %v672_v23, %v616_v62  ;;  %v3965_v11 = vadd.f32 %v673_v32, %v617_v21  ;;  %v3979_v62 = vpop.eup %3380 }
 0x260   :  { %7126 = vst [vmem:[#allocation36_spill] sm:$0xff] %v3956_v37  ;;  %7127 = vst [vmem:[#allocation37_spill] sm:$0xff] %v3960_v17  ;;  %v952_v49 = vadd.f32 %v680_v29, %v624_v36  ;;  %v953_v41 = vadd.f32 %v681_v10, %v625_v42  ;;  %v3973_v59 = vadd.f32 %v682_v6, %v626_v33  ;;  %v3988_v6 = vpop.eup %3382 }
 0x261   :  { %7128 = vst [vmem:[#allocation38_spill] sm:$0xff] %v3963_v5  ;;  %7129 = vst [vmem:[#allocation39_spill] sm:$0xff] %v3965_v11  ;;  %v729_v30 = vmul.f32 %v703_v38, %v3796_v55  ;;  %v736_v4 = vmul.f32 %v699_v26, %v3967_v20  ;;  %v755_v23 = vrot.slane %v3828_v46, %v3651_v16 }
 0x262   :  { %7131 = vst [vmem:[#allocation41_spill] sm:$0xff] %v3969_v63  ;;  %7132 = vst [vmem:[#allocation42_spill] sm:$0xff] %v3973_v59  ;;  %v737_v29 = vmul.f32 %v703_v38, %v3967_v20  ;;  %v759_v32 = vrot.slane %v3830_v22, %v3651_v16  ;;  %v763_v21 = vrot.slane %v3840_v24, %v3651_v16  ;;  %v4000_v10 = vpop.eup %3384 }
 0x263   :  { %v767_v33 = vrot.slane %v3852_v27, %v3651_v16  ;;  %7133 = vst [vmem:[#allocation43_spill] sm:$0xff] %v3988_v6  ;;  %v3992_v36 = vrot.slane %v3862_v45, %v3651_v16  ;;  %v3996_v42 = vrot.slane %v3872_v54, %v3651_v16  ;;  %v784_v26 = vmul.f32 %v755_v23, %v3802_v58  ;;  %v4008_v6 = vpop.eup %3386 }
 0x264   :  { %v792_v38 = vmul.f32 %v755_v23, %v3969_v63  ;;  %7134 = vst [vmem:[#allocation44_spill] sm:$0xff] %v4000_v10  ;;  %v738_v59 = vmul.f32 %v3956_v37, %v3967_v20  ;;  %v739_v11 = vmul.f32 %v3960_v17, %v3967_v20  ;;  %v785_v5 = vmul.f32 %v759_v32, %v3802_v58  ;;  %v4016_v15 = vpop.eup %3388 }
 0x265   :  { %v793_v34 = vmul.f32 %v759_v32, %v3969_v63  ;;  %7135 = vst [vmem:[#allocation45_spill] sm:$0xff] %v4008_v6  ;;  %v4010_v16 = vadd.f32 %v683_v53, %v627_v47  ;;  %v794_v55 = vmul.f32 %v763_v21, %v3969_v63  ;;  %v795_v23 = vmul.f32 %v767_v33, %v3969_v63  ;;  %v4034_v6 = vpop.permute.xlu0 %805 }
 0x266   :  { %v811_v10 = vrot.slane %v3950_v61, %v3630_v7  ;;  %v4019_v37 = vmul.f32 %v763_v21, %v3802_v58  ;;  %v4022_v20 = vmul.f32 %v767_v33, %v3802_v58  ;;  %v968_v32 = vadd.f32 %v792_v38, %v736_v4  ;;  %7142 = vst [vmem:[#allocation52_spill] sm:$0xff] %v4034_v6 }
 0x267   :  { %7136 = vst [vmem:[#allocation46_spill] sm:$0xff] %v4010_v16  ;;  %v969_v17 = vadd.f32 %v793_v34, %v737_v29  ;;  %v4026_v47 = vmul.f32 %v3992_v36, %v3969_v63  ;;  %v4030_v53 = vmul.f32 %v3996_v42, %v3969_v63  ;;  %v4032_v16 = vadd.f32 %v784_v26, %v728_v0  ;;  %v4043_v34 = vpop.permute.xlu1 %801 }
 0x268   :  { %7137 = vst [vmem:[#allocation47_spill] sm:$0xff] %v4019_v37  ;;  %7138 = vst [vmem:[#allocation48_spill] sm:$0xff] %v4022_v20  ;;  %v815_v21 = vrot.slane %v3377_v18, %v3630_v7  ;;  %v4037_v37 = vadd.f32 %v785_v5, %v729_v30  ;;  %v4039_v33 = vadd.f32 %v794_v55, %v738_v59 }
 0x269   :  { %7139 = vst [vmem:[#allocation49_spill] sm:$0xff] %v4026_v47  ;;  %7140 = vst [vmem:[#allocation50_spill] sm:$0xff] %v4030_v53  ;;  %v4041_v4 = vadd.f32 %v795_v23, %v739_v11  ;;  %v4047_v29 = vrot.slane %v3971_v57, %v3630_v7  ;;  %v4049_v38 = vadd.f32 %v968_v32, %v952_v49 }
 0x26a   :  { %7141 = vst [vmem:[#allocation51_spill] sm:$0xff] %v4032_v16  ;;  %7143 = vst [vmem:[#allocation53_spill] sm:$0xff] %v4037_v37  ;;  %v4051_v0 = vadd.f32 %v969_v17, %v953_v41  ;;  %v4055_v26 = vrot.slane %v3979_v62, %v3630_v7  ;;  %v4058_v5 = vmul.f32 %v811_v10, %v4043_v34 }
 0x26b   :  { %7144 = vst [vmem:[#allocation54_spill] sm:$0xff] %v4039_v33  ;;  %7145 = vst [vmem:[#allocation55_spill] sm:$0xff] %v4041_v4  ;;  %v4061_v30 = vmul.f32 %v815_v21, %v4043_v34  ;;  %v4064_v55 = vmul.f32 %v811_v10, %v4034_v6  ;;  %v4067_v59 = vmul.f32 %v815_v21, %v4034_v6 }
 0x26c   :  { %7146 = vst [vmem:[#allocation56_spill] sm:$0xff] %v4047_v29  ;;  %7147 = vst [vmem:[#allocation57_spill] sm:$0xff] %v4049_v38  ;;  %v4071_v41 = vrot.slane %v3828_v46, %v3630_v7  ;;  %v4075_v11 = vrot.slane %v3830_v22, %v3630_v7  ;;  %v4079_v49 = vrot.slane %v3840_v24, %v3630_v7 }
 0x26d   :  { %7148 = vst [vmem:[#allocation58_spill] sm:$0xff] %v4051_v0  ;;  %7149 = vst [vmem:[#allocation59_spill] sm:$0xff] %v4055_v26  ;;  %v4083_v17 = vrot.slane %v3852_v27, %v3630_v7  ;;  %v4087_v10 = vrot.slane %v3862_v45, %v3630_v7  ;;  %v4091_v23 = vrot.slane %v3950_v61, %v3633_v8 }
 0x26e   :  { %7150 = vst [vmem:[#allocation60_spill] sm:$0xff] %v4058_v5  ;;  %7151 = vst [vmem:[#allocation61_spill] sm:$0xff] %v4061_v30  ;;  %v4094_v32 = vrot.slane %v3377_v18, %v3633_v8  ;;  %v4098_v21 = vrot.slane %v3872_v54, %v3630_v7  ;;  %v4102_v0 = vrot.slane %v3922_v39, %v3630_v7 }
 0x26f   :  { %7152 = vst [vmem:[#allocation62_spill] sm:$0xff] %v4064_v55  ;;  %7153 = vst [vmem:[#allocation63_spill] sm:$0xff] %v4067_v59  ;;  %v4106_v38 = vrot.slane %v3933_v3, %v3630_v7  ;;  %v4110_v4 = vmul.f32 %v4071_v41, %v3792_v44  ;;  %v4114_v18 = vmul.f32 %v4075_v11, %v3792_v44 }
 0x270   :  { %7154 = vst [vmem:[#allocation64_spill] sm:$0xff] %v4071_v41  ;;  %7155 = vst [vmem:[#allocation65_spill] sm:$0xff] %v4075_v11  ;;  %v4118_v61 = vmul.f32 %v4079_v49, %v3792_v44  ;;  %v4122_v33 = vmul.f32 %v4083_v17, %v3792_v44  ;;  %v4126_v59 = vmul.f32 %v4087_v10, %v3792_v44 }
 0x271   :  { %7156 = vst [vmem:[#allocation66_spill] sm:$0xff] %v4079_v49  ;;  %7157 = vst [vmem:[#allocation67_spill] sm:$0xff] %v4083_v17  ;;  %v4130_v55 = vmul.f32 %v4098_v21, %v3792_v44  ;;  %v4134_v53 = vmul.f32 %v4102_v0, %v3792_v44  ;;  %v4138_v47 = vmul.f32 %v4106_v38, %v3792_v44 }
 0x272   :  { %7158 = vst [vmem:[#allocation68_spill] sm:$0xff] %v4087_v10  ;;  %7159 = vst [vmem:[#allocation69_spill] sm:$0xff] %v4091_v23  ;;  %v4142_v63 = vrot.slane %v3828_v46, %v3633_v8  ;;  %v4146_v10 = vrot.slane %v3830_v22, %v3633_v8  ;;  %v4158_v44 = vrot.slane %v3862_v45, %v3633_v8 }
 0x273   :  { %7160 = vst [vmem:[#allocation70_spill] sm:$0xff] %v4094_v32  ;;  %7161 = vst [vmem:[#allocation71_spill] sm:$0xff] %v4098_v21  ;;  %v4150_v21 = vrot.slane %v3840_v24, %v3633_v8  ;;  %v4162_v46 = vrot.slane %v3872_v54, %v3633_v8  ;;  %v4166_v22 = vrot.slane %v3922_v39, %v3633_v8 }
 0x274   :  { %7162 = vst [vmem:[#allocation72_spill] sm:$0xff] %v4102_v0  ;;  %7163 = vst [vmem:[#allocation73_spill] sm:$0xff] %v4106_v38  ;;  %v4154_v0 = vrot.slane %v3852_v27, %v3633_v8  ;;  %v4170_v38 = vrot.slane %v3933_v3, %v3633_v8  ;;  %v4174_v17 = vmul.f32 %v4142_v63, %v3788_v50 }
 0x275   :  { %7164 = vst [vmem:[#allocation74_spill] sm:$0xff] %v4142_v63  ;;  %7165 = vst [vmem:[#allocation75_spill] sm:$0xff] %v4146_v10  ;;  %v4178_v49 = vmul.f32 %v4146_v10, %v3788_v50  ;;  %v4182_v11 = vmul.f32 %v4150_v21, %v3788_v50  ;;  %v4190_v6 = vmul.f32 %v4158_v44, %v3788_v50 }
 0x276   :  { %7166 = vst [vmem:[#allocation76_spill] sm:$0xff] %v4150_v21  ;;  %7167 = vst [vmem:[#allocation77_spill] sm:$0xff] %v4154_v0  ;;  %v4186_v41 = vmul.f32 %v4154_v0, %v3788_v50  ;;  %v4194_v63 = vmul.f32 %v4162_v46, %v3788_v50  ;;  %v4198_v10 = vmul.f32 %v4166_v22, %v3788_v50 }
 0x277   :  { %7168 = vst [vmem:[#allocation78_spill] sm:$0xff] %v4158_v44  ;;  %7169 = vst [vmem:[#allocation79_spill] sm:$0xff] %v4162_v46  ;;  %v4202_v21 = vmul.f32 %v4170_v38, %v3788_v50  ;;  %v4206_v0 = vrot.slane %v3840_v24, %v3636_v9  ;;  %v4210_v44 = vrot.slane %v3852_v27, %v3636_v9 }
 0x278   :  { %7170 = vst [vmem:[#allocation80_spill] sm:$0xff] %v4166_v22  ;;  %7171 = vst [vmem:[#allocation81_spill] sm:$0xff] %v4170_v38  ;;  %v4214_v46 = vrot.slane %v3862_v45, %v3636_v9  ;;  %v4218_v22 = vrot.slane %v3872_v54, %v3636_v9  ;;  %v4222_v50 = vrot.slane %v3922_v39, %v3636_v9 }
 0x279   :  { %7172 = vst [vmem:[#allocation82_spill] sm:$0xff] %v4206_v0  ;;  %7173 = vst [vmem:[#allocation83_spill] sm:$0xff] %v4210_v44  ;;  %v4226_v24 = vrot.slane %v3933_v3, %v3636_v9  ;;  %v4230_v27 = vmul.f32 %v3834_v19, %v3790_v51  ;;  %v4234_v38 = vmul.f32 %v3844_v48, %v3790_v51 }
 0x27a   :  { %7174 = vst [vmem:[#allocation84_spill] sm:$0xff] %v4214_v46  ;;  %7175 = vst [vmem:[#allocation85_spill] sm:$0xff] %v4218_v22  ;;  %v4238_v37 = vmul.f32 %v4206_v0, %v3790_v51  ;;  %v4242_v16 = vmul.f32 %v4210_v44, %v3790_v51  ;;  %v4246_v9 = vmul.f32 %v4214_v46, %v3790_v51 }
 0x27b   :  { %7176 = vst [vmem:[#allocation86_spill] sm:$0xff] %v4222_v50  ;;  %7177 = vst [vmem:[#allocation87_spill] sm:$0xff] %v4226_v24  ;;  %v4250_v19 = vmul.f32 %v4218_v22, %v3790_v51  ;;  %v4254_v48 = vmul.f32 %v4222_v50, %v3790_v51  ;;  %v4258_v0 = vmul.f32 %v4226_v24, %v3790_v51 }
 0x27c   :  { %v4262_v44 = vrot.slane %v3862_v45, %v3639_v12  ;;  %v4266_v46 = vrot.slane %v3872_v54, %v3639_v12  ;;  %v4270_v22 = vrot.slane %v3922_v39, %v3639_v12  ;;  %v4274_v50 = vrot.slane %v3933_v3, %v3639_v12 }
 0x27d   :  { %7178 = vst [vmem:[#allocation88_spill] sm:$0xff] %v4258_v0  ;;  %v4278_v51 = vmul.f32 %v3838_v28, %v3804_v2  ;;  %v4282_v24 = vmul.f32 %v3848_v25, %v3804_v2  ;;  %v4286_v30 = vmul.f32 %v3858_v40, %v3804_v2  ;;  %v4290_v5 = vmul.f32 %v3868_v35, %v3804_v2 }
 0x27e   :  { %7179 = vst [vmem:[#allocation89_spill] sm:$0xff] %v4262_v44  ;;  %7180 = vst [vmem:[#allocation90_spill] sm:$0xff] %v4266_v46  ;;  %v4294_v12 = vmul.f32 %v4262_v44, %v3804_v2  ;;  %v4298_v28 = vmul.f32 %v4266_v46, %v3804_v2  ;;  %v4302_v25 = vmul.f32 %v4270_v22, %v3804_v2 }
 0x27f   :  { %7181 = vst [vmem:[#allocation91_spill] sm:$0xff] %v4270_v22  ;;  %7182 = vst [vmem:[#allocation92_spill] sm:$0xff] %v4274_v50  ;;  %v4306_v40 = vmul.f32 %v4274_v50, %v3804_v2  ;;  %v4310_v35 = vrot.slane %v3922_v39, %v3642_v13  ;;  %v4314_v44 = vrot.slane %v3933_v3, %v3642_v13 }
 0x280   :  { %7183 = vst [vmem:[#allocation93_spill] sm:$0xff] %v4302_v25  ;;  %v4318_v46 = vmul.f32 %v3896_v1, %v3794_v52  ;;  %v4322_v22 = vmul.f32 %v3900_v60, %v3794_v52  ;;  %v4326_v2 = vrot.slane %v3862_v45, %v3645_v14  ;;  %v4334_v13 = vrot.slane %v3872_v54, %v3645_v14 }
 0x281   :  { %7184 = vst [vmem:[#allocation94_spill] sm:$0xff] %v4306_v40  ;;  %7185 = vst [vmem:[#allocation95_spill] sm:$0xff] %v4310_v35  ;;  %v4330_v50 = vmul.f32 %v4310_v35, %v3794_v52  ;;  %v4338_v1 = vrot.slane %v3922_v39, %v3645_v14  ;;  %v4342_v60 = vrot.slane %v3933_v3, %v3645_v14 }
 0x282   :  { %7186 = vst [vmem:[#allocation96_spill] sm:$0xff] %v4314_v44  ;;  %7187 = vst [vmem:[#allocation97_spill] sm:$0xff] %v4318_v46  ;;  %v4346_v20 = vmul.f32 %v4314_v44, %v3794_v52  ;;  %v4350_v35 = vmul.f32 %v3920_v43, %v3798_v56  ;;  %v4362_v14 = vmul.f32 %v4334_v13, %v3798_v56  ;;  %v7201_v44 = vld [vmem:[#allocation18_spill] sm:$0xff] }
 0x283   :  { %7188 = vst [vmem:[#allocation98_spill] sm:$0xff] %v4322_v22  ;;  %7189 = vst [vmem:[#allocation99_spill] sm:$0xff] %v4326_v2  ;;  %v4358_v22 = vmul.f32 %v4326_v2, %v3798_v56  ;;  %v4366_v52 = vmul.f32 %v4338_v1, %v3798_v56  ;;  %v4370_v43 = vmul.f32 %v4342_v60, %v3798_v56 }
 0x284   :  { %7190 = vst [vmem:[#allocation100_spill] sm:$0xff] %v4330_v50  ;;  %7191 = vst [vmem:[#allocation101_spill] sm:$0xff] %v4334_v13  ;;  %v4354_v50 = vmul.f32 %v3927_v31, %v3798_v56  ;;  %v4374_v31 = vrot.slane %v3862_v45, %v7201_v44  ;;  %v4378_v2 = vrot.slane %v3872_v54, %v7201_v44 }
 0x285   :  { %7192 = vst [vmem:[#allocation102_spill] sm:$0xff] %v4338_v1  ;;  %7193 = vst [vmem:[#allocation103_spill] sm:$0xff] %v4342_v60  ;;  %v4382_v13 = vrot.slane %v3922_v39, %v7201_v44  ;;  %v4386_v1 = vrot.slane %v3933_v3, %v7201_v44  ;;  %v7208_v60 = vld [vmem:[#allocation37_spill] sm:$0xff]  ;;  %v4444_v40 = vrot.slane %v3979_v62, %v3633_v8 }
 0x286   :  { %7194 = vst [vmem:[#allocation104_spill] sm:$0xff] %v4346_v20  ;;  %7195 = vst [vmem:[#allocation105_spill] sm:$0xff] %v4350_v35  ;;  %v7206_v20 = vld [vmem:[#allocation21_spill] sm:$0xff]  ;;  %v4440_v35 = vrot.slane %v3971_v57, %v3633_v8 }
 0x287   :  { %7196 = vst [vmem:[#allocation106_spill] sm:$0xff] %v4354_v50  ;;  %7197 = vst [vmem:[#allocation107_spill] sm:$0xff] %v4358_v22  ;;  %v732_v45 = vmul.f32 %v4374_v31, %v7206_v20  ;;  %v733_v44 = vmul.f32 %v4378_v2, %v7206_v20  ;;  %v7214_v50 = vld [vmem:[#allocation44_spill] sm:$0xff] }
 0x288   :  { %7198 = vst [vmem:[#allocation108_spill] sm:$0xff] %v4362_v14  ;;  %7199 = vst [vmem:[#allocation109_spill] sm:$0xff] %v4366_v52  ;;  %v7207_v52 = vld [vmem:[#allocation36_spill] sm:$0xff]  ;;  %v7209_v14 = vld [vmem:[#allocation19_spill] sm:$0xff]  ;;  %v4458_v57 = vrot.slane %v7214_v50, %v3633_v8 }
 0x289   :  { %7200 = vst [vmem:[#allocation110_spill] sm:$0xff] %v4370_v43  ;;  %7202 = vst [vmem:[#allocation111_spill] sm:$0xff] %v4374_v31  ;;  %v730_v56 = vmul.f32 %v7207_v52, %v7206_v20  ;;  %v731_v43 = vmul.f32 %v7208_v60, %v7206_v20  ;;  %v4396_v54 = vrot.slane %v3922_v39, %v7209_v14 }
 0x28a   :  { %7203 = vst [vmem:[#allocation112_spill] sm:$0xff] %v4378_v2  ;;  %7204 = vst [vmem:[#allocation113_spill] sm:$0xff] %v4382_v13  ;;  %v4400_v22 = vrot.slane %v3933_v3, %v7209_v14  ;;  %v734_v52 = vmul.f32 %v4382_v13, %v7206_v20  ;;  %v735_v60 = vmul.f32 %v4386_v1, %v7206_v20  ;;  %v7212_v14 = vld [vmem:[#allocation43_spill] sm:$0xff]  ;;  %v858_v13 = vpop.permute.xlu1 %857 }
 0x28b   :  { %7205 = vst [vmem:[#allocation114_spill] sm:$0xff] %v4386_v1  ;;  %7210 = vst [vmem:[#allocation21_spill] sm:$0xff] %v4396_v54  ;;  %v788_v31 = vmul.f32 %v3992_v36, %v3802_v58  ;;  %v789_v39 = vmul.f32 %v3996_v42, %v3802_v58  ;;  %v790_v46 = vmul.f32 %v4396_v54, %v3802_v58  ;;  %v7216_v36 = vld [vmem:[#allocation45_spill] sm:$0xff] }
 0x28c   :  { %7211 = vst [vmem:[#allocation36_spill] sm:$0xff] %v4400_v22  ;;  %v791_v3 = vmul.f32 %v4400_v22, %v3802_v58  ;;  %v4418_v2 = vrot.slane %v7212_v14, %v3630_v7  ;;  %v4422_v20 = vrot.slane %v7214_v50, %v3630_v7  ;;  %v4426_v1 = vrot.slane %v7216_v36, %v3630_v7 }
 0x28d   :  { %v4430_v42 = vrot.slane %v4016_v15, %v3630_v7  ;;  %v842_v58 = vmul.f32 %v4047_v29, %v4043_v34  ;;  %v843_v22 = vmul.f32 %v4055_v26, %v4043_v34  ;;  %7219 = vst [vmem:[#allocation115_spill] sm:$0xff] %v4440_v35  ;;  %7220 = vst [vmem:[#allocation116_spill] sm:$0xff] %v4444_v40 }
 0x28e   :  { %7213 = vst [vmem:[#allocation37_spill] sm:$0xff] %v4418_v2  ;;  %7215 = vst [vmem:[#allocation43_spill] sm:$0xff] %v4422_v20  ;;  %v844_v54 = vmul.f32 %v4418_v2, %v4043_v34  ;;  %v845_v7 = vmul.f32 %v4422_v20, %v4043_v34  ;;  %v846_v29 = vmul.f32 %v4426_v1, %v4043_v34 }
 0x28f   :  { %7217 = vst [vmem:[#allocation44_spill] sm:$0xff] %v4426_v1  ;;  %7218 = vst [vmem:[#allocation45_spill] sm:$0xff] %v4430_v42  ;;  %v847_v26 = vmul.f32 %v4430_v42, %v4043_v34  ;;  %v4454_v2 = vrot.slane %v7212_v14, %v3633_v8  ;;  %v4462_v62 = vrot.slane %v7216_v36, %v3633_v8 }
 0x290   :  { %7222 = vst [vmem:[#allocation118_spill] sm:$0xff] %v4458_v57  ;;  %v4466_v20 = vrot.slane %v4016_v15, %v3633_v8  ;;  %v896_v1 = vmul.f32 %v4091_v23, %v858_v13  ;;  %v897_v34 = vmul.f32 %v4094_v32, %v858_v13  ;;  %v898_v42 = vmul.f32 %v4440_v35, %v858_v13 }
 0x291   :  { %7221 = vst [vmem:[#allocation117_spill] sm:$0xff] %v4454_v2  ;;  %7223 = vst [vmem:[#allocation119_spill] sm:$0xff] %v4462_v62  ;;  %v899_v14 = vmul.f32 %v4444_v40, %v858_v13  ;;  %v900_v0 = vmul.f32 %v4454_v2, %v858_v13  ;;  %v901_v50 = vmul.f32 %v4458_v57, %v858_v13 }
 0x292   :  { %7224 = vst [vmem:[#allocation120_spill] sm:$0xff] %v4466_v20  ;;  %v902_v25 = vmul.f32 %v4462_v62, %v858_v13  ;;  %v903_v36 = vmul.f32 %v4466_v20, %v858_v13  ;;  %v912_v15 = vadd.f32 %v4174_v17, %v4110_v4  ;;  %v913_v8 = vadd.f32 %v4178_v49, %v4114_v18  ;;  %v7230_v18 = vld [vmem:[#allocation33_spill] sm:$0xff]  ;;  %v7240_v20 = vld [vmem:[#allocation47_spill] sm:$0xff] }
 0x293   :  { %v914_v32 = vadd.f32 %v4182_v11, %v4118_v61  ;;  %v915_v40 = vadd.f32 %v4186_v41, %v4122_v33  ;;  %v916_v2 = vadd.f32 %v4190_v6, %v4126_v59  ;;  %v917_v62 = vadd.f32 %v4194_v63, %v4130_v55  ;;  %v7226_v59 = vld [vmem:[#allocation88_spill] sm:$0xff]  ;;  %v7227_v41 = vld [vmem:[#allocation94_spill] sm:$0xff]  ;;  %v7232_v61 = vld [vmem:[#allocation97_spill] sm:$0xff] }
 0x294   :  { %v918_v13 = vadd.f32 %v4198_v10, %v4134_v53  ;;  %v919_v4 = vadd.f32 %v4202_v21, %v4138_v47  ;;  %v928_v49 = vadd.f32 %v4278_v51, %v4230_v27  ;;  %v929_v11 = vadd.f32 %v4282_v24, %v4234_v38  ;;  %v7225_v47 = vld [vmem:[#allocation93_spill] sm:$0xff]  ;;  %v7228_v10 = vld [vmem:[#allocation32_spill] sm:$0xff]  ;;  %v7234_v24 = vld [vmem:[#allocation98_spill] sm:$0xff] }
 0x295   :  { %v930_v33 = vadd.f32 %v4286_v30, %v4238_v37  ;;  %v931_v6 = vadd.f32 %v4290_v5, %v4242_v16  ;;  %v932_v63 = vadd.f32 %v4294_v12, %v4246_v9  ;;  %v933_v53 = vadd.f32 %v4298_v28, %v4250_v19  ;;  %v7229_v38 = vld [vmem:[#allocation105_spill] sm:$0xff]  ;;  %v7231_v37 = vld [vmem:[#allocation106_spill] sm:$0xff]  ;;  %v7233_v16 = vld [vmem:[#allocation107_spill] sm:$0xff] }
 0x296   :  { %v934_v55 = vadd.f32 %v7225_v47, %v4254_v48  ;;  %v935_v17 = vadd.f32 %v7227_v41, %v7226_v59  ;;  %v946_v21 = vadd.f32 %v7229_v38, %v7228_v10  ;;  %v947_v30 = vadd.f32 %v7231_v37, %v7230_v18  ;;  %v7235_v9 = vld [vmem:[#allocation108_spill] sm:$0xff]  ;;  %v7237_v19 = vld [vmem:[#allocation109_spill] sm:$0xff]  ;;  %v7239_v48 = vld [vmem:[#allocation110_spill] sm:$0xff] }
 0x297   :  { %v948_v5 = vadd.f32 %v7233_v16, %v7232_v61  ;;  %v949_v12 = vadd.f32 %v7235_v9, %v7234_v24  ;;  %v7236_v27 = vld [vmem:[#allocation100_spill] sm:$0xff]  ;;  %v962_v59 = vadd.f32 %v7240_v20, %v730_v56  ;;  %v964_v10 = vadd.f32 %v788_v31, %v732_v45  ;;  %v4523_v61 = vpop.permute.xlu1 %861  ;;  %v7243_v16 = vld [vmem:[#allocation61_spill] sm:$0xff] }
 0x298   :  { %v950_v51 = vadd.f32 %v7237_v19, %v7236_v27  ;;  %v7238_v28 = vld [vmem:[#allocation104_spill] sm:$0xff]  ;;  %v965_v38 = vadd.f32 %v789_v39, %v733_v44  ;;  %v966_v35 = vadd.f32 %v790_v46, %v734_v52  ;;  %v967_v18 = vadd.f32 %v791_v3, %v735_v60  ;;  %v7244_v60 = vld [vmem:[#allocation38_spill] sm:$0xff]  ;;  %v7246_v3 = vld [vmem:[#allocation39_spill] sm:$0xff] }
 0x299   :  { %v951_v47 = vadd.f32 %v7239_v48, %v7238_v28  ;;  %v7241_v41 = vld [vmem:[#allocation48_spill] sm:$0xff]  ;;  %v977_v24 = vadd.f32 %v897_v34, %v7243_v16  ;;  %v978_v9 = vadd.f32 %v898_v42, %v842_v58  ;;  %v979_v19 = vadd.f32 %v899_v14, %v843_v22  ;;  %v7263_v16 = vld [vmem:[#allocation70_spill] sm:$0xff] }
 0x29a   :  { %v963_v57 = vadd.f32 %v7241_v41, %v731_v43  ;;  %v7242_v37 = vld [vmem:[#allocation60_spill] sm:$0xff]  ;;  %v980_v27 = vadd.f32 %v900_v0, %v844_v54  ;;  %v981_v28 = vadd.f32 %v901_v50, %v845_v7  ;;  %v982_v48 = vadd.f32 %v902_v25, %v846_v29 }
 0x29b   :  { %v976_v23 = vadd.f32 %v896_v1, %v7242_v37  ;;  %v983_v20 = vadd.f32 %v903_v36, %v847_v26  ;;  %v992_v56 = vadd.f32 %v928_v49, %v912_v15  ;;  %v993_v41 = vadd.f32 %v929_v11, %v913_v8  ;;  %v7245_v1 = vld [vmem:[#allocation51_spill] sm:$0xff]  ;;  %v7247_v37 = vld [vmem:[#allocation53_spill] sm:$0xff]  ;;  %v1058_v8 = vpop.permute.xlu1 %1057 }
 0x29c   :  { %v994_v43 = vadd.f32 %v930_v33, %v914_v32  ;;  %v995_v31 = vadd.f32 %v931_v6, %v915_v40  ;;  %v996_v45 = vadd.f32 %v932_v63, %v916_v2  ;;  %v997_v44 = vadd.f32 %v933_v53, %v917_v62 }
 0x29d   :  { %v998_v46 = vadd.f32 %v934_v55, %v918_v13  ;;  %v999_v52 = vadd.f32 %v935_v17, %v919_v4  ;;  %v1008_v39 = vadd.f32 %v7245_v1, %v7244_v60  ;;  %v1009_v34 = vadd.f32 %v7247_v37, %v7246_v3  ;;  %v7269_v3 = vld [vmem:[#allocation66_spill] sm:$0xff] }
 0x29e   :  { %v1010_v42 = vadd.f32 %v962_v59, %v946_v21  ;;  %v1011_v22 = vadd.f32 %v963_v57, %v947_v30  ;;  %v1012_v0 = vadd.f32 %v964_v10, %v948_v5  ;;  %v1013_v7 = vadd.f32 %v965_v38, %v949_v12  ;;  %v7256_v30 = vld [vmem:[#allocation52_spill] sm:$0xff]  ;;  %v7261_v38 = vld [vmem:[#allocation69_spill] sm:$0xff] }
 0x29f   :  { %v1014_v29 = vadd.f32 %v966_v35, %v950_v51  ;;  %v1015_v26 = vadd.f32 %v967_v18, %v951_v47  ;;  %v1024_v25 = vadd.f32 %v1008_v39, %v992_v56  ;;  %v1025_v32 = vadd.f32 %v1009_v34, %v993_v41  ;;  %v7257_v5 = vld [vmem:[#allocation56_spill] sm:$0xff]  ;;  %v7259_v51 = vld [vmem:[#allocation59_spill] sm:$0xff] }
 0x2a0   :  { %v1026_v40 = vadd.f32 %v1010_v42, %v994_v43  ;;  %v1027_v2 = vadd.f32 %v1011_v22, %v995_v31  ;;  %v1028_v54 = vadd.f32 %v1012_v0, %v996_v45  ;;  %v1029_v58 = vadd.f32 %v1013_v7, %v997_v44  ;;  %v7266_v31 = vld [vmem:[#allocation23_spill] sm:$0xff]  ;;  %v7267_v45 = vld [vmem:[#allocation64_spill] sm:$0xff] }
 0x2a1   :  { %v1030_v62 = vadd.f32 %v1014_v29, %v998_v46  ;;  %v1031_v14 = vadd.f32 %v1015_v26, %v999_v52  ;;  %v1040_v50 = vadd.f32 %v1024_v25, %v976_v23  ;;  %v1041_v36 = vadd.f32 %v1025_v32, %v977_v24  ;;  %v7268_v46 = vld [vmem:[#allocation65_spill] sm:$0xff]  ;;  %v7270_v34 = vld [vmem:[#allocation67_spill] sm:$0xff]  ;;  %v7271_v22 = vld [vmem:[#allocation68_spill] sm:$0xff] }
 0x2a2   :  { %v1042_v15 = vadd.f32 %v1026_v40, %v978_v9  ;;  %v1043_v13 = vadd.f32 %v1027_v2, %v979_v19  ;;  %v1044_v4 = vadd.f32 %v1028_v54, %v980_v27  ;;  %v1045_v49 = vadd.f32 %v1029_v58, %v981_v28  ;;  %v7265_v9 = vld [vmem:[#allocation20_spill] sm:$0xff]  ;;  %v7272_v7 = vld [vmem:[#allocation71_spill] sm:$0xff]  ;;  %v7274_v40 = vld [vmem:[#allocation73_spill] sm:$0xff] }
 0x2a3   :  { %v1046_v57 = vadd.f32 %v1030_v62, %v982_v48  ;;  %v1047_v11 = vadd.f32 %v1031_v14, %v983_v20  ;;  %v4530_v33 = vadd.f32 %v1058_v8, %v1040_v50  ;;  %v4532_v35 = vadd.f32 %v1058_v8, %v1041_v36  ;;  %v7273_v26 = vld [vmem:[#allocation72_spill] sm:$0xff]  ;;  %v7275_v54 = vld [vmem:[#allocation22_spill] sm:$0xff]  ;;  %v7277_v14 = vld [vmem:[#allocation75_spill] sm:$0xff] }
 0x2a4   :  { %v4534_v6 = vadd.f32 %v1058_v8, %v1042_v15  ;;  %v4536_v63 = vadd.f32 %v1058_v8, %v1043_v13  ;;  %v4538_v53 = vadd.f32 %v1058_v8, %v1044_v4  ;;  %v4540_v55 = vadd.f32 %v1058_v8, %v1045_v49  ;;  %v7276_v58 = vld [vmem:[#allocation74_spill] sm:$0xff]  ;;  %v7278_v36 = vld [vmem:[#allocation76_spill] sm:$0xff]  ;;  %v7279_v13 = vld [vmem:[#allocation77_spill] sm:$0xff] }
 0x2a5   :  { %7248 = vst [vmem:[#allocation93_spill] sm:$0xff] %v4530_v33  ;;  %7249 = vst [vmem:[#allocation88_spill] sm:$0xff] %v4532_v35  ;;  %v4542_v23 = vadd.f32 %v1058_v8, %v1046_v57  ;;  %v4544_v17 = vadd.f32 %v1058_v8, %v1047_v11  ;;  %v1122_v21 = vmul.f32 %v4530_v33, %v4530_v33  ;;  %v7280_v49 = vld [vmem:[#allocation78_spill] sm:$0xff] }
 0x2a6   :  { %7250 = vst [vmem:[#allocation94_spill] sm:$0xff] %v4534_v6  ;;  %7251 = vst [vmem:[#allocation32_spill] sm:$0xff] %v4536_v63  ;;  %v4550_v12 = vmul.f32 %v7257_v5, %v7256_v30  ;;  %v4554_v47 = vmul.f32 %v7259_v51, %v7256_v30  ;;  %v1096_v59 = vadd.f32 %v4532_v35, %v4530_v33  ;;  %v7281_v5 = vld [vmem:[#allocation79_spill] sm:$0xff] }
 0x2a7   :  { %7252 = vst [vmem:[#allocation105_spill] sm:$0xff] %v4538_v53  ;;  %7253 = vst [vmem:[#allocation33_spill] sm:$0xff] %v4540_v55  ;;  %v1123_v10 = vmul.f32 %v4532_v35, %v4532_v35  ;;  %v4562_v18 = vmul.f32 %v7261_v38, %v4523_v61  ;;  %v4566_v24 = vmul.f32 %v7263_v16, %v4523_v61  ;;  %v7283_v38 = vld [vmem:[#allocation81_spill] sm:$0xff] }
 0x2a8   :  { %7254 = vst [vmem:[#allocation106_spill] sm:$0xff] %v4542_v23  ;;  %7255 = vst [vmem:[#allocation97_spill] sm:$0xff] %v4544_v17  ;;  %v1087_v19 = vmul.f32 %v7265_v9, %v4544_v17  ;;  %v1124_v27 = vmul.f32 %v4534_v6, %v4534_v6  ;;  %v1097_v28 = vadd.f32 %v1096_v59, %v4534_v6  ;;  %v7282_v59 = vld [vmem:[#allocation80_spill] sm:$0xff]  ;;  %v7310_v17 = vld [vmem:[#allocation21_spill] sm:$0xff] }
 0x2a9   :  { %7258 = vst [vmem:[#allocation107_spill] sm:$0xff] %v4550_v12  ;;  %7260 = vst [vmem:[#allocation98_spill] sm:$0xff] %v4554_v47  ;;  %v1125_v48 = vmul.f32 %v4536_v63, %v4536_v63  ;;  %v1126_v20 = vmul.f32 %v4538_v53, %v4538_v53  ;;  %v1138_v56 = vadd.f32 %v1123_v10, %v1122_v21  ;;  %v7322_v12 = vld [vmem:[#allocation26_spill] sm:$0xff] }
 0x2aa   :  { %7262 = vst [vmem:[#allocation108_spill] sm:$0xff] %v4562_v18  ;;  %7264 = vst [vmem:[#allocation100_spill] sm:$0xff] %v4566_v24  ;;  %v1127_v41 = vmul.f32 %v4540_v55, %v4540_v55  ;;  %v1128_v43 = vmul.f32 %v4542_v23, %v4542_v23  ;;  %v400_v44 = vmul.f32 %v7267_v45, %v7266_v31  ;;  %v7287_v45 = vld [vmem:[#allocation84_spill] sm:$0xff] }
 0x2ab   :  { %v401_v52 = vmul.f32 %v7268_v46, %v7266_v31  ;;  %v1098_v60 = vadd.f32 %v1097_v28, %v4536_v63  ;;  %v1129_v1 = vmul.f32 %v1087_v19, %v1087_v19  ;;  %v1139_v39 = vadd.f32 %v1138_v56, %v1124_v27  ;;  %v7284_v27 = vld [vmem:[#allocation24_spill] sm:$0xff]  ;;  %v7285_v28 = vld [vmem:[#allocation82_spill] sm:$0xff]  ;;  %v7286_v56 = vld [vmem:[#allocation83_spill] sm:$0xff] }
 0x2ac   :  { %v402_v37 = vmul.f32 %v7269_v3, %v7266_v31  ;;  %v403_v42 = vmul.f32 %v7270_v34, %v7266_v31  ;;  %v404_v0 = vmul.f32 %v7271_v22, %v7266_v31  ;;  %v405_v29 = vmul.f32 %v7272_v7, %v7266_v31  ;;  %v7289_v34 = vld [vmem:[#allocation86_spill] sm:$0xff]  ;;  %v7290_v7 = vld [vmem:[#allocation87_spill] sm:$0xff] }
 0x2ad   :  { %v406_v25 = vmul.f32 %v7273_v26, %v7266_v31  ;;  %v1099_v8 = vadd.f32 %v1098_v60, %v4538_v53  ;;  %v1140_v32 = vadd.f32 %v1139_v39, %v1125_v48  ;;  %v407_v2 = vmul.f32 %v7274_v40, %v7266_v31  ;;  %v7288_v39 = vld [vmem:[#allocation85_spill] sm:$0xff] }
 0x2ae   :  { %v456_v62 = vmul.f32 %v7276_v58, %v7275_v54  ;;  %v457_v50 = vmul.f32 %v7277_v14, %v7275_v54  ;;  %v458_v15 = vmul.f32 %v7278_v36, %v7275_v54  ;;  %v459_v4 = vmul.f32 %v7279_v13, %v7275_v54  ;;  %v7294_v14 = vld [vmem:[#allocation91_spill] sm:$0xff] }
 0x2af   :  { %v460_v57 = vmul.f32 %v7280_v49, %v7275_v54  ;;  %v1100_v11 = vadd.f32 %v1099_v8, %v4540_v55  ;;  %v1141_v21 = vadd.f32 %v1140_v32, %v1126_v20  ;;  %v461_v51 = vmul.f32 %v7281_v5, %v7275_v54  ;;  %v7291_v8 = vld [vmem:[#allocation25_spill] sm:$0xff]  ;;  %v7295_v49 = vld [vmem:[#allocation92_spill] sm:$0xff]  ;;  %v7297_v5 = vld [vmem:[#allocation95_spill] sm:$0xff] }
 0x2b0   :  { %v462_v10 = vmul.f32 %v7282_v59, %v7275_v54  ;;  %v463_v16 = vmul.f32 %v7283_v38, %v7275_v54  ;;  %v514_v48 = vmul.f32 %v7285_v28, %v7284_v27  ;;  %v515_v31 = vmul.f32 %v7286_v56, %v7284_v27  ;;  %v7292_v32 = vld [vmem:[#allocation89_spill] sm:$0xff]  ;;  %v7293_v54 = vld [vmem:[#allocation90_spill] sm:$0xff]  ;;  %v7298_v38 = vld [vmem:[#allocation96_spill] sm:$0xff] }
 0x2b1   :  { %v516_v46 = vmul.f32 %v7287_v45, %v7284_v27  ;;  %v1101_v20 = vadd.f32 %v1100_v11, %v4542_v23  ;;  %v1142_v60 = vadd.f32 %v1141_v21, %v1127_v41  ;;  %v517_v3 = vmul.f32 %v7288_v39, %v7284_v27  ;;  %v7296_v21 = vld [vmem:[#allocation30_spill] sm:$0xff]  ;;  %v7299_v28 = vld [vmem:[#allocation31_spill] sm:$0xff]  ;;  %v7301_v39 = vld [vmem:[#allocation101_spill] sm:$0xff] }
 0x2b2   :  { %v518_v22 = vmul.f32 %v7289_v34, %v7284_v27  ;;  %v519_v26 = vmul.f32 %v7290_v7, %v7284_v27  ;;  %v572_v40 = vmul.f32 %v7292_v32, %v7291_v8  ;;  %v573_v58 = vmul.f32 %v7293_v54, %v7291_v8  ;;  %v7300_v56 = vld [vmem:[#allocation99_spill] sm:$0xff]  ;;  %v7302_v7 = vld [vmem:[#allocation102_spill] sm:$0xff] }
 0x2b3   :  { %v574_v36 = vmul.f32 %v7294_v14, %v7291_v8  ;;  %v1102_v13 = vadd.f32 %v1101_v20, %v1087_v19  ;;  %v1143_v41 = vadd.f32 %v1142_v60, %v1128_v43  ;;  %v575_v11 = vmul.f32 %v7295_v49, %v7291_v8  ;;  %v7303_v43 = vld [vmem:[#allocation103_spill] sm:$0xff]  ;;  %v7304_v60 = vld [vmem:[#allocation40_spill] sm:$0xff] }
 0x2b4   :  { %v630_v59 = vmul.f32 %v7297_v5, %v7296_v21  ;;  %v631_v27 = vmul.f32 %v7298_v38, %v7296_v21  ;;  %v684_v45 = vmul.f32 %v7300_v56, %v7299_v28  ;;  %v685_v34 = vmul.f32 %v7301_v39, %v7299_v28  ;;  %v7305_v8 = vld [vmem:[#allocation111_spill] sm:$0xff]  ;;  %v7306_v14 = vld [vmem:[#allocation112_spill] sm:$0xff]  ;;  %v7307_v21 = vld [vmem:[#allocation113_spill] sm:$0xff] }
 0x2b5   :  { %v686_v32 = vmul.f32 %v7302_v7, %v7299_v28  ;;  %1103 = vadd.xlane.f32.xlu1 %v1102_v13  ;;  %v1144_v19 = vadd.f32 %v1143_v41, %v1129_v1  ;;  %v687_v20 = vmul.f32 %v7303_v43, %v7299_v28  ;;  %v740_v54 = vmul.f32 %v7305_v8, %v7304_v60  ;;  %v7308_v38 = vld [vmem:[#allocation114_spill] sm:$0xff]  ;;  %v7309_v39 = vld [vmem:[#allocation41_spill] sm:$0xff]  ;;  %v7311_v1 = vld [vmem:[#allocation36_spill] sm:$0xff] }
 0x2b6   :  { %v741_v49 = vmul.f32 %v7306_v14, %v7304_v60  ;;  %v742_v5 = vmul.f32 %v7307_v21, %v7304_v60  ;;  %v743_v56 = vmul.f32 %v7308_v38, %v7304_v60  ;;  %v798_v7 = vmul.f32 %v7310_v17, %v7309_v39  ;;  %v7312_v41 = vld [vmem:[#allocation37_spill] sm:$0xff]  ;;  %v7313_v43 = vld [vmem:[#allocation43_spill] sm:$0xff]  ;;  %v7314_v14 = vld [vmem:[#allocation44_spill] sm:$0xff] }
 0x2b7   :  { %v799_v13 = vmul.f32 %v7311_v1, %v7309_v39  ;;  %1145 = vadd.xlane.f32.xlu0 %v1144_v19  ;;  %v852_v28 = vmul.f32 %v7312_v41, %v7256_v30  ;;  %v853_v8 = vmul.f32 %v7313_v43, %v7256_v30  ;;  %v854_v23 = vmul.f32 %v7314_v14, %v7256_v30  ;;  %v7315_v21 = vld [vmem:[#allocation45_spill] sm:$0xff]  ;;  %v7316_v60 = vld [vmem:[#allocation115_spill] sm:$0xff]  ;;  %v7317_v17 = vld [vmem:[#allocation116_spill] sm:$0xff] }
 0x2b8   :  { %v855_v55 = vmul.f32 %v7315_v21, %v7256_v30  ;;  %v906_v38 = vmul.f32 %v7316_v60, %v4523_v61  ;;  %v907_v53 = vmul.f32 %v7317_v17, %v4523_v61  ;;  %v7318_v19 = vld [vmem:[#allocation117_spill] sm:$0xff]  ;;  %v7319_v1 = vld [vmem:[#allocation118_spill] sm:$0xff]  ;;  %v7320_v43 = vld [vmem:[#allocation119_spill] sm:$0xff]  ;;  %v920_v35 = vadd.f32 %v456_v62, %v400_v44 }
 0x2b9   :  { %v908_v39 = vmul.f32 %v7318_v19, %v4523_v61  ;;  %v909_v41 = vmul.f32 %v7319_v1, %v4523_v61  ;;  %v910_v63 = vmul.f32 %v7320_v43, %v4523_v61  ;;  %v7321_v14 = vld [vmem:[#allocation120_spill] sm:$0xff]  ;;  %v921_v30 = vadd.f32 %v457_v50, %v401_v52  ;;  %v7323_v19 = vld [vmem:[#allocation27_spill] sm:$0xff]  ;;  %v7324_v44 = vld [vmem:[#allocation34_spill] sm:$0xff] }
 0x2ba   :  { %v911_v6 = vmul.f32 %v7321_v14, %v4523_v61  ;;  %v922_v21 = vadd.f32 %v458_v15, %v402_v37  ;;  %v923_v33 = vadd.f32 %v459_v4, %v403_v42  ;;  %v924_v60 = vadd.f32 %v460_v57, %v404_v0  ;;  %v7325_v50 = vld [vmem:[#allocation35_spill] sm:$0xff]  ;;  %v7326_v4 = vld [vmem:[#allocation49_spill] sm:$0xff]  ;;  %v7327_v0 = vld [vmem:[#allocation50_spill] sm:$0xff] }
 0x2bb   :  { %v925_v9 = vadd.f32 %v461_v51, %v405_v29  ;;  %v926_v47 = vadd.f32 %v462_v10, %v406_v25  ;;  %v927_v17 = vadd.f32 %v463_v16, %v407_v2  ;;  %v938_v24 = vadd.f32 %v7322_v12, %v514_v48  ;;  %v7328_v57 = vld [vmem:[#allocation62_spill] sm:$0xff]  ;;  %v7329_v12 = vld [vmem:[#allocation108_spill] sm:$0xff]  ;;  %v7330_v10 = vld [vmem:[#allocation63_spill] sm:$0xff] }
 0x2bc   :  { %v939_v18 = vadd.f32 %v7323_v19, %v515_v31  ;;  %v940_v1 = vadd.f32 %v572_v40, %v516_v46  ;;  %v941_v43 = vadd.f32 %v573_v58, %v517_v3  ;;  %v942_v14 = vadd.f32 %v574_v36, %v518_v22  ;;  %v7331_v16 = vld [vmem:[#allocation100_spill] sm:$0xff]  ;;  %v7332_v31 = vld [vmem:[#allocation107_spill] sm:$0xff]  ;;  %v7333_v3 = vld [vmem:[#allocation98_spill] sm:$0xff] }
 0x2bd   :  { %v943_v61 = vadd.f32 %v575_v11, %v519_v26  ;;  %v956_v62 = vadd.f32 %v684_v45, %v7324_v44  ;;  %v957_v52 = vadd.f32 %v685_v34, %v7325_v50  ;;  %v958_v15 = vadd.f32 %v686_v32, %v630_v59  ;;  %v7334_v26 = vld [vmem:[#allocation28_spill] sm:$0xff]  ;;  %v7335_v58 = vld [vmem:[#allocation29_spill] sm:$0xff]  ;;  %v7341_v50 = vld [vmem:[#allocation58_spill] sm:$0xff] }
 0x2be   :  { %v959_v37 = vadd.f32 %v687_v20, %v631_v27  ;;  %v972_v42 = vadd.f32 %v7326_v4, %v740_v54  ;;  %v973_v29 = vadd.f32 %v7327_v0, %v741_v49  ;;  %v974_v25 = vadd.f32 %v798_v7, %v742_v5  ;;  %v7336_v20 = vld [vmem:[#allocation42_spill] sm:$0xff]  ;;  %v7340_v44 = vld [vmem:[#allocation57_spill] sm:$0xff] }
 0x2bf   :  { %v975_v2 = vadd.f32 %v799_v13, %v743_v56  ;;  %v984_v51 = vadd.f32 %v7329_v12, %v7328_v57  ;;  %v985_v48 = vadd.f32 %v7331_v16, %v7330_v10  ;;  %v986_v46 = vadd.f32 %v906_v38, %v7332_v31  ;;  %v7337_v54 = vld [vmem:[#allocation54_spill] sm:$0xff]  ;;  %v7339_v56 = vld [vmem:[#allocation55_spill] sm:$0xff] }
 0x2c0   :  { %v987_v22 = vadd.f32 %v907_v53, %v7333_v3  ;;  %v1000_v40 = vadd.f32 %v7334_v26, %v920_v35  ;;  %v1001_v36 = vadd.f32 %v7335_v58, %v921_v30  ;;  %v1002_v11 = vadd.f32 %v938_v24, %v922_v21  ;;  %v7338_v5 = vld [vmem:[#allocation46_spill] sm:$0xff]  ;;  %v1062_v24 = vpop.permute.xlu0 %1061 }
 0x2c1   :  { %v1003_v59 = vadd.f32 %v939_v18, %v923_v33  ;;  %v988_v27 = vadd.f32 %v908_v39, %v852_v28  ;;  %v989_v45 = vadd.f32 %v909_v41, %v853_v8  ;;  %v1004_v34 = vadd.f32 %v940_v1, %v924_v60 }
 0x2c2   :  { %v1005_v32 = vadd.f32 %v941_v43, %v925_v9  ;;  %v1018_v49 = vadd.f32 %v7337_v54, %v7336_v20  ;;  %v1019_v7 = vadd.f32 %v7339_v56, %v7338_v5  ;;  %v1020_v13 = vadd.f32 %v972_v42, %v956_v62 }
 0x2c3   :  { %v1021_v38 = vadd.f32 %v973_v29, %v957_v52  ;;  %v1007_v19 = vadd.f32 %v943_v61, %v927_v17  ;;  %v1023_v53 = vadd.f32 %v975_v2, %v959_v37  ;;  %v1032_v35 = vadd.f32 %v7340_v44, %v1000_v40 }
 0x2c4   :  { %v1033_v30 = vadd.f32 %v7341_v50, %v1001_v36  ;;  %v1006_v33 = vadd.f32 %v942_v14, %v926_v47  ;;  %v1022_v18 = vadd.f32 %v974_v25, %v958_v15  ;;  %v1034_v28 = vadd.f32 %v1018_v49, %v1002_v11 }
 0x2c5   :  { %v1035_v8 = vadd.f32 %v1019_v7, %v1003_v59  ;;  %v991_v9 = vadd.f32 %v911_v6, %v855_v55  ;;  %v1036_v39 = vadd.f32 %v1020_v13, %v1004_v34  ;;  %v1048_v41 = vadd.f32 %v1032_v35, %v984_v51  ;;  %v7342_v59 = vld [vmem:[#allocation20_spill] sm:$0xff] }
 0x2c6   :  { %v1049_v21 = vadd.f32 %v1033_v30, %v985_v48  ;;  %v990_v60 = vadd.f32 %v910_v63, %v854_v23  ;;  %v1037_v1 = vadd.f32 %v1021_v38, %v1005_v32  ;;  %v1050_v43 = vadd.f32 %v1034_v28, %v986_v46 }
 0x2c7   :  { %v1051_v62 = vadd.f32 %v1035_v8, %v987_v22  ;;  %v1039_v52 = vadd.f32 %v1023_v53, %v1007_v19  ;;  %v1052_v17 = vadd.f32 %v1036_v39, %v988_v27  ;;  %v4701_v61 = vadd.f32 %v1062_v24, %v1048_v41 }
 0x2c8   :  { %v4703_v37 = vadd.f32 %v1062_v24, %v1049_v21  ;;  %v1038_v4 = vadd.f32 %v1022_v18, %v1006_v33  ;;  %v1053_v42 = vadd.f32 %v1037_v1, %v989_v45  ;;  %v4705_v47 = vadd.f32 %v1062_v24, %v1050_v43  ;;  %v4756_v43 = vld [vmem:[#allocation5 + $0x30] sm:$0xff] }
 0x2c9   :  { %v1055_v14 = vadd.f32 %v1039_v52, %v991_v9  ;;  %v4707_v15 = vadd.f32 %v1062_v24, %v1051_v62  ;;  %v1105_v6 = vsel %vm196_vm1, %v4701_v61, 0.0  ;;  %v4713_v0 = vadd.f32 %v1062_v24, %v1052_v17  ;;  %v74_v17 = vld [vmem:[#allocation5 + $0x10] sm:$0xff] }
 0x2ca   :  { %v1106_v63 = vsel %vm196_vm1, %v4703_v37, 0.0  ;;  %v1054_v23 = vadd.f32 %v1038_v4, %v990_v60  ;;  %v1108_v29 = vsel %vm196_vm1, %v4705_v47, 0.0  ;;  %v1130_v25 = vmul.f32 %v4701_v61, %v4701_v61 }
 0x2cb   :  { %v1107_v55 = vadd.f32 %v1106_v63, %v1105_v6  ;;  %v1131_v57 = vmul.f32 %v4703_v37, %v4703_v37  ;;  %v1132_v12 = vmul.f32 %v4705_v47, %v4705_v47  ;;  %v4723_v51 = vadd.f32 %v1062_v24, %v1053_v42 }
 0x2cc   :  { %v4725_v10 = vadd.f32 %v1062_v24, %v1055_v14  ;;  %v1110_v16 = vsel %vm196_vm1, %v4707_v15, 0.0  ;;  %v1133_v31 = vmul.f32 %v4707_v15, %v4707_v15  ;;  %v1147_v46 = vsel %vm196_vm1, %v1130_v25, 0.0 }
 0x2cd   :  { %v1109_v2 = vadd.f32 %v1108_v29, %v1107_v55  ;;  %v1148_v3 = vsel %vm196_vm1, %v1131_v57, 0.0  ;;  %v4733_v22 = vadd.f32 %v1062_v24, %v1054_v23  ;;  %v1112_v26 = vsel %vm196_vm1, %v4713_v0, 0.0 }
 0x2ce   :  { %v1149_v40 = vadd.f32 %v1148_v3, %v1147_v46  ;;  %v1134_v36 = vmul.f32 %v4713_v0, %v4713_v0  ;;  %v1150_v11 = vsel %vm196_vm1, %v1132_v12, 0.0  ;;  %v1095_v27 = vmul.f32 %v7342_v59, %v4725_v10 }
 0x2cf   :  { %v1111_v48 = vadd.f32 %v1110_v16, %v1109_v2  ;;  %v1114_v45 = vsel %vm196_vm1, %v4723_v51, 0.0  ;;  %v1135_v20 = vmul.f32 %v4723_v51, %v4723_v51  ;;  %v1152_v54 = vsel %vm196_vm1, %v1133_v31, 0.0  ;;  %v75_v16 = vld [vmem:[#allocation5 + $0x18] sm:$0x3] }
 0x2d0   :  { %v1151_v34 = vadd.f32 %v1150_v11, %v1149_v40  ;;  %v1116_v49 = vsel %vm196_vm1, %v4733_v22, 0.0  ;;  %v1136_v7 = vmul.f32 %v4733_v22, %v4733_v22  ;;  %v1154_v13 = vsel %vm196_vm1, %v1134_v36, 0.0  ;;  %v3499_v31 = vld [vmem:[#allocation5 + $0x38] sm:$0x3] }
 0x2d1   :  { %v1113_v58 = vadd.f32 %v1112_v26, %v1111_v48  ;;  %v1118_v38 = vsel %vm196_vm1, %v1095_v27, 0.0  ;;  %v1137_v44 = vmul.f32 %v1095_v27, %v1095_v27  ;;  %v1156_v35 = vsel %vm196_vm1, %v1135_v20, 0.0 }
 0x2d2   :  { %v1153_v5 = vadd.f32 %v1152_v54, %v1151_v34  ;;  %v1158_v30 = vsel %vm196_vm1, %v1136_v7, 0.0  ;;  %v7343_v42 = vmov 0   ;;  %v7344_v55 = vmov 2  }
 0x2d3   :  { %v1115_v32 = vadd.f32 %v1114_v45, %v1113_v58  ;;  %v1160_v33 = vsel %vm196_vm1, %v1137_v44, 0.0  ;;  %v7345_v2 = vmov 3   ;;  %v7346_v57 = vmov 5  }
 0x2d4   :  { %v1155_v19 = vadd.f32 %v1154_v13, %v1153_v5  ;;  %v7347_v12 = vmov 6   ;;  %v7348_v26 = vmov 1   ;;  %v7349_v40 = vmov 4  }
 0x2d5   :  { %v1117_v56 = vadd.f32 %v1116_v49, %v1115_v32  ;;  %v7350_v58 = vmov 7   ;;  %v7351_v36 = vmov 8   ;;  %v7352_v11 = vmov 9  }
 0x2d6   :  { %v1157_v50 = vadd.f32 %v1156_v35, %v1155_v19  ;;  %v7361_v35 = vld [vmem:[#allocation88_spill] sm:$0xff] }
 0x2d7   :  { %v1119_v53 = vadd.f32 %v1118_v38, %v1117_v56 }
 0x2d8   :  { %v1159_v24 = vadd.f32 %v1158_v30, %v1157_v50  ;;  %v7362_v30 = vld [vmem:[#allocation94_spill] sm:$0xff] }
 0x2d9   :  { %1120 = vadd.xlane.f32.xlu1 %v1119_v53  ;;  %v7360_v53 = vld [vmem:[#allocation93_spill] sm:$0xff] }
 0x2da   :  { %v1161_v18 = vadd.f32 %v1160_v33, %v1159_v24  ;;  %v7363_v33 = vld [vmem:[#allocation32_spill] sm:$0xff] }
 0x2dc   :  { %1162 = vadd.xlane.f32.xlu0 %v1161_v18 }
 0x33e   :  { %v1104_v28 = vpop.xlane.xlu1 %1103 }
 0x33f   :  { %v1164_v8 = vmul.f32 0.001, %v1104_v28 }
 0x340   :  { %v1146_v9 = vpop.xlane.xlu0 %1145 }
 0x341   :  { %v1168_v39 = vmul.f32 %v1164_v8, %v1164_v8  ;;  %v1166_v41 = vmul.f32 0.001, %v1146_v9 }
 0x343   :  { %v1170_v21 = vsub.f32 %v1166_v41, %v1168_v39 }
 0x345   :  { %v1172_v60 = vadd.f32 1e-06, %v1170_v21 }
 0x347   :  { %3390 = vrsqrt.f32 %v1172_v60  ;;  %v7365_v60 = vld [vmem:[#allocation33_spill] sm:$0xff] }
 0x354   :  { %v3391_v1 = vpop.eup %3390 }
 0x355   :  { %v1176_v62 = vmul.f32 %v4756_v43, %v3391_v1 }
 0x357   :  { %v1178_v52 = vmul.f32 %v1176_v62, %v1164_v8  ;;  %v7364_v8 = vld [vmem:[#allocation105_spill] sm:$0xff] }
 0x359   :  { %1182 = vrot.lane.b32.xlu1 %v1178_v52, %s3578_s0 }
 0x35d   :  { %1192 = vperm.xlu1 %3299, %v1176_v62  }
 0x361   :  { %3301 = vset.pattern.permute.xlu1 %v7343_v42 }
 0x362   :  { %v1121_v4 = vpop.xlane.xlu1 %1120  ;;  %1260 = vperm.xlu1 %3301, %v74_v17  }
 0x363   :  { %v1165_v14 = vmul.f32 0.001, %v1121_v4 }
 0x365   :  { %v1169_v6 = vmul.f32 %v1165_v14, %v1165_v14  ;;  %v1163_v63 = vpop.xlane.xlu0 %1162 }
 0x366   :  { %3303 = vset.pattern.permute.xlu1 %v7344_v55  ;;  %v1167_v23 = vmul.f32 0.001, %v1163_v63 }
 0x367   :  { %1373 = vperm.xlu1 %3303, %v74_v17  }
 0x368   :  { %v1171_v29 = vsub.f32 %v1167_v23, %v1169_v6  ;;  %v7368_v23 = vld [vmem:[#allocation97_spill] sm:$0xff] }
 0x36a   :  { %v1173_v25 = vadd.f32 1e-06, %v1171_v29 }
 0x36b   :  { %3304 = vset.pattern.permute.xlu1 %v7345_v2 }
 0x36c   :  { %1429 = vperm.xlu1 %3304, %v74_v17   ;;  %3392 = vrsqrt.f32 %v1173_v25 }
 0x370   :  { %3306 = vset.pattern.permute.xlu1 %v7346_v57 }
 0x371   :  { %1541 = vperm.xlu1 %3306, %v74_v17  }
 0x375   :  { %3307 = vset.pattern.permute.xlu1 %v7347_v12 }
 0x376   :  { %1597 = vperm.xlu1 %3307, %v74_v17  }
 0x379   :  { %v3393_v48 = vpop.eup %3392 }
 0x37a   :  { %3309 = vset.pattern.permute.xlu1 %v7343_v42  ;;  %v1177_v46 = vmul.f32 %v3499_v31, %v3393_v48 }
 0x37b   :  { %1265 = vperm.xlu1 %3309, %v75_v16  }
 0x37c   :  { %v1179_v3 = vmul.f32 %v1177_v46, %v1165_v14  ;;  %v7367_v14 = vld [vmem:[#allocation106_spill] sm:$0xff] }
 0x37e   :  { %1184 = vrot.lane.b32.xlu0 %v1179_v3, %s3578_s0 }
 0x37f   :  { %3310 = vset.pattern.permute.xlu1 %v7348_v26 }
 0x380   :  { %1321 = vperm.xlu1 %3310, %v75_v16  }
 0x382   :  { %1197 = vperm.xlu0 %3300, %v1177_v46  }
 0x384   :  { %3312 = vset.pattern.permute.xlu1 %v7345_v2 }
 0x385   :  { %1433 = vperm.xlu1 %3312, %v75_v16  }
 0x386   :  { %3302 = vset.pattern.permute.xlu0 %v7348_v26 }
 0x387   :  { %1317 = vperm.xlu0 %3302, %v74_v17  }
 0x389   :  { %3313 = vset.pattern.permute.xlu1 %v7347_v12 }
 0x38b   :  { %3305 = vset.pattern.permute.xlu0 %v7349_v40 }
 0x38c   :  { %1485 = vperm.xlu0 %3305, %v74_v17  }
 0x390   :  { %3308 = vset.pattern.permute.xlu0 %v7350_v58 }
 0x391   :  { %1653 = vperm.xlu0 %3308, %v74_v17  }
 0x395   :  { %3311 = vset.pattern.permute.xlu0 %v7344_v55 }
 0x396   :  { %1377 = vperm.xlu0 %3311, %v75_v16  }
 0x39a   :  { %3315 = vset.pattern.permute.xlu0 %v7346_v57 }
 0x39b   :  { %1545 = vperm.xlu0 %3315, %v75_v16  }
 0x39f   :  { %3318 = vset.pattern.permute.xlu0 %v7351_v36 }
 0x3a0   :  { %1709 = vperm.xlu0 %3318, %v74_v17  }
 0x3a4   :  { %3321 = vset.pattern.permute.xlu0 %v7352_v11 }
 0x3a5   :  { %1769 = vperm.xlu0 %3321, %v75_v16  }
 0x3a9   :  { %3324 = vset.pattern.permute.xlu0 %v7351_v36 }
 0x3cb   :  { %v1183_v27 = vpop.permute.xlu1 %1182 }
 0x3cc   :  { %v1188_v45 = vsub.f32 %v4756_v43, %v1183_v27  ;;  %v7369_v27 = vld [vmem:[#allocation16_spill] sm:$0xff] }
 0x3ce   :  { %1218 = vperm.xlu1 %3313, %v1188_v45  }
 0x3d8   :  { %v1193_v20 = vpop.permute.xlu1 %1192 }
 0x3d9   :  { %v1200_v44 = vmul.f32 %v1193_v20, %v7360_v53  ;;  %v1201_v50 = vmul.f32 %v1193_v20, %v7361_v35  ;;  %v1202_v24 = vmul.f32 %v1193_v20, %v7362_v30  ;;  %v1203_v18 = vmul.f32 %v1193_v20, %v7363_v33 }
 0x3da   :  { %v1204_v9 = vmul.f32 %v1193_v20, %v7364_v8  ;;  %v1205_v1 = vmul.f32 %v1193_v20, %v7365_v60  ;;  %v1206_v6 = vmul.f32 %v1193_v20, %v7367_v14  ;;  %v1207_v29 = vmul.f32 %v1193_v20, %v7368_v23  ;;  %v7372_v8 = vld [vmem:[#allocation18_spill] sm:$0xff] }
 0x3dd   :  { %v4786_v54 = vpop.permute.xlu1 %1260 }
 0x3de   :  { %7353 = vst [vmem:[#allocation109_spill] sm:$0xff] %v4786_v54 }
 0x3e2   :  { %v4789_v49 = vpop.permute.xlu1 %1373 }
 0x3e3   :  { %7354 = vst [vmem:[#allocation104_spill] sm:$0xff] %v4789_v49 }
 0x3e7   :  { %v4791_v5 = vpop.permute.xlu1 %1429 }
 0x3ec   :  { %v4793_v56 = vpop.permute.xlu1 %1541 }
 0x3ed   :  { %7355 = vst [vmem:[#allocation110_spill] sm:$0xff] %v4793_v56 }
 0x3f0   :  { %v1185_v34 = vpop.permute.xlu0 %1184 }
 0x3f1   :  { %v1189_v32 = vsub.f32 %v3499_v31, %v1185_v34  ;;  %v4795_v7 = vpop.permute.xlu1 %1597  ;;  %v7370_v34 = vld [vmem:[#allocation17_spill] sm:$0xff] }
 0x3f2   :  { %7356 = vst [vmem:[#allocation47_spill] sm:$0xff] %v4795_v7 }
 0x3f3   :  { %1223 = vperm.xlu1 %3313, %v1189_v32  }
 0x3f6   :  { %v4797_v13 = vpop.permute.xlu1 %1265 }
 0x3f7   :  { %3314 = vset.pattern.permute.xlu1 %v7349_v40  ;;  %7357 = vst [vmem:[#allocation48_spill] sm:$0xff] %v4797_v13 }
 0x3f8   :  { %1489 = vperm.xlu1 %3314, %v75_v16  }
 0x3fb   :  { %v4799_v38 = vpop.permute.xlu1 %1321 }
 0x3fc   :  { %3316 = vset.pattern.permute.xlu1 %v7347_v12  ;;  %7358 = vst [vmem:[#allocation60_spill] sm:$0xff] %v4799_v38 }
 0x3fd   :  { %1601 = vperm.xlu1 %3316, %v75_v16  }
 0x400   :  { %v4801_v19 = vpop.permute.xlu1 %1433 }
 0x401   :  { %3317 = vset.pattern.permute.xlu1 %v7350_v58  ;;  %7359 = vst [vmem:[#allocation61_spill] sm:$0xff] %v4801_v19 }
 0x402   :  { %1657 = vperm.xlu1 %3317, %v75_v16  }
 0x406   :  { %3319 = vset.pattern.permute.xlu1 %v7352_v11 }
 0x407   :  { %1765 = vperm.xlu1 %3319, %v74_v17   ;;  %v1198_v17 = vpop.permute.xlu0 %1197 }
 0x408   :  { %v4816_v25 = vmul.f32 %v1198_v17, %v4701_v61  ;;  %v4824_v46 = vmul.f32 %v1198_v17, %v4705_v47  ;;  %v4827_v3 = vmul.f32 %v1198_v17, %v4707_v15  ;;  %v4843_v20 = vmul.f32 %v1198_v17, %v4723_v51 }
 0x409   :  { %v4859_v35 = vmul.f32 %v1198_v17, %v4725_v10 }
 0x40b   :  { %3320 = vset.pattern.permute.xlu1 %v7351_v36  ;;  %v4809_v4 = vpop.permute.xlu0 %1317 }
 0x40c   :  { %1713 = vperm.xlu1 %3320, %v75_v16   ;;  %7366 = vst [vmem:[#allocation38_spill] sm:$0xff] %v4809_v4  ;;  %v4819_v16 = vmul.f32 %v1198_v17, %v4703_v37  ;;  %v4840_v37 = vmul.f32 %v1198_v17, %v4713_v0  ;;  %v7385_v4 = vld [vmem:[#allocation13_spill] sm:$0xff] }
 0x40f   :  { %v4861_v0 = vpop.permute.xlu0 %1485 }
 0x410   :  { %3322 = vset.pattern.permute.xlu1 %v7350_v58  ;;  %7371 = vst [vmem:[#allocation51_spill] sm:$0xff] %v4861_v0 }
 0x411   :  { %1965 = vperm.xlu1 %3322, %v4756_v43  }
 0x415   :  { %1969 = vperm.xlu1 %3322, %v3499_v31  }
 0x419   :  { %3323 = vset.pattern.permute.xlu1 %v7351_v36  ;;  %v4929_v36 = vpop.permute.xlu0 %1653 }
 0x41a   :  { %7375 = vst [vmem:[#allocation53_spill] sm:$0xff] %v4929_v36 }
 0x449   :  { %v1219_v28 = vpop.permute.xlu1 %1218 }
 0x44a   :  { %v1226_v39 = vadd.f32 %v1219_v28, %v1200_v44  ;;  %v1227_v41 = vadd.f32 %v1219_v28, %v1201_v50  ;;  %v1228_v21 = vadd.f32 %v1219_v28, %v1202_v24  ;;  %v1229_v43 = vadd.f32 %v1219_v28, %v1203_v18 }
 0x44b   :  { %v1230_v62 = vadd.f32 %v1219_v28, %v1204_v9  ;;  %v1231_v52 = vadd.f32 %v1219_v28, %v1205_v1  ;;  %v1232_v48 = vadd.f32 %v1219_v28, %v1206_v6  ;;  %v4856_v44 = vmul.f32 %v1198_v17, %v4733_v22 }
 0x44c   :  { %3394 = vtanh.f32 %v1226_v39  ;;  %v1233_v24 = vadd.f32 %v1219_v28, %v1207_v29  ;;  %v7373_v39 = vld [vmem:[#allocation19_spill] sm:$0xff] }
 0x44d   :  { %3396 = vtanh.f32 %v1227_v41 }
 0x44e   :  { %3398 = vtanh.f32 %v1228_v21 }
 0x44f   :  { %3400 = vtanh.f32 %v1229_v43 }
 0x450   :  { %3402 = vtanh.f32 %v1230_v62 }
 0x451   :  { %3404 = vtanh.f32 %v1231_v52 }
 0x452   :  { %3406 = vtanh.f32 %v1232_v48 }
 0x453   :  { %3408 = vtanh.f32 %v1233_v24 }
 0x459   :  { %v4812_v63 = vpop.eup %3394 }
 0x45a   :  { %v4821_v31 = vpop.eup %3396  ;;  %v4831_v45 = vrot.slane %v4812_v63, %v7369_v27  ;;  %v4835_v61 = vrot.slane %v4812_v63, %v7370_v34  ;;  %v4885_v9 = vrot.slane %v4812_v63, %v7372_v8  ;;  %v4893_v41 = vrot.slane %v4812_v63, %v7373_v39 }
 0x45b   :  { %v4837_v32 = vpop.eup %3398  ;;  %v4847_v47 = vrot.slane %v4821_v31, %v7369_v27  ;;  %v4851_v15 = vrot.slane %v4821_v31, %v7370_v34  ;;  %v4889_v28 = vrot.slane %v4821_v31, %v7372_v8  ;;  %v4905_v43 = vrot.slane %v4821_v31, %v7373_v39 }
 0x45c   :  { %v4853_v53 = vpop.eup %3400  ;;  %v4865_v51 = vrot.slane %v4837_v32, %v7369_v27  ;;  %v4869_v50 = vrot.slane %v4837_v32, %v7370_v34  ;;  %v1524_v22 = vmul.f32 %v4831_v45, %v4861_v0  ;;  %v1580_v10 = vmul.f32 %v4835_v61, %v4793_v56 }
 0x45d   :  { %v4871_v30 = vpop.eup %3402  ;;  %v4881_v18 = vrot.slane %v4853_v53, %v7369_v27  ;;  %v1525_v21 = vmul.f32 %v4847_v47, %v4861_v0  ;;  %v4899_v60 = vrot.slane %v4853_v53, %v7370_v34  ;;  %v1581_v1 = vmul.f32 %v4851_v15, %v4793_v56  ;;  %7374 = vst [vmem:[#allocation39_spill] sm:$0xff] %v4905_v43 }
 0x45e   :  { %v4877_v33 = vpop.eup %3404  ;;  %v4909_v62 = vrot.slane %v4871_v30, %v7369_v27  ;;  %v1526_v52 = vmul.f32 %v4865_v51, %v4861_v0  ;;  %v1582_v17 = vmul.f32 %v4869_v50, %v4793_v56  ;;  %v4917_v14 = vrot.slane %v4837_v32, %v7372_v8 }
 0x45f   :  { %v4921_v6 = vrot.slane %v4877_v33, %v7369_v27  ;;  %v1852_v23 = vadd.f32 %v1580_v10, %v1524_v22  ;;  %v4925_v29 = vrot.slane %v4853_v53, %v7372_v8  ;;  %v1527_v48 = vmul.f32 %v4881_v18, %v4861_v0 }
 0x460   :  { %v1636_v58 = vmul.f32 %v4885_v9, %v4795_v7  ;;  %v4935_v24 = vrot.slane %v4837_v32, %v7373_v39  ;;  %v4939_v11 = vrot.slane %v4853_v53, %v7373_v39  ;;  %v1583_v22 = vmul.f32 %v4899_v60, %v4793_v56 }
 0x461   :  { %v1637_v10 = vmul.f32 %v4889_v28, %v4795_v7  ;;  %v1692_v40 = vmul.f32 %v4893_v41, %v4929_v36  ;;  %v1693_v26 = vmul.f32 %v4905_v43, %v4929_v36  ;;  %v4951_v12 = vmul.f32 %v4909_v62, %v4861_v0 }
 0x462   :  { %7376 = vst [vmem:[#allocation52_spill] sm:$0xff] %v4935_v24  ;;  %7377 = vst [vmem:[#allocation56_spill] sm:$0xff] %v4939_v11  ;;  %v1853_v57 = vadd.f32 %v1581_v1, %v1525_v21  ;;  %v4953_v2 = vadd.f32 %v1582_v17, %v1526_v52  ;;  %v1638_v55 = vmul.f32 %v4917_v14, %v4795_v7  ;;  %v7382_v52 = vld [vmem:[#allocation12_spill] sm:$0xff] }
 0x463   :  { %7378 = vst [vmem:[#allocation59_spill] sm:$0xff] %v4951_v12  ;;  %v1639_v42 = vmul.f32 %v4925_v29, %v4795_v7  ;;  %v4961_v59 = vrot.slane %v4871_v30, %v7373_v39  ;;  %v4965_v56 = vrot.slane %v4877_v33, %v7373_v39  ;;  %v1694_v12 = vmul.f32 %v4935_v24, %v4929_v36 }
 0x464   :  { %7379 = vst [vmem:[#allocation69_spill] sm:$0xff] %v4953_v2  ;;  %v1695_v21 = vmul.f32 %v4939_v11, %v4929_v36  ;;  %v1868_v1 = vadd.f32 %v1692_v40, %v1636_v58  ;;  %v4973_v17 = vrot.slane %v4812_v63, %v7382_v52  ;;  %v4977_v2 = vrot.slane %v4821_v31, %v7382_v52  ;;  %v7388_v58 = vld [vmem:[#allocation14_spill] sm:$0xff] }
 0x465   :  { %7380 = vst [vmem:[#allocation70_spill] sm:$0xff] %v4961_v59  ;;  %7381 = vst [vmem:[#allocation23_spill] sm:$0xff] %v4965_v56  ;;  %v4981_v7 = vmul.f32 %v4921_v6, %v4861_v0  ;;  %v4983_v39 = vadd.f32 %v1583_v22, %v1527_v48  ;;  %v1869_v27 = vadd.f32 %v1693_v26, %v1637_v10 }
 0x466   :  { %v4987_v54 = vrot.slane %v4812_v63, %v7385_v4  ;;  %v4991_v40 = vrot.slane %v4821_v31, %v7385_v4  ;;  %v1383_v11 = vrot.slane %v4812_v63, %v7388_v58  ;;  %v1387_v24 = vrot.slane %v4821_v31, %v7388_v58 }
 0x467   :  { %7383 = vst [vmem:[#allocation64_spill] sm:$0xff] %v4981_v7  ;;  %7384 = vst [vmem:[#allocation65_spill] sm:$0xff] %v4983_v39  ;;  %v1391_v7 = vrot.slane %v4837_v32, %v7388_v58  ;;  %v5001_v26 = vmul.f32 %v4961_v59, %v4929_v36  ;;  %v5005_v48 = vmul.f32 %v4965_v56, %v4929_v36  ;;  %v5011_v39 = vpop.eup %3406 }
 0x468   :  { %7386 = vst [vmem:[#allocation66_spill] sm:$0xff] %v4987_v54  ;;  %7387 = vst [vmem:[#allocation67_spill] sm:$0xff] %v4991_v40  ;;  %v5007_v22 = vadd.f32 %v1694_v12, %v1638_v55  ;;  %v1395_v10 = vrot.slane %v4853_v53, %v7388_v58  ;;  %v5013_v0 = vadd.f32 %v1695_v21, %v1639_v42 }
 0x469   :  { %7389 = vst [vmem:[#allocation68_spill] sm:$0xff] %v5001_v26  ;;  %7390 = vst [vmem:[#allocation71_spill] sm:$0xff] %v5005_v48  ;;  %v5015_v4 = vadd.f32 %v1868_v1, %v1852_v23  ;;  %v1308_v43 = vmul.f32 %v4973_v17, %v4797_v13  ;;  %v1309_v26 = vmul.f32 %v4977_v2, %v4797_v13  ;;  %v5033_v23 = vpop.permute.xlu0 %1377  ;;  %v5050_v48 = vpop.eup %3408 }
 0x46a   :  { %7391 = vst [vmem:[#allocation72_spill] sm:$0xff] %v5007_v22  ;;  %7392 = vst [vmem:[#allocation73_spill] sm:$0xff] %v5013_v0  ;;  %v5021_v59 = vadd.f32 %v1869_v27, %v1853_v57  ;;  %v1364_v55 = vmul.f32 %v4987_v54, %v4799_v38  ;;  %v5027_v12 = vrot.slane %v4871_v30, %v7388_v58 }
 0x46b   :  { %7393 = vst [vmem:[#allocation22_spill] sm:$0xff] %v5015_v4  ;;  %v5031_v42 = vrot.slane %v4877_v33, %v7388_v58  ;;  %7395 = vst [vmem:[#allocation75_spill] sm:$0xff] %v5033_v23  ;;  %v1365_v21 = vmul.f32 %v4991_v40, %v4799_v38  ;;  %v1412_v1 = vmul.f32 %v1383_v11, %v4789_v49  ;;  %v7398_v4 = vld [vmem:[#allocation15_spill] sm:$0xff] }
 0x46c   :  { %7394 = vst [vmem:[#allocation74_spill] sm:$0xff] %v5021_v59  ;;  %v1413_v57 = vmul.f32 %v1387_v24, %v4789_v49  ;;  %v5040_v27 = vmul.f32 %v1391_v7, %v4789_v49  ;;  %v5043_v13 = vmul.f32 %v1395_v10, %v4789_v49  ;;  %v1420_v59 = vmul.f32 %v1383_v11, %v5033_v23 }
 0x46d   :  { %v1439_v0 = vrot.slane %v4812_v63, %v7398_v4  ;;  %v1443_v22 = vrot.slane %v4821_v31, %v7398_v4  ;;  %v1421_v38 = vmul.f32 %v1387_v24, %v5033_v23  ;;  %v1422_v36 = vmul.f32 %v1391_v7, %v5033_v23 }
 0x46e   :  { %7396 = vst [vmem:[#allocation76_spill] sm:$0xff] %v5040_v27  ;;  %7397 = vst [vmem:[#allocation77_spill] sm:$0xff] %v5043_v13  ;;  %v5056_v27 = vrot.slane %v4837_v32, %v7398_v4  ;;  %v5060_v13 = vrot.slane %v4853_v53, %v7398_v4  ;;  %v1224_v11 = vpop.permute.xlu1 %1223  ;;  %v1423_v63 = vmul.f32 %v1395_v10, %v5033_v23 }
 0x46f   :  { %v5065_v31 = vmul.f32 %v5027_v12, %v5033_v23  ;;  %v5069_v24 = vmul.f32 %v5031_v42, %v5033_v23  ;;  %v1828_v7 = vadd.f32 %v1364_v55, %v1308_v43  ;;  %v1234_v49 = vadd.f32 %v1224_v11, %v4816_v25 }
 0x470   :  { %v1235_v58 = vadd.f32 %v1224_v11, %v4819_v16  ;;  %v1236_v40 = vadd.f32 %v1224_v11, %v4824_v46  ;;  %v1829_v4 = vadd.f32 %v1365_v21, %v1309_v26  ;;  %v1237_v54 = vadd.f32 %v1224_v11, %v4827_v3  ;;  %v5101_v21 = vpop.permute.xlu0 %1545 }
 0x471   :  { %7399 = vst [vmem:[#allocation78_spill] sm:$0xff] %v5065_v31  ;;  %7400 = vst [vmem:[#allocation79_spill] sm:$0xff] %v5069_v24  ;;  %v1468_v10 = vmul.f32 %v1439_v0, %v4791_v5  ;;  %v1469_v56 = vmul.f32 %v1443_v22, %v4791_v5  ;;  %v1476_v31 = vmul.f32 %v1439_v0, %v4801_v19  ;;  %3410 = vtanh.f32 %v1234_v49 }
 0x472   :  { %v1477_v23 = vmul.f32 %v1443_v22, %v4801_v19  ;;  %v1478_v43 = vmul.f32 %v5056_v27, %v4801_v19  ;;  %v1479_v25 = vmul.f32 %v5060_v13, %v4801_v19  ;;  %v1238_v16 = vadd.f32 %v1224_v11, %v4840_v37  ;;  %7403 = vst [vmem:[#allocation24_spill] sm:$0xff] %v5101_v21 }
 0x473   :  { %3412 = vtanh.f32 %v1235_v58  ;;  %v5086_v46 = vrot.slane %v4871_v30, %v7370_v34  ;;  %v5090_v3 = vrot.slane %v4877_v33, %v7370_v34  ;;  %v1239_v49 = vadd.f32 %v1224_v11, %v4843_v20  ;;  %v5095_v22 = vpop.permute.xlu1 %1489 }
 0x474   :  { %v1240_v0 = vadd.f32 %v1224_v11, %v4856_v44  ;;  %v1241_v26 = vadd.f32 %v1224_v11, %v4859_v35  ;;  %3414 = vtanh.f32 %v1236_v40  ;;  %7401 = vst [vmem:[#allocation80_spill] sm:$0xff] %v5095_v22  ;;  %v5097_v37 = vadd.f32 %v1468_v10, %v1412_v1 }
 0x475   :  { %3416 = vtanh.f32 %v1237_v54  ;;  %v5099_v58 = vadd.f32 %v1469_v56, %v1413_v57  ;;  %v1844_v55 = vadd.f32 %v1476_v31, %v1420_v59  ;;  %v1845_v24 = vadd.f32 %v1477_v23, %v1421_v38 }
 0x476   :  { %v5103_v19 = vadd.f32 %v1478_v43, %v1422_v36  ;;  %v5105_v34 = vadd.f32 %v1479_v25, %v1423_v63  ;;  %v1588_v20 = vmul.f32 %v4835_v61, %v5101_v21  ;;  %v1532_v44 = vmul.f32 %v4831_v45, %v5095_v22  ;;  %v7421_v25 = vld [vmem:[#allocation39_spill] sm:$0xff] }
 0x477   :  { %7402 = vst [vmem:[#allocation81_spill] sm:$0xff] %v5099_v58  ;;  %v1533_v54 = vmul.f32 %v4847_v47, %v5095_v22  ;;  %v1534_v56 = vmul.f32 %v4865_v51, %v5095_v22  ;;  %v1589_v59 = vmul.f32 %v4851_v15, %v5101_v21  ;;  %3418 = vtanh.f32 %v1238_v16 }
 0x478   :  { %7404 = vst [vmem:[#allocation82_spill] sm:$0xff] %v5103_v19  ;;  %7405 = vst [vmem:[#allocation83_spill] sm:$0xff] %v5105_v34  ;;  %v1535_v36 = vmul.f32 %v4881_v18, %v5095_v22  ;;  %v1590_v38 = vmul.f32 %v4869_v50, %v5101_v21  ;;  %v1591_v61 = vmul.f32 %v4899_v60, %v5101_v21  ;;  %3420 = vtanh.f32 %v1239_v49  ;;  %v5133_v35 = vpop.permute.xlu1 %1601  ;;  %v7430_v34 = vld [vmem:[#allocation13_spill] sm:$0xff] }
 0x479   :  { %v5125_v45 = vmul.f32 %v4909_v62, %v5095_v22  ;;  %v5129_v47 = vmul.f32 %v4921_v6, %v5095_v22  ;;  %v5131_v15 = vadd.f32 %v1844_v55, %v1828_v7  ;;  %7409 = vst [vmem:[#allocation87_spill] sm:$0xff] %v5133_v35  ;;  %3422 = vtanh.f32 %v1240_v0  ;;  %v5177_v7 = vpop.permute.xlu0 %1709  ;;  %v7424_v55 = vld [vmem:[#allocation52_spill] sm:$0xff] }
 0x47a   :  { %v5135_v51 = vadd.f32 %v1845_v24, %v1829_v4  ;;  %v5139_v50 = vrot.slane %v4871_v30, %v7372_v8  ;;  %v5143_v18 = vrot.slane %v4877_v33, %v7372_v8  ;;  %3424 = vtanh.f32 %v1241_v26 }
 0x47b   :  { %7406 = vst [vmem:[#allocation84_spill] sm:$0xff] %v5125_v45  ;;  %7407 = vst [vmem:[#allocation85_spill] sm:$0xff] %v5129_v47  ;;  %v5147_v60 = vmul.f32 %v5086_v46, %v5101_v21  ;;  %v5151_v62 = vmul.f32 %v5090_v3, %v5101_v21  ;;  %v1860_v6 = vadd.f32 %v1588_v20, %v1532_v44 }
 0x47c   :  { %7408 = vst [vmem:[#allocation86_spill] sm:$0xff] %v5131_v15  ;;  %7410 = vst [vmem:[#allocation25_spill] sm:$0xff] %v5135_v51  ;;  %v1861_v4 = vadd.f32 %v1589_v59, %v1533_v54  ;;  %v5153_v40 = vadd.f32 %v1590_v38, %v1534_v56  ;;  %v5155_v23 = vadd.f32 %v1591_v61, %v1535_v36  ;;  %v7427_v61 = vld [vmem:[#allocation56_spill] sm:$0xff] }
 0x47d   :  { %7411 = vst [vmem:[#allocation89_spill] sm:$0xff] %v5147_v60  ;;  %7412 = vst [vmem:[#allocation90_spill] sm:$0xff] %v5151_v62  ;;  %v1644_v1 = vmul.f32 %v4885_v9, %v5133_v35  ;;  %v1645_v57 = vmul.f32 %v4889_v28, %v5133_v35  ;;  %v1646_v11 = vmul.f32 %v4917_v14, %v5133_v35  ;;  %v5179_v28 = vpop.permute.xlu1 %1657 }
 0x47e   :  { %7413 = vst [vmem:[#allocation91_spill] sm:$0xff] %v5153_v40  ;;  %7414 = vst [vmem:[#allocation92_spill] sm:$0xff] %v5155_v23  ;;  %v1647_v63 = vmul.f32 %v4925_v29, %v5133_v35  ;;  %v5167_v31 = vrot.slane %v4837_v32, %v7382_v52  ;;  %v5171_v24 = vmul.f32 %v5139_v50, %v5133_v35  ;;  %v3411_v10 = vpop.eup %3410 }
 0x47f   :  { %v5175_v9 = vmul.f32 %v5143_v18, %v5133_v35  ;;  %7418 = vst [vmem:[#allocation31_spill] sm:$0xff] %v5179_v28  ;;  %v5183_v14 = vrot.slane %v4853_v53, %v7382_v52  ;;  %v5187_v29 = vrot.slane %v4871_v30, %v7382_v52  ;;  %v1700_v43 = vmul.f32 %v4893_v41, %v5179_v28  ;;  %v7426_v41 = vld [vmem:[#allocation109_spill] sm:$0xff] }
 0x480   :  { %7415 = vst [vmem:[#allocation30_spill] sm:$0xff] %v5167_v31  ;;  %7416 = vst [vmem:[#allocation95_spill] sm:$0xff] %v5171_v24  ;;  %v1701_v16 = vmul.f32 %v7421_v25, %v5179_v28  ;;  %v5195_v49 = vrot.slane %v4877_v33, %v7382_v52  ;;  %v5199_v0 = vrot.slane %v5011_v39, %v7382_v52  ;;  %v3413_v26 = vpop.eup %3412 }
 0x481   :  { %7417 = vst [vmem:[#allocation96_spill] sm:$0xff] %v5175_v9  ;;  %7419 = vst [vmem:[#allocation99_spill] sm:$0xff] %v5183_v14  ;;  %v1702_v20 = vmul.f32 %v7424_v55, %v5179_v28  ;;  %v5205_v44 = vrot.slane %v5050_v48, %v7382_v52  ;;  %v5209_v54 = vmul.f32 %v4973_v17, %v7426_v41  ;;  %v3415_v59 = vpop.eup %3414 }
 0x482   :  { %7420 = vst [vmem:[#allocation101_spill] sm:$0xff] %v5187_v29  ;;  %7422 = vst [vmem:[#allocation102_spill] sm:$0xff] %v5195_v49  ;;  %v5213_v56 = vmul.f32 %v4977_v2, %v7426_v41  ;;  %v1719_v36 = vrot.slane %v3411_v10, %v7382_v52  ;;  %v1723_v38 = vrot.slane %v3413_v26, %v7382_v52  ;;  %v3417_v51 = vpop.eup %3416 }
 0x483   :  { %7423 = vst [vmem:[#allocation103_spill] sm:$0xff] %v5199_v0  ;;  %7425 = vst [vmem:[#allocation40_spill] sm:$0xff] %v5205_v44  ;;  %v1703_v25 = vmul.f32 %v7427_v61, %v5179_v28  ;;  %v5221_v55 = vmul.f32 %v5167_v31, %v7426_v41  ;;  %v5224_v17 = vrot.slane %v3415_v59, %v7382_v52  ;;  %v5234_v61 = vpop.permute.xlu1 %1765 }
 0x484   :  { %v1876_v15 = vadd.f32 %v1700_v43, %v1644_v1  ;;  %v1877_v23 = vadd.f32 %v1701_v16, %v1645_v57  ;;  %v5228_v2 = vmul.f32 %v5183_v14, %v7426_v41  ;;  %v5231_v40 = vrot.slane %v3417_v51, %v7382_v52  ;;  %v7431_v1 = vld [vmem:[#allocation70_spill] sm:$0xff]  ;;  %v7433_v43 = vld [vmem:[#allocation23_spill] sm:$0xff]  ;;  %v5257_v60 = vpop.eup %3418 }
 0x485   :  { %7428 = vst [vmem:[#allocation111_spill] sm:$0xff] %v5224_v17  ;;  %v1775_v9 = vrot.slane %v3411_v10, %v7430_v34  ;;  %v5238_v19 = vmul.f32 %v5187_v29, %v7426_v41  ;;  %v5242_v62 = vmul.f32 %v5195_v49, %v7426_v41  ;;  %v5246_v57 = vmul.f32 %v7431_v1, %v5179_v28  ;;  %v5254_v10 = vpop.permute.xlu0 %1769 }
 0x486   :  { %7429 = vst [vmem:[#allocation112_spill] sm:$0xff] %v5231_v40  ;;  %v5250_v16 = vmul.f32 %v7433_v43, %v5179_v28  ;;  %v5252_v47 = vadd.f32 %v1702_v20, %v1646_v11  ;;  %7436 = vst [vmem:[#allocation21_spill] sm:$0xff] %v5254_v10  ;;  %v1779_v24 = vrot.slane %v3413_v26, %v7430_v34 }
 0x487   :  { %7432 = vst [vmem:[#allocation113_spill] sm:$0xff] %v5246_v57  ;;  %v1748_v45 = vmul.f32 %v1719_v36, %v5177_v7  ;;  %v1749_v35 = vmul.f32 %v1723_v38, %v5177_v7  ;;  %v5261_v21 = vadd.f32 %v1703_v25, %v1647_v63  ;;  %v1804_v1 = vmul.f32 %v1775_v9, %v5234_v61  ;;  %v5264_v57 = vpop.eup %3420 }
 0x488   :  { %7434 = vst [vmem:[#allocation114_spill] sm:$0xff] %v5250_v16  ;;  %7435 = vst [vmem:[#allocation41_spill] sm:$0xff] %v5252_v47  ;;  %v5268_v11 = vmul.f32 %v5224_v17, %v5177_v7  ;;  %v5270_v20 = vadd.f32 %v1876_v15, %v1860_v6  ;;  %v5272_v43 = vadd.f32 %v1877_v23, %v1861_v4  ;;  %v5275_v47 = vpop.eup %3422  ;;  %v5295_v4 = vpop.permute.xlu1 %1713  ;;  %v7474_v17 = vld [vmem:[#allocation51_spill] sm:$0xff] }
 0x489   :  { %7437 = vst [vmem:[#allocation36_spill] sm:$0xff] %v5261_v21  ;;  %v1805_v26 = vmul.f32 %v1779_v24, %v5234_v61  ;;  %v5279_v63 = vmul.f32 %v5231_v40, %v5177_v7  ;;  %v5282_v25 = vrot.slane %v3415_v59, %v7430_v34  ;;  %v5285_v21 = vrot.slane %v3417_v51, %v7430_v34  ;;  %v5290_v15 = vpop.eup %3424 }
 0x48a   :  { %7438 = vst [vmem:[#allocation37_spill] sm:$0xff] %v5270_v20  ;;  %7439 = vst [vmem:[#allocation43_spill] sm:$0xff] %v5272_v43  ;;  %v5288_v16 = vmul.f32 %v1775_v9, %v5254_v10  ;;  %v5293_v6 = vmul.f32 %v1779_v24, %v5254_v10  ;;  %v5299_v23 = vrot.slane %v4837_v32, %v7430_v34 }
 0x48b   :  { %7440 = vst [vmem:[#allocation44_spill] sm:$0xff] %v5282_v25  ;;  %7441 = vst [vmem:[#allocation45_spill] sm:$0xff] %v5285_v21  ;;  %v5303_v59 = vrot.slane %v4853_v53, %v7430_v34  ;;  %v5307_v51 = vrot.slane %v4871_v30, %v7430_v34  ;;  %v5311_v9 = vmul.f32 %v5282_v25, %v5234_v61 }
 0x48c   :  { %7442 = vst [vmem:[#allocation115_spill] sm:$0xff] %v5288_v16  ;;  %7443 = vst [vmem:[#allocation116_spill] sm:$0xff] %v5293_v6  ;;  %v5315_v24 = vmul.f32 %v5285_v21, %v5234_v61  ;;  %v5317_v43 = vadd.f32 %v1804_v1, %v1748_v45  ;;  %v5321_v32 = vrot.slane %v4877_v33, %v7430_v34  ;;  %v7458_v6 = vld [vmem:[#allocation14_spill] sm:$0xff] }
 0x48d   :  { %7444 = vst [vmem:[#allocation117_spill] sm:$0xff] %v5295_v4  ;;  %7445 = vst [vmem:[#allocation118_spill] sm:$0xff] %v5299_v23  ;;  %v5323_v53 = vadd.f32 %v1805_v26, %v1749_v35  ;;  %v5327_v20 = vmul.f32 %v5199_v0, %v7426_v41  ;;  %v5331_v28 = vmul.f32 %v5205_v44, %v7426_v41  ;;  %v7455_v26 = vld [vmem:[#allocation38_spill] sm:$0xff]  ;;  %v7457_v41 = vld [vmem:[#allocation67_spill] sm:$0xff] }
 0x48e   :  { %7446 = vst [vmem:[#allocation119_spill] sm:$0xff] %v5303_v59  ;;  %7447 = vst [vmem:[#allocation120_spill] sm:$0xff] %v5307_v51  ;;  %v5335_v22 = vrot.slane %v5011_v39, %v7430_v34  ;;  %v5338_v45 = vmul.f32 %v1719_v36, %v5295_v4  ;;  %v5341_v1 = vmul.f32 %v1723_v38, %v5295_v4  ;;  %v7456_v0 = vld [vmem:[#allocation66_spill] sm:$0xff] }
 0x48f   :  { %7448 = vst [vmem:[#allocation26_spill] sm:$0xff] %v5317_v43  ;;  %7449 = vst [vmem:[#allocation27_spill] sm:$0xff] %v5321_v32  ;;  %v5345_v35 = vrot.slane %v5050_v48, %v7430_v34  ;;  %v1356_v49 = vmul.f32 %v7456_v0, %v7455_v26  ;;  %v1357_v44 = vmul.f32 %v7457_v41, %v7455_v26  ;;  %v7475_v21 = vld [vmem:[#allocation110_spill] sm:$0xff] }
 0x490   :  { %7450 = vst [vmem:[#allocation34_spill] sm:$0xff] %v5323_v53  ;;  %7451 = vst [vmem:[#allocation35_spill] sm:$0xff] %v5335_v22  ;;  %v1358_v29 = vmul.f32 %v5299_v23, %v7455_v26  ;;  %v1359_v36 = vmul.f32 %v5303_v59, %v7455_v26  ;;  %v1360_v38 = vmul.f32 %v5307_v51, %v7455_v26  ;;  %v7461_v23 = vld [vmem:[#allocation15_spill] sm:$0xff] }
 0x491   :  { %7452 = vst [vmem:[#allocation49_spill] sm:$0xff] %v5338_v45  ;;  %7453 = vst [vmem:[#allocation50_spill] sm:$0xff] %v5341_v1  ;;  %v1361_v14 = vmul.f32 %v5321_v32, %v7455_v26  ;;  %v1362_v31 = vmul.f32 %v5335_v22, %v7455_v26  ;;  %v5363_v0 = vrot.slane %v5011_v39, %v7458_v6  ;;  %v7466_v1 = vld [vmem:[#allocation104_spill] sm:$0xff] }
 0x492   :  { %7454 = vst [vmem:[#allocation62_spill] sm:$0xff] %v5345_v35  ;;  %v5367_v41 = vrot.slane %v5050_v48, %v7458_v6  ;;  %v5371_v59 = vrot.slane %v4871_v30, %v7461_v23  ;;  %v5375_v51 = vrot.slane %v4877_v33, %v7461_v23  ;;  %v5379_v32 = vrot.slane %v5011_v39, %v7461_v23 }
 0x493   :  { %7459 = vst [vmem:[#allocation108_spill] sm:$0xff] %v5363_v0  ;;  %v5383_v22 = vrot.slane %v5050_v48, %v7461_v23  ;;  %v1363_v6 = vmul.f32 %v5345_v35, %v7455_v26  ;;  %v1416_v16 = vmul.f32 %v5027_v12, %v7466_v1  ;;  %v1417_v30 = vmul.f32 %v5031_v42, %v7466_v1  ;;  %v7467_v35 = vld [vmem:[#allocation16_spill] sm:$0xff] }
 0x494   :  { %7460 = vst [vmem:[#allocation63_spill] sm:$0xff] %v5367_v41  ;;  %7462 = vst [vmem:[#allocation100_spill] sm:$0xff] %v5371_v59  ;;  %v1418_v33 = vmul.f32 %v5363_v0, %v7466_v1  ;;  %v1419_v45 = vmul.f32 %v5367_v41, %v7466_v1  ;;  %v1470_v40 = vmul.f32 %v5056_v27, %v4791_v5  ;;  %v7470_v0 = vld [vmem:[#allocation17_spill] sm:$0xff] }
 0x495   :  { %7463 = vst [vmem:[#allocation107_spill] sm:$0xff] %v5375_v51  ;;  %7464 = vst [vmem:[#allocation98_spill] sm:$0xff] %v5379_v32  ;;  %v1471_v23 = vmul.f32 %v5060_v13, %v4791_v5  ;;  %v1472_v26 = vmul.f32 %v5371_v59, %v4791_v5  ;;  %v5403_v12 = vrot.slane %v5011_v39, %v7467_v35 }
 0x496   :  { %7465 = vst [vmem:[#allocation28_spill] sm:$0xff] %v5383_v22  ;;  %v5407_v42 = vrot.slane %v5050_v48, %v7467_v35  ;;  %v5411_v1 = vrot.slane %v5011_v39, %v7470_v0  ;;  %v5415_v27 = vrot.slane %v5050_v48, %v7470_v0  ;;  %v1473_v13 = vmul.f32 %v5375_v51, %v4791_v5 }
 0x497   :  { %7468 = vst [vmem:[#allocation29_spill] sm:$0xff] %v5403_v12  ;;  %v1474_v59 = vmul.f32 %v5379_v32, %v4791_v5  ;;  %v1475_v41 = vmul.f32 %v5383_v22, %v4791_v5  ;;  %v5425_v35 = vrot.slane %v5011_v39, %v7372_v8  ;;  %v1530_v4 = vmul.f32 %v5403_v12, %v7474_v17  ;;  %v7477_v12 = vld [vmem:[#allocation47_spill] sm:$0xff] }
 0x498   :  { %7469 = vst [vmem:[#allocation42_spill] sm:$0xff] %v5407_v42  ;;  %7471 = vst [vmem:[#allocation54_spill] sm:$0xff] %v5411_v1  ;;  %v1584_v0 = vmul.f32 %v5086_v46, %v7475_v21  ;;  %v1585_v25 = vmul.f32 %v5090_v3, %v7475_v21  ;;  %v5435_v51 = vrot.slane %v5050_v48, %v7372_v8  ;;  %v7478_v46 = vld [vmem:[#allocation19_spill] sm:$0xff] }
 0x499   :  { %7472 = vst [vmem:[#allocation46_spill] sm:$0xff] %v5415_v27  ;;  %7473 = vst [vmem:[#allocation55_spill] sm:$0xff] %v5425_v35  ;;  %v1531_v5 = vmul.f32 %v5407_v42, %v7474_v17  ;;  %v1586_v22 = vmul.f32 %v5411_v1, %v7475_v21  ;;  %v1587_v32 = vmul.f32 %v5415_v27, %v7475_v21  ;;  %v7485_v27 = vld [vmem:[#allocation53_spill] sm:$0xff] }
 0x49a   :  { %7476 = vst [vmem:[#allocation57_spill] sm:$0xff] %v5435_v51  ;;  %v1640_v10 = vmul.f32 %v5139_v50, %v7477_v12  ;;  %v5447_v53 = vrot.slane %v5011_v39, %v7478_v46  ;;  %v5451_v3 = vrot.slane %v5050_v48, %v7478_v46  ;;  %v5455_v17 = vrot.slane %v5257_v60, %v7382_v52 }
 0x49b   :  { %v5459_v8 = vrot.slane %v5264_v57, %v7382_v52  ;;  %v1641_v21 = vmul.f32 %v5143_v18, %v7477_v12  ;;  %v1642_v50 = vmul.f32 %v5425_v35, %v7477_v12  ;;  %v5467_v39 = vrot.slane %v5275_v47, %v7382_v52 }
 0x49c   :  { %7479 = vst [vmem:[#allocation58_spill] sm:$0xff] %v5447_v53  ;;  %7480 = vst [vmem:[#allocation93_spill] sm:$0xff] %v5451_v3  ;;  %v5471_v48 = vrot.slane %v5290_v15, %v7382_v52  ;;  %v1643_v46 = vmul.f32 %v5435_v51, %v7477_v12  ;;  %v1698_v1 = vmul.f32 %v5447_v53, %v7485_v27 }
 0x49d   :  { %7481 = vst [vmem:[#allocation88_spill] sm:$0xff] %v5455_v17  ;;  %7482 = vst [vmem:[#allocation94_spill] sm:$0xff] %v5459_v8  ;;  %v5479_v18 = vrot.slane %v5257_v60, %v7430_v34  ;;  %v5483_v35 = vrot.slane %v5264_v57, %v7430_v34  ;;  %v1699_v42 = vmul.f32 %v5451_v3, %v7485_v27 }
 0x49e   :  { %7483 = vst [vmem:[#allocation32_spill] sm:$0xff] %v5467_v39  ;;  %7484 = vst [vmem:[#allocation105_spill] sm:$0xff] %v5471_v48  ;;  %v1752_v52 = vmul.f32 %v5455_v17, %v5177_v7  ;;  %v1753_v12 = vmul.f32 %v5459_v8, %v5177_v7  ;;  %v5493_v53 = vrot.slane %v5275_v47, %v7430_v34 }
 0x49f   :  { %7486 = vst [vmem:[#allocation33_spill] sm:$0xff] %v5479_v18  ;;  %7487 = vst [vmem:[#allocation106_spill] sm:$0xff] %v5483_v35  ;;  %v1754_v60 = vmul.f32 %v5467_v39, %v5177_v7  ;;  %v1755_v57 = vmul.f32 %v5471_v48, %v5177_v7  ;;  %v5501_v51 = vrot.slane %v5290_v15, %v7430_v34 }
 0x4a0   :  { %7488 = vst [vmem:[#allocation97_spill] sm:$0xff] %v5493_v53  ;;  %v1808_v27 = vmul.f32 %v5479_v18, %v5234_v61  ;;  %v1809_v8 = vmul.f32 %v5483_v35, %v5234_v61  ;;  %v1810_v47 = vmul.f32 %v5493_v53, %v5234_v61  ;;  %v1820_v17 = vadd.f32 %v1356_v49, %v5209_v54  ;;  %v7490_v53 = vld [vmem:[#allocation76_spill] sm:$0xff]  ;;  %v7491_v49 = vld [vmem:[#allocation77_spill] sm:$0xff] }
 0x4a1   :  { %7489 = vst [vmem:[#allocation39_spill] sm:$0xff] %v5501_v51  ;;  %v1821_v39 = vadd.f32 %v1357_v44, %v5213_v56  ;;  %v1811_v7 = vmul.f32 %v5501_v51, %v5234_v61  ;;  %v1822_v48 = vadd.f32 %v1358_v29, %v5221_v55  ;;  %v1823_v15 = vadd.f32 %v1359_v36, %v5228_v2  ;;  %v7492_v51 = vld [vmem:[#allocation59_spill] sm:$0xff]  ;;  %v7493_v55 = vld [vmem:[#allocation64_spill] sm:$0xff] }
 0x4a2   :  { %v1824_v34 = vadd.f32 %v1360_v38, %v5238_v19  ;;  %v1825_v18 = vadd.f32 %v1361_v14, %v5242_v62  ;;  %v1826_v35 = vadd.f32 %v1362_v31, %v5327_v20  ;;  %v1827_v3 = vadd.f32 %v1363_v6, %v5331_v28  ;;  %v7494_v38 = vld [vmem:[#allocation68_spill] sm:$0xff]  ;;  %v7495_v14 = vld [vmem:[#allocation71_spill] sm:$0xff] }
 0x4a3   :  { %v1838_v43 = vadd.f32 %v1470_v40, %v7490_v53  ;;  %v1839_v54 = vadd.f32 %v1471_v23, %v7491_v49  ;;  %v1840_v44 = vadd.f32 %v1472_v26, %v1416_v16  ;;  %v1841_v56 = vadd.f32 %v1473_v13, %v1417_v30  ;;  %v7499_v30 = vld [vmem:[#allocation65_spill] sm:$0xff] }
 0x4a4   :  { %v1842_v58 = vadd.f32 %v1474_v59, %v1418_v33  ;;  %v1843_v61 = vadd.f32 %v1475_v41, %v1419_v45  ;;  %v1856_v29 = vadd.f32 %v1584_v0, %v7492_v51  ;;  %v1857_v2 = vadd.f32 %v1585_v25, %v7493_v55  ;;  %v7496_v59 = vld [vmem:[#allocation81_spill] sm:$0xff]  ;;  %v7498_v0 = vld [vmem:[#allocation72_spill] sm:$0xff] }
 0x4a5   :  { %v1858_v36 = vadd.f32 %v1586_v22, %v1530_v4  ;;  %v1859_v19 = vadd.f32 %v1587_v32, %v1531_v5  ;;  %v1872_v62 = vadd.f32 %v7494_v38, %v1640_v10  ;;  %v1873_v31 = vadd.f32 %v7495_v14, %v1641_v21  ;;  %v7497_v45 = vld [vmem:[#allocation69_spill] sm:$0xff]  ;;  %v7511_v38 = vld [vmem:[#allocation44_spill] sm:$0xff] }
 0x4a6   :  { %v1874_v20 = vadd.f32 %v1698_v1, %v1642_v50  ;;  %v1875_v28 = vadd.f32 %v1699_v42, %v1643_v46  ;;  %v1886_v40 = vadd.f32 %v5311_v9, %v5268_v11  ;;  %v1887_v16 = vadd.f32 %v5315_v24, %v5279_v63  ;;  %v7500_v33 = vld [vmem:[#allocation73_spill] sm:$0xff]  ;;  %v7501_v42 = vld [vmem:[#allocation22_spill] sm:$0xff] }
 0x4a7   :  { %v1891_v6 = vadd.f32 %v1811_v7, %v1755_v57  ;;  %v1900_v23 = vadd.f32 %v5097_v37, %v1820_v17  ;;  %v1901_v51 = vadd.f32 %v7496_v59, %v1821_v39  ;;  %v1902_v25 = vadd.f32 %v1838_v43, %v1822_v48  ;;  %v7502_v1 = vld [vmem:[#allocation74_spill] sm:$0xff]  ;;  %v1966_v43 = vpop.permute.xlu1 %1965  ;;  %v7512_v14 = vld [vmem:[#allocation45_spill] sm:$0xff]  ;;  %v7516_v59 = vld [vmem:[#allocation20_spill] sm:$0xff] }
 0x4a8   :  { %v1903_v22 = vadd.f32 %v1839_v54, %v1823_v15  ;;  %v1904_v4 = vadd.f32 %v1840_v44, %v1824_v34  ;;  %v1905_v32 = vadd.f32 %v1841_v56, %v1825_v18  ;;  %v1906_v10 = vadd.f32 %v1842_v58, %v1826_v35  ;;  %v7503_v17 = vld [vmem:[#allocation26_spill] sm:$0xff] }
 0x4a9   :  { %v1907_v53 = vadd.f32 %v1843_v61, %v1827_v3  ;;  %v1918_v41 = vadd.f32 %v7498_v0, %v7497_v45  ;;  %v1919_v11 = vadd.f32 %v7500_v33, %v7499_v30  ;;  %v1920_v9 = vadd.f32 %v1872_v62, %v1856_v29  ;;  %v7504_v50 = vld [vmem:[#allocation34_spill] sm:$0xff]  ;;  %v7520_v45 = vld [vmem:[#allocation116_spill] sm:$0xff] }
 0x4aa   :  { %v1921_v26 = vadd.f32 %v1873_v31, %v1857_v2  ;;  %v1922_v63 = vadd.f32 %v1874_v20, %v1858_v36  ;;  %v1923_v24 = vadd.f32 %v1875_v28, %v1859_v19  ;;  %v1932_v37 = vadd.f32 %v7501_v42, %v1900_v23  ;;  %v7510_v19 = vld [vmem:[#allocation21_spill] sm:$0xff]  ;;  %v7514_v28 = vld [vmem:[#allocation111_spill] sm:$0xff]  ;;  %v7522_v42 = vld [vmem:[#allocation30_spill] sm:$0xff] }
 0x4ab   :  { %v1933_v13 = vadd.f32 %v7502_v1, %v1901_v51  ;;  %v1888_v5 = vadd.f32 %v1808_v27, %v1752_v52  ;;  %v1889_v34 = vadd.f32 %v1809_v8, %v1753_v12  ;;  %v1890_v46 = vadd.f32 %v1810_v47, %v1754_v60  ;;  %v7513_v20 = vld [vmem:[#allocation117_spill] sm:$0xff]  ;;  %v7523_v1 = vld [vmem:[#allocation99_spill] sm:$0xff] }
 0x4ac   :  { %v1934_v58 = vadd.f32 %v1918_v41, %v1902_v25  ;;  %v1935_v35 = vadd.f32 %v1919_v11, %v1903_v22  ;;  %v1939_v3 = vadd.f32 %v1923_v24, %v1907_v53  ;;  %v1948_v21 = vadd.f32 %v1932_v37, %v7503_v17  ;;  %v7519_v53 = vld [vmem:[#allocation50_spill] sm:$0xff]  ;;  %v7521_v24 = vld [vmem:[#allocation48_spill] sm:$0xff] }
 0x4ad   :  { %v1949_v39 = vadd.f32 %v1933_v13, %v7504_v50  ;;  %v1936_v48 = vadd.f32 %v1920_v9, %v1904_v4  ;;  %v1937_v18 = vadd.f32 %v1921_v26, %v1905_v32  ;;  %v1938_v57 = vadd.f32 %v1922_v63, %v1906_v10  ;;  %v7517_v4 = vld [vmem:[#allocation49_spill] sm:$0xff]  ;;  %v7518_v32 = vld [vmem:[#allocation115_spill] sm:$0xff]  ;;  %v7527_v50 = vld [vmem:[#allocation40_spill] sm:$0xff] }
 0x4ae   :  { %v1950_v7 = vadd.f32 %v1934_v58, %v1886_v40  ;;  %v1951_v15 = vadd.f32 %v1935_v35, %v1887_v16  ;;  %v1955_v49 = vadd.f32 %v1939_v3, %v1891_v6  ;;  %v5539_v54 = vadd.f32 %v1966_v43, %v1948_v21  ;;  %v7515_v6 = vld [vmem:[#allocation112_spill] sm:$0xff]  ;;  %v7525_v58 = vld [vmem:[#allocation102_spill] sm:$0xff]  ;;  %v7526_v3 = vld [vmem:[#allocation103_spill] sm:$0xff] }
 0x4af   :  { %v5541_v44 = vadd.f32 %v1966_v43, %v1949_v39  ;;  %v1952_v52 = vadd.f32 %v1936_v48, %v1888_v5  ;;  %v1953_v8 = vadd.f32 %v1937_v18, %v1889_v34  ;;  %v1954_v12 = vadd.f32 %v1938_v57, %v1890_v46  ;;  %v7528_v48 = vld [vmem:[#allocation60_spill] sm:$0xff]  ;;  %v7529_v18 = vld [vmem:[#allocation118_spill] sm:$0xff] }
 0x4b0   :  { %v5543_v60 = vadd.f32 %v1966_v43, %v1950_v7  ;;  %v5545_v27 = vadd.f32 %v1966_v43, %v1951_v15  ;;  %v5547_v47 = vadd.f32 %v1966_v43, %v1955_v49  ;;  %v2030_v61 = vmul.f32 %v5539_v54, %v5539_v54  ;;  %v7530_v7 = vld [vmem:[#allocation119_spill] sm:$0xff] }
 0x4b1   :  { %v2004_v56 = vadd.f32 %v5541_v44, %v5539_v54  ;;  %v5553_v29 = vadd.f32 %v1966_v43, %v1952_v52  ;;  %v5555_v55 = vadd.f32 %v1966_v43, %v1953_v8  ;;  %v5557_v2 = vadd.f32 %v1966_v43, %v1954_v12  ;;  %v7524_v43 = vld [vmem:[#allocation101_spill] sm:$0xff]  ;;  %v7531_v52 = vld [vmem:[#allocation120_spill] sm:$0xff]  ;;  %v7532_v12 = vld [vmem:[#allocation27_spill] sm:$0xff] }
 0x4b2   :  { %7505 = vst [vmem:[#allocation52_spill] sm:$0xff] %v5545_v27  ;;  %7506 = vst [vmem:[#allocation109_spill] sm:$0xff] %v5547_v47  ;;  %v2031_v36 = vmul.f32 %v5541_v44, %v5541_v44  ;;  %v5563_v62 = vmul.f32 %v7511_v38, %v7510_v19  ;;  %v5567_v31 = vmul.f32 %v7512_v14, %v7510_v19  ;;  %v7534_v14 = vld [vmem:[#allocation62_spill] sm:$0xff] }
 0x4b3   :  { %7507 = vst [vmem:[#allocation56_spill] sm:$0xff] %v5553_v29  ;;  %7508 = vst [vmem:[#allocation70_spill] sm:$0xff] %v5555_v55  ;;  %v5571_v40 = vmul.f32 %v7514_v28, %v7513_v20  ;;  %v2005_v16 = vadd.f32 %v2004_v56, %v5543_v60  ;;  %v5576_v23 = vmul.f32 %v7515_v6, %v7513_v20  ;;  %v7536_v6 = vld [vmem:[#allocation108_spill] sm:$0xff] }
 0x4b4   :  { %7509 = vst [vmem:[#allocation23_spill] sm:$0xff] %v5557_v2  ;;  %v1995_v51 = vmul.f32 %v7516_v59, %v5547_v47  ;;  %v2032_v25 = vmul.f32 %v5543_v60, %v5543_v60  ;;  %v2046_v22 = vadd.f32 %v2031_v36, %v2030_v61  ;;  %v5584_v10 = vadd.f32 %v7518_v32, %v7517_v4  ;;  %v7533_v61 = vld [vmem:[#allocation35_spill] sm:$0xff] }
 0x4b5   :  { %v5588_v0 = vadd.f32 %v7520_v45, %v7519_v53  ;;  %v2006_v41 = vadd.f32 %v2005_v16, %v5545_v27  ;;  %v2033_v30 = vmul.f32 %v5545_v27, %v5545_v27  ;;  %v2034_v33 = vmul.f32 %v5553_v29, %v5553_v29  ;;  %v7535_v16 = vld [vmem:[#allocation75_spill] sm:$0xff]  ;;  %v7538_v53 = vld [vmem:[#allocation61_spill] sm:$0xff]  ;;  %v7539_v45 = vld [vmem:[#allocation100_spill] sm:$0xff] }
 0x4b6   :  { %v2035_v11 = vmul.f32 %v5555_v55, %v5555_v55  ;;  %v2036_v9 = vmul.f32 %v5557_v2, %v5557_v2  ;;  %v2047_v26 = vadd.f32 %v2046_v22, %v2032_v25  ;;  %v1310_v37 = vmul.f32 %v7522_v42, %v7521_v24  ;;  %v7537_v22 = vld [vmem:[#allocation63_spill] sm:$0xff]  ;;  %v7542_v42 = vld [vmem:[#allocation28_spill] sm:$0xff]  ;;  %v7570_v27 = vld [vmem:[#allocation90_spill] sm:$0xff] }
 0x4b7   :  { %v2007_v63 = vadd.f32 %v2006_v41, %v5553_v29  ;;  %v1311_v13 = vmul.f32 %v7523_v1, %v7521_v24  ;;  %v1312_v5 = vmul.f32 %v7524_v43, %v7521_v24  ;;  %v2037_v34 = vmul.f32 %v1995_v51, %v1995_v51  ;;  %v7543_v43 = vld [vmem:[#allocation80_spill] sm:$0xff] }
 0x4b8   :  { %v2048_v46 = vadd.f32 %v2047_v26, %v2033_v30  ;;  %v1313_v35 = vmul.f32 %v7525_v58, %v7521_v24  ;;  %v1314_v17 = vmul.f32 %v7526_v3, %v7521_v24  ;;  %v1315_v39 = vmul.f32 %v7527_v50, %v7521_v24  ;;  %v7540_v30 = vld [vmem:[#allocation107_spill] sm:$0xff]  ;;  %v7541_v26 = vld [vmem:[#allocation98_spill] sm:$0xff]  ;;  %v7546_v50 = vld [vmem:[#allocation24_spill] sm:$0xff] }
 0x4b9   :  { %v2008_v21 = vadd.f32 %v2007_v63, %v5555_v55  ;;  %v1366_v57 = vmul.f32 %v7529_v18, %v7528_v48  ;;  %v1367_v15 = vmul.f32 %v7530_v7, %v7528_v48  ;;  %v1368_v8 = vmul.f32 %v7531_v52, %v7528_v48  ;;  %v7545_v3 = vld [vmem:[#allocation42_spill] sm:$0xff]  ;;  %v7549_v52 = vld [vmem:[#allocation87_spill] sm:$0xff]  ;;  %v7566_v55 = vld [vmem:[#allocation89_spill] sm:$0xff] }
 0x4ba   :  { %v2049_v49 = vadd.f32 %v2048_v46, %v2034_v33  ;;  %v1369_v56 = vmul.f32 %v7532_v12, %v7528_v48  ;;  %v1370_v36 = vmul.f32 %v7533_v61, %v7528_v48  ;;  %v1371_v28 = vmul.f32 %v7534_v14, %v7528_v48  ;;  %v7544_v46 = vld [vmem:[#allocation29_spill] sm:$0xff]  ;;  %v7547_v48 = vld [vmem:[#allocation54_spill] sm:$0xff]  ;;  %v7550_v12 = vld [vmem:[#allocation55_spill] sm:$0xff] }
 0x4bb   :  { %v2009_v38 = vadd.f32 %v2008_v21, %v5557_v2  ;;  %v1426_v25 = vmul.f32 %v7536_v6, %v7535_v16  ;;  %v1427_v4 = vmul.f32 %v7537_v22, %v7535_v16  ;;  %v1480_v41 = vmul.f32 %v7539_v45, %v7538_v53  ;;  %v7548_v7 = vld [vmem:[#allocation46_spill] sm:$0xff]  ;;  %v7552_v14 = vld [vmem:[#allocation31_spill] sm:$0xff]  ;;  %v7554_v22 = vld [vmem:[#allocation93_spill] sm:$0xff] }
 0x4bc   :  { %v2050_v32 = vadd.f32 %v2049_v49, %v2035_v11  ;;  %v1481_v33 = vmul.f32 %v7540_v30, %v7538_v53  ;;  %v1482_v63 = vmul.f32 %v7541_v26, %v7538_v53  ;;  %v1483_v1 = vmul.f32 %v7542_v42, %v7538_v53  ;;  %v7553_v16 = vld [vmem:[#allocation58_spill] sm:$0xff]  ;;  %v7557_v42 = vld [vmem:[#allocation32_spill] sm:$0xff] }
 0x4bd   :  { %v2010_v24 = vadd.f32 %v2009_v38, %v1995_v51  ;;  %v1538_v58 = vmul.f32 %v7544_v46, %v7543_v43  ;;  %v1539_v21 = vmul.f32 %v7545_v3, %v7543_v43  ;;  %v1594_v18 = vmul.f32 %v7547_v48, %v7546_v50  ;;  %v7551_v51 = vld [vmem:[#allocation57_spill] sm:$0xff]  ;;  %v7556_v30 = vld [vmem:[#allocation94_spill] sm:$0xff] }
 0x4be   :  { %v2051_v11 = vadd.f32 %v2050_v32, %v2036_v9  ;;  %v1595_v49 = vmul.f32 %v7548_v7, %v7546_v50  ;;  %v1650_v61 = vmul.f32 %v7550_v12, %v7549_v52  ;;  %v1651_v38 = vmul.f32 %v7551_v51, %v7549_v52  ;;  %v7555_v9 = vld [vmem:[#allocation88_spill] sm:$0xff]  ;;  %v7559_v3 = vld [vmem:[#allocation33_spill] sm:$0xff]  ;;  %v7560_v48 = vld [vmem:[#allocation106_spill] sm:$0xff] }
 0x4bf   :  { %2011 = vadd.xlane.f32.xlu0 %v2010_v24  ;;  %v1706_v6 = vmul.f32 %v7553_v16, %v7552_v14  ;;  %v1707_v53 = vmul.f32 %v7554_v22, %v7552_v14  ;;  %v1760_v32 = vmul.f32 %v7555_v9, %v7513_v20  ;;  %v1761_v26 = vmul.f32 %v7556_v30, %v7513_v20  ;;  %v7558_v24 = vld [vmem:[#allocation105_spill] sm:$0xff] }
 0x4c0   :  { %v2052_v45 = vadd.f32 %v2051_v11, %v2037_v34  ;;  %v1762_v43 = vmul.f32 %v7557_v42, %v7513_v20  ;;  %v1763_v46 = vmul.f32 %v7558_v24, %v7513_v20  ;;  %v1816_v50 = vmul.f32 %v7559_v3, %v7510_v19  ;;  %v7561_v52 = vld [vmem:[#allocation97_spill] sm:$0xff]  ;;  %v7562_v34 = vld [vmem:[#allocation39_spill] sm:$0xff]  ;;  %v7563_v20 = vld [vmem:[#allocation78_spill] sm:$0xff] }
 0x4c1   :  { %v1817_v7 = vmul.f32 %v7560_v48, %v7510_v19  ;;  %v1818_v12 = vmul.f32 %v7561_v52, %v7510_v19  ;;  %v1830_v51 = vadd.f32 %v1366_v57, %v1310_v37  ;;  %v1819_v11 = vmul.f32 %v7562_v34, %v7510_v19  ;;  %v7564_v24 = vld [vmem:[#allocation79_spill] sm:$0xff]  ;;  %v7565_v48 = vld [vmem:[#allocation84_spill] sm:$0xff]  ;;  %v7568_v37 = vld [vmem:[#allocation113_spill] sm:$0xff] }
 0x4c2   :  { %2053 = vadd.xlane.f32.xlu1 %v2052_v45  ;;  %v1831_v14 = vadd.f32 %v1367_v15, %v1311_v13  ;;  %v1832_v16 = vadd.f32 %v1368_v8, %v1312_v5  ;;  %v1833_v22 = vadd.f32 %v1369_v56, %v1313_v35  ;;  %v1834_v9 = vadd.f32 %v1370_v36, %v1314_v17  ;;  %v7567_v52 = vld [vmem:[#allocation95_spill] sm:$0xff]  ;;  %v7569_v45 = vld [vmem:[#allocation85_spill] sm:$0xff]  ;;  %v7571_v35 = vld [vmem:[#allocation82_spill] sm:$0xff] }
 0x4c3   :  { %v1835_v30 = vadd.f32 %v1371_v28, %v1315_v39  ;;  %v1848_v42 = vadd.f32 %v1480_v41, %v7563_v20  ;;  %v1849_v3 = vadd.f32 %v1481_v33, %v7564_v24  ;;  %v1850_v47 = vadd.f32 %v1482_v63, %v1426_v25  ;;  %v7572_v39 = vld [vmem:[#allocation96_spill] sm:$0xff]  ;;  %v7573_v15 = vld [vmem:[#allocation114_spill] sm:$0xff]  ;;  %v7574_v25 = vld [vmem:[#allocation83_spill] sm:$0xff] }
 0x4c4   :  { %v1851_v2 = vadd.f32 %v1483_v1, %v1427_v4  ;;  %v1864_v29 = vadd.f32 %v7566_v55, %v7565_v48  ;;  %v1880_v57 = vadd.f32 %v7568_v37, %v7567_v52  ;;  %v1865_v19 = vadd.f32 %v7570_v27, %v7569_v45  ;;  %v7575_v41 = vld [vmem:[#allocation91_spill] sm:$0xff]  ;;  %v7576_v33 = vld [vmem:[#allocation41_spill] sm:$0xff]  ;;  %v7577_v63 = vld [vmem:[#allocation92_spill] sm:$0xff] }
 0x4c5   :  { %v1866_v13 = vadd.f32 %v1594_v18, %v1538_v58  ;;  %v1867_v5 = vadd.f32 %v1595_v49, %v1539_v21  ;;  %v1910_v17 = vadd.f32 %v7571_v35, %v1830_v51  ;;  %v1881_v8 = vadd.f32 %v7573_v15, %v7572_v39  ;;  %v7578_v1 = vld [vmem:[#allocation36_spill] sm:$0xff]  ;;  %v7579_v51 = vld [vmem:[#allocation86_spill] sm:$0xff]  ;;  %v7582_v34 = vld [vmem:[#allocation43_spill] sm:$0xff] }
 0x4c6   :  { %v1882_v56 = vadd.f32 %v1706_v6, %v1650_v61  ;;  %v1883_v36 = vadd.f32 %v1707_v53, %v1651_v38  ;;  %v1894_v28 = vadd.f32 %v5563_v62, %v5571_v40  ;;  %v1895_v55 = vadd.f32 %v5567_v31, %v5576_v23  ;;  %v7580_v61 = vld [vmem:[#allocation37_spill] sm:$0xff]  ;;  %v1970_v6 = vpop.permute.xlu1 %1969 }
 0x4c7   :  { %v1911_v4 = vadd.f32 %v7574_v25, %v1831_v14  ;;  %v1926_v27 = vadd.f32 %v7576_v33, %v7575_v41  ;;  %v1927_v58 = vadd.f32 %v7578_v1, %v7577_v63  ;;  %v1896_v21 = vadd.f32 %v1816_v50, %v1760_v32  ;;  %v7581_v40 = vld [vmem:[#allocation25_spill] sm:$0xff] }
 0x4c8   :  { %v1912_v18 = vadd.f32 %v1848_v42, %v1832_v16  ;;  %v1928_v49 = vadd.f32 %v1880_v57, %v1864_v29  ;;  %v1940_v38 = vadd.f32 %v7580_v61, %v7579_v51  ;;  %v1913_v53 = vadd.f32 %v1849_v3, %v1833_v22 }
 0x4c9   :  { %v1914_v62 = vadd.f32 %v1850_v47, %v1834_v9  ;;  %v1941_v31 = vadd.f32 %v7582_v34, %v7581_v40  ;;  %v1942_v23 = vadd.f32 %v1926_v27, %v1910_v17  ;;  %v1915_v14 = vadd.f32 %v1851_v2, %v1835_v30 }
 0x4ca   :  { %v1929_v20 = vadd.f32 %v1881_v8, %v1865_v19  ;;  %v1931_v24 = vadd.f32 %v1883_v36, %v1867_v5  ;;  %v1956_v48 = vadd.f32 %v1940_v38, %v5584_v10  ;;  %v1930_v52 = vadd.f32 %v1882_v56, %v1866_v13 }
 0x4cb   :  { %v1943_v37 = vadd.f32 %v1927_v58, %v1911_v4  ;;  %v1957_v32 = vadd.f32 %v1941_v31, %v5588_v0  ;;  %v1958_v29 = vadd.f32 %v1942_v23, %v1894_v28  ;;  %v1897_v50 = vadd.f32 %v1817_v7, %v1761_v26 }
 0x4cc   :  { %v1899_v16 = vadd.f32 %v1819_v11, %v1763_v46  ;;  %v1944_v42 = vadd.f32 %v1928_v49, %v1912_v18  ;;  %v5696_v57 = vadd.f32 %v1970_v6, %v1956_v48  ;;  %v1898_v47 = vadd.f32 %v1818_v12, %v1762_v43 }
 0x4cd   :  { %v1959_v22 = vadd.f32 %v1943_v37, %v1895_v55  ;;  %v5698_v9 = vadd.f32 %v1970_v6, %v1957_v32  ;;  %v5700_v3 = vadd.f32 %v1970_v6, %v1958_v29  ;;  %v1945_v2 = vadd.f32 %v1929_v20, %v1913_v53 }
 0x4ce   :  { %v1947_v30 = vadd.f32 %v1931_v24, %v1915_v14  ;;  %v1960_v45 = vadd.f32 %v1944_v42, %v1896_v21  ;;  %v2013_v10 = vsel %vm196_vm1, %v5696_v57, 0.0  ;;  %v1946_v19 = vadd.f32 %v1930_v52, %v1914_v62 }
 0x4cf   :  { %v5704_v0 = vadd.f32 %v1970_v6, %v1959_v22  ;;  %v2014_v26 = vsel %vm196_vm1, %v5698_v9, 0.0  ;;  %v1961_v46 = vadd.f32 %v1945_v2, %v1897_v50  ;;  %v2016_v11 = vsel %vm196_vm1, %v5700_v3, 0.0 }
 0x4d0   :  { %v1963_v7 = vadd.f32 %v1947_v30, %v1899_v16  ;;  %v5708_v43 = vadd.f32 %v1970_v6, %v1960_v45  ;;  %v2015_v12 = vadd.f32 %v2014_v26, %v2013_v10  ;;  %v2038_v13 = vmul.f32 %v5696_v57, %v5696_v57  ;;  %v5751_v45 = vld [vmem:[#allocation5 + $0x30] sm:$0xff] }
 0x4d1   :  { %v2039_v5 = vmul.f32 %v5698_v9, %v5698_v9  ;;  %v2040_v35 = vmul.f32 %v5700_v3, %v5700_v3  ;;  %v1962_v17 = vadd.f32 %v1946_v19, %v1898_v47  ;;  %v5718_v39 = vadd.f32 %v1970_v6, %v1961_v46 }
 0x4d2   :  { %v5720_v15 = vadd.f32 %v1970_v6, %v1963_v7  ;;  %v2017_v8 = vadd.f32 %v2016_v11, %v2015_v12  ;;  %v2018_v56 = vsel %vm196_vm1, %v5704_v0, 0.0  ;;  %v2041_v36 = vmul.f32 %v5704_v0, %v5704_v0  ;;  %v77_v7 = vld [vmem:[#allocation5 + $0x28] sm:$0x3] }
 0x4d3   :  { %v2055_v28 = vsel %vm196_vm1, %v2038_v13, 0.0  ;;  %v2056_v55 = vsel %vm196_vm1, %v2039_v5, 0.0  ;;  %v5728_v41 = vadd.f32 %v1970_v6, %v1962_v17  ;;  %v2020_v33 = vsel %vm196_vm1, %v5708_v43, 0.0 }
 0x4d4   :  { %v2019_v25 = vadd.f32 %v2018_v56, %v2017_v8  ;;  %v2057_v4 = vadd.f32 %v2056_v55, %v2055_v28  ;;  %v2042_v27 = vmul.f32 %v5708_v43, %v5708_v43  ;;  %v2058_v63 = vsel %vm196_vm1, %v2040_v35, 0.0  ;;  %v3501_v55 = vld [vmem:[#allocation5 + $0x38] sm:$0x3] }
 0x4d5   :  { %v2003_v21 = vmul.f32 %v7516_v59, %v5720_v15  ;;  %v2022_v18 = vsel %vm196_vm1, %v5718_v39, 0.0  ;;  %v2043_v49 = vmul.f32 %v5718_v39, %v5718_v39  ;;  %v2060_v51 = vsel %vm196_vm1, %v2041_v36, 0.0 }
 0x4d6   :  { %v2021_v1 = vadd.f32 %v2020_v33, %v2019_v25  ;;  %v2059_v58 = vadd.f32 %v2058_v63, %v2057_v4  ;;  %v2024_v6 = vsel %vm196_vm1, %v5728_v41, 0.0  ;;  %v2044_v53 = vmul.f32 %v5728_v41, %v5728_v41 }
 0x4d7   :  { %v2062_v62 = vsel %vm196_vm1, %v2042_v27, 0.0  ;;  %v2026_v31 = vsel %vm196_vm1, %v2003_v21, 0.0  ;;  %v2045_v23 = vmul.f32 %v2003_v21, %v2003_v21  ;;  %v2064_v14 = vsel %vm196_vm1, %v2043_v49, 0.0  ;;  %v76_v27 = vld [vmem:[#allocation5 + $0x20] sm:$0xff] }
 0x4d8   :  { %v2023_v61 = vadd.f32 %v2022_v18, %v2021_v1  ;;  %v2061_v38 = vadd.f32 %v2060_v51, %v2059_v58  ;;  %v2066_v48 = vsel %vm196_vm1, %v2044_v53, 0.0  ;;  %v7583_v5 = vmov 0  }
 0x4d9   :  { %v2068_v37 = vsel %vm196_vm1, %v2045_v23, 0.0  ;;  %v7584_v8 = vmov 2   ;;  %v7585_v56 = vmov 3   ;;  %v7586_v36 = vmov 5  }
 0x4da   :  { %v2025_v40 = vadd.f32 %v2024_v6, %v2023_v61  ;;  %v2063_v34 = vadd.f32 %v2062_v62, %v2061_v38  ;;  %v7587_v4 = vmov 6   ;;  %v7588_v63 = vmov 1  }
 0x4db   :  { %v7589_v1 = vmov 4   ;;  %v7590_v58 = vmov 9   ;;  %v7591_v21 = vmov 7   ;;  %v7592_v18 = vmov 8  }
 0x4dc   :  { %v2027_v20 = vadd.f32 %v2026_v31, %v2025_v40  ;;  %v2065_v24 = vadd.f32 %v2064_v14, %v2063_v34  ;;  %v3586_v6 = vmov 10  }
 0x4de   :  { %2028 = vadd.xlane.f32.xlu0 %v2027_v20  ;;  %v2067_v52 = vadd.f32 %v2066_v48, %v2065_v24 }
 0x4e0   :  { %v2069_v32 = vadd.f32 %v2068_v37, %v2067_v52 }
 0x4e2   :  { %2070 = vadd.xlane.f32.xlu0 %v2069_v32  ;;  %v7599_v32 = vld [vmem:[#allocation52_spill] sm:$0xff] }
 0x548   :  { %v2012_v29 = vpop.xlane.xlu0 %2011 }
 0x549   :  { %v2072_v50 = vmul.f32 0.001, %v2012_v29 }
 0x54b   :  { %v2076_v16 = vmul.f32 %v2072_v50, %v2072_v50  ;;  %v2054_v42 = vpop.xlane.xlu1 %2053 }
 0x54c   :  { %v2074_v47 = vmul.f32 0.001, %v2054_v42 }
 0x54e   :  { %v2078_v22 = vsub.f32 %v2074_v47, %v2076_v16  ;;  %v7600_v16 = vld [vmem:[#allocation56_spill] sm:$0xff] }
 0x550   :  { %v2080_v2 = vadd.f32 1e-06, %v2078_v22 }
 0x552   :  { %3426 = vrsqrt.f32 %v2080_v2 }
 0x55f   :  { %v3427_v30 = vpop.eup %3426 }
 0x560   :  { %v2084_v10 = vmul.f32 %v5751_v45, %v3427_v30  ;;  %v7601_v30 = vld [vmem:[#allocation70_spill] sm:$0xff] }
 0x562   :  { %v2086_v19 = vmul.f32 %v2084_v10, %v2072_v50 }
 0x564   :  { %2090 = vrot.lane.b32.xlu1 %v2086_v19, %s3578_s0 }
 0x567   :  { %v2029_v26 = vpop.xlane.xlu0 %2028 }
 0x568   :  { %v2073_v46 = vmul.f32 0.001, %v2029_v26  ;;  %2100 = vperm.xlu1 %3323, %v2084_v10  }
 0x56a   :  { %v2077_v11 = vmul.f32 %v2073_v46, %v2073_v46 }
 0x56b   :  { %v2071_v12 = vpop.xlane.xlu0 %2070 }
 0x56c   :  { %v2075_v13 = vmul.f32 0.001, %v2071_v12  ;;  %3325 = vset.pattern.permute.xlu1 %v7583_v5 }
 0x56d   :  { %2173 = vperm.xlu1 %3325, %v77_v7  }
 0x56e   :  { %v2079_v35 = vsub.f32 %v2075_v13, %v2077_v11 }
 0x570   :  { %v2081_v17 = vadd.f32 1e-06, %v2079_v35 }
 0x571   :  { %3327 = vset.pattern.permute.xlu1 %v7584_v8 }
 0x572   :  { %3428 = vrsqrt.f32 %v2081_v17  ;;  %2285 = vperm.xlu1 %3327, %v77_v7  }
 0x576   :  { %3328 = vset.pattern.permute.xlu1 %v7585_v56 }
 0x577   :  { %2341 = vperm.xlu1 %3328, %v77_v7  }
 0x57b   :  { %3330 = vset.pattern.permute.xlu1 %v7586_v36 }
 0x57c   :  { %2453 = vperm.xlu1 %3330, %v77_v7  }
 0x57f   :  { %v3429_v28 = vpop.eup %3428 }
 0x580   :  { %v2085_v25 = vmul.f32 %v3501_v55, %v3429_v28  ;;  %3331 = vset.pattern.permute.xlu1 %v7587_v4 }
 0x581   :  { %2509 = vperm.xlu1 %3331, %v77_v7  }
 0x582   :  { %v2087_v33 = vmul.f32 %v2085_v25, %v2073_v46 }
 0x584   :  { %2092 = vrot.lane.b32.xlu0 %v2087_v33, %s3578_s0 }
 0x585   :  { %3333 = vset.pattern.permute.xlu1 %v7583_v5 }
 0x586   :  { %2168 = vperm.xlu1 %3333, %v76_v27  }
 0x588   :  { %2105 = vperm.xlu0 %3324, %v2085_v25  }
 0x58a   :  { %3334 = vset.pattern.permute.xlu1 %v7588_v63 }
 0x58b   :  { %2225 = vperm.xlu1 %3334, %v76_v27  }
 0x58c   :  { %3326 = vset.pattern.permute.xlu0 %v7588_v63 }
 0x58d   :  { %2229 = vperm.xlu0 %3326, %v77_v7  }
 0x58f   :  { %3336 = vset.pattern.permute.xlu1 %v7585_v56 }
 0x590   :  { %2337 = vperm.xlu1 %3336, %v76_v27  }
 0x591   :  { %3329 = vset.pattern.permute.xlu0 %v7589_v1 }
 0x592   :  { %2397 = vperm.xlu0 %3329, %v77_v7  }
 0x594   :  { %3337 = vset.pattern.permute.xlu1 %v7590_v58 }
 0x596   :  { %3332 = vset.pattern.permute.xlu0 %v7591_v21 }
 0x597   :  { %2565 = vperm.xlu0 %3332, %v77_v7  }
 0x59b   :  { %3335 = vset.pattern.permute.xlu0 %v7584_v8 }
 0x59c   :  { %2281 = vperm.xlu0 %3335, %v76_v27  }
 0x5a0   :  { %3339 = vset.pattern.permute.xlu0 %v7586_v36 }
 0x5a1   :  { %2449 = vperm.xlu0 %3339, %v76_v27  }
 0x5a5   :  { %3342 = vset.pattern.permute.xlu0 %v7592_v18 }
 0x5a6   :  { %2621 = vperm.xlu0 %3342, %v77_v7  }
 0x5aa   :  { %3345 = vset.pattern.permute.xlu0 %v7590_v58 }
 0x5ab   :  { %2673 = vperm.xlu0 %3345, %v76_v27  }
 0x5d6   :  { %v2091_v49 = vpop.permute.xlu1 %2090 }
 0x5d7   :  { %v2096_v51 = vsub.f32 %v5751_v45, %v2091_v49 }
 0x5d9   :  { %2126 = vperm.xlu1 %3337, %v2096_v51   ;;  %v7608_v51 = vld [vmem:[#allocation17_spill] sm:$0xff] }
 0x5e3   :  { %v2101_v53 = vpop.permute.xlu1 %2100 }
 0x5e4   :  { %v2108_v48 = vmul.f32 %v2101_v53, %v5539_v54  ;;  %v2109_v52 = vmul.f32 %v2101_v53, %v5541_v44  ;;  %v2110_v37 = vmul.f32 %v2101_v53, %v5543_v60  ;;  %v2111_v29 = vmul.f32 %v2101_v53, %v7599_v32  ;;  %v7602_v54 = vld [vmem:[#allocation23_spill] sm:$0xff] }
 0x5e5   :  { %v2112_v42 = vmul.f32 %v2101_v53, %v7600_v16  ;;  %v2114_v44 = vmul.f32 %v2101_v53, %v7602_v54 }
 0x5e8   :  { %v5779_v62 = vpop.permute.xlu1 %2173 }
 0x5e9   :  { %7593 = vst [vmem:[#allocation38_spill] sm:$0xff] %v5779_v62 }
 0x5ed   :  { %v5781_v40 = vpop.permute.xlu1 %2285 }
 0x5f2   :  { %v5783_v34 = vpop.permute.xlu1 %2341 }
 0x5f6   :  { %v2093_v61 = vpop.permute.xlu0 %2092 }
 0x5f7   :  { %v2097_v38 = vsub.f32 %v3501_v55, %v2093_v61  ;;  %v5785_v31 = vpop.permute.xlu1 %2453 }
 0x5f8   :  { %7594 = vst [vmem:[#allocation66_spill] sm:$0xff] %v5785_v31 }
 0x5f9   :  { %2131 = vperm.xlu1 %3337, %v2097_v38  }
 0x5fc   :  { %v5787_v23 = vpop.permute.xlu1 %2509 }
 0x5fd   :  { %3338 = vset.pattern.permute.xlu1 %v7589_v1  ;;  %7595 = vst [vmem:[#allocation67_spill] sm:$0xff] %v5787_v23 }
 0x5fe   :  { %2393 = vperm.xlu1 %3338, %v76_v27  }
 0x601   :  { %v5789_v14 = vpop.permute.xlu1 %2168 }
 0x602   :  { %3340 = vset.pattern.permute.xlu1 %v7587_v4  ;;  %7596 = vst [vmem:[#allocation104_spill] sm:$0xff] %v5789_v14  ;;  %v7605_v4 = vld [vmem:[#allocation13_spill] sm:$0xff] }
 0x603   :  { %2505 = vperm.xlu1 %3340, %v76_v27   ;;  %v2106_v60 = vpop.permute.xlu0 %2105 }
 0x604   :  { %v5806_v13 = vmul.f32 %v2106_v60, %v5696_v57  ;;  %v5811_v35 = vmul.f32 %v2106_v60, %v5698_v9  ;;  %v5814_v17 = vmul.f32 %v2106_v60, %v5700_v3  ;;  %v5817_v8 = vmul.f32 %v2106_v60, %v5704_v0  ;;  %v7604_v3 = vld [vmem:[#allocation12_spill] sm:$0xff] }
 0x605   :  { %v5822_v28 = vmul.f32 %v2106_v60, %v5708_v43  ;;  %v5825_v57 = vmul.f32 %v2106_v60, %v5718_v39 }
 0x606   :  { %v5791_v20 = vpop.permute.xlu1 %2225 }
 0x607   :  { %3341 = vset.pattern.permute.xlu1 %v7591_v21  ;;  %7597 = vst [vmem:[#allocation51_spill] sm:$0xff] %v5791_v20  ;;  %v5861_v21 = vmul.f32 %v2106_v60, %v5720_v15 }
 0x608   :  { %2561 = vperm.xlu1 %3341, %v76_v27   ;;  %v5871_v38 = vpop.permute.xlu0 %2229 }
 0x609   :  { %7609 = vst [vmem:[#allocation53_spill] sm:$0xff] %v5871_v38 }
 0x60b   :  { %v5793_v24 = vpop.permute.xlu1 %2337 }
 0x60c   :  { %3343 = vset.pattern.permute.xlu1 %v7590_v58  ;;  %7598 = vst [vmem:[#allocation110_spill] sm:$0xff] %v5793_v24 }
 0x60d   :  { %2677 = vperm.xlu1 %3343, %v77_v7   ;;  %v7603_v7 = vld [vmem:[#allocation109_spill] sm:$0xff] }
 0x60e   :  { %v2115_v12 = vmul.f32 %v2101_v53, %v7603_v7 }
 0x611   :  { %3344 = vset.pattern.permute.xlu1 %v7592_v18  ;;  %v7607_v18 = vld [vmem:[#allocation16_spill] sm:$0xff] }
 0x612   :  { %2617 = vperm.xlu1 %3344, %v76_v27  }
 0x616   :  { %3346 = vset.pattern.permute.xlu1 %v3586_v6 }
 0x617   :  { %2877 = vperm.xlu1 %3346, %v3501_v55   ;;  %v5828_v55 = vmul.f32 %v2106_v60, %v5728_v41 }
 0x61b   :  { %2873 = vperm.xlu1 %3346, %v5751_v45   ;;  %v2113_v45 = vmul.f32 %v2101_v53, %v7601_v30 }
 0x654   :  { %v2127_v50 = vpop.permute.xlu1 %2126 }
 0x655   :  { %v2134_v47 = vadd.f32 %v2127_v50, %v2108_v48  ;;  %v2135_v22 = vadd.f32 %v2127_v50, %v2109_v52  ;;  %v2136_v2 = vadd.f32 %v2127_v50, %v2110_v37  ;;  %v2137_v10 = vadd.f32 %v2127_v50, %v2111_v29 }
 0x656   :  { %v2138_v19 = vadd.f32 %v2127_v50, %v2112_v42  ;;  %v2139_v26 = vadd.f32 %v2127_v50, %v2113_v45  ;;  %v2140_v46 = vadd.f32 %v2127_v50, %v2114_v44  ;;  %v2141_v56 = vadd.f32 %v2127_v50, %v2115_v12 }
 0x657   :  { %3430 = vtanh.f32 %v2134_v47 }
 0x658   :  { %3432 = vtanh.f32 %v2135_v22 }
 0x659   :  { %3434 = vtanh.f32 %v2136_v2 }
 0x65a   :  { %3436 = vtanh.f32 %v2137_v10 }
 0x65b   :  { %3438 = vtanh.f32 %v2138_v19 }
 0x65c   :  { %3440 = vtanh.f32 %v2139_v26 }
 0x65d   :  { %3442 = vtanh.f32 %v2140_v46 }
 0x65e   :  { %3444 = vtanh.f32 %v2141_v56 }
 0x664   :  { %v5803_v11 = vpop.eup %3430 }
 0x665   :  { %v5808_v5 = vpop.eup %3432  ;;  %v5834_v25 = vrot.slane %v5803_v11, %v7604_v3  ;;  %v2235_v43 = vrot.slane %v5803_v11, %v7605_v4  ;;  %v5865_v49 = vrot.slane %v5803_v11, %v7607_v18  ;;  %v5869_v61 = vrot.slane %v5803_v11, %v7608_v51 }
 0x666   :  { %v5819_v36 = vpop.eup %3434  ;;  %v5838_v0 = vrot.slane %v5808_v5, %v7604_v3  ;;  %v2239_v39 = vrot.slane %v5808_v5, %v7605_v4  ;;  %v5881_v15 = vrot.slane %v5808_v5, %v7607_v18  ;;  %v5885_v48 = vrot.slane %v5808_v5, %v7608_v51 }
 0x667   :  { %v5830_v9 = vpop.eup %3436  ;;  %v5848_v41 = vrot.slane %v5819_v36, %v7604_v3  ;;  %v2243_v63 = vrot.slane %v5819_v36, %v7605_v4  ;;  %v2216_v52 = vmul.f32 %v5834_v25, %v5779_v62  ;;  %v2272_v32 = vmul.f32 %v2235_v43, %v5871_v38 }
 0x668   :  { %v5844_v33 = vpop.eup %3438  ;;  %v5852_v27 = vrot.slane %v5830_v9, %v7604_v3  ;;  %v2247_v1 = vrot.slane %v5830_v9, %v7605_v4  ;;  %v2217_v37 = vmul.f32 %v5838_v0, %v5779_v62  ;;  %v2273_v29 = vmul.f32 %v2239_v39, %v5871_v38 }
 0x669   :  { %v5858_v58 = vpop.eup %3440  ;;  %v2251_v6 = vrot.slane %v5844_v33, %v7605_v4  ;;  %v2218_v50 = vmul.f32 %v5848_v41, %v5779_v62  ;;  %v2274_v42 = vmul.f32 %v2243_v63, %v5871_v38  ;;  %v5900_v22 = vmul.f32 %v2235_v43, %v5791_v20  ;;  %v5941_v43 = vpop.permute.xlu0 %2397 }
 0x66a   :  { %7606 = vst [vmem:[#allocation47_spill] sm:$0xff] %v5852_v27  ;;  %v5877_v53 = vrot.slane %v5858_v58, %v7605_v4  ;;  %v2219_v16 = vmul.f32 %v5852_v27, %v5779_v62  ;;  %v2275_v47 = vmul.f32 %v2247_v1, %v5871_v38  ;;  %v5903_v2 = vmul.f32 %v2239_v39, %v5791_v20 }
 0x66b   :  { %v5906_v30 = vmul.f32 %v2243_v63, %v5791_v20  ;;  %v5909_v45 = vmul.f32 %v2247_v1, %v5791_v20  ;;  %v5912_v10 = vmul.f32 %v2251_v6, %v5791_v20  ;;  %v5915_v19 = vmul.f32 %v2251_v6, %v5871_v38  ;;  %7619 = vst [vmem:[#allocation65_spill] sm:$0xff] %v5941_v43 }
 0x66c   :  { %7610 = vst [vmem:[#allocation76_spill] sm:$0xff] %v5877_v53  ;;  %v5919_v26 = vmul.f32 %v5877_v53, %v5871_v38  ;;  %v5923_v54 = vrot.slane %v5819_v36, %v7607_v18  ;;  %v5925_v44 = vadd.f32 %v2272_v32, %v2216_v52  ;;  %v5927_v60 = vadd.f32 %v2273_v29, %v2217_v37 }
 0x66d   :  { %7611 = vst [vmem:[#allocation77_spill] sm:$0xff] %v5909_v45  ;;  %7612 = vst [vmem:[#allocation59_spill] sm:$0xff] %v5912_v10  ;;  %v5931_v46 = vrot.slane %v5830_v9, %v7607_v18  ;;  %v5935_v7 = vrot.slane %v5844_v33, %v7607_v18  ;;  %v5937_v12 = vadd.f32 %v2274_v42, %v2218_v50  ;;  %v7620_v50 = vld [vmem:[#allocation18_spill] sm:$0xff] }
 0x66e   :  { %7613 = vst [vmem:[#allocation64_spill] sm:$0xff] %v5915_v19  ;;  %7614 = vst [vmem:[#allocation68_spill] sm:$0xff] %v5919_v26  ;;  %v5939_v56 = vadd.f32 %v2275_v47, %v2219_v16  ;;  %v5945_v39 = vrot.slane %v5858_v58, %v7607_v18  ;;  %v5949_v63 = vrot.slane %v5819_v36, %v7608_v51  ;;  %v5973_v47 = vpop.eup %3442 }
 0x66f   :  { %7615 = vst [vmem:[#allocation71_spill] sm:$0xff] %v5925_v44  ;;  %7616 = vst [vmem:[#allocation81_spill] sm:$0xff] %v5927_v60  ;;  %v2440_v1 = vmul.f32 %v5865_v49, %v5941_v43  ;;  %v2441_v6 = vmul.f32 %v5881_v15, %v5941_v43  ;;  %v5957_v52 = vrot.slane %v5830_v9, %v7608_v51 }
 0x670   :  { %7617 = vst [vmem:[#allocation69_spill] sm:$0xff] %v5937_v12  ;;  %7618 = vst [vmem:[#allocation72_spill] sm:$0xff] %v5939_v56  ;;  %v2496_v37 = vmul.f32 %v5869_v61, %v5785_v31  ;;  %v2442_v32 = vmul.f32 %v5923_v54, %v5941_v43  ;;  %v2497_v29 = vmul.f32 %v5885_v48, %v5785_v31  ;;  %v7627_v12 = vld [vmem:[#allocation19_spill] sm:$0xff] }
 0x671   :  { %v5967_v16 = vrot.slane %v5803_v11, %v7620_v50  ;;  %v5971_v42 = vrot.slane %v5808_v5, %v7620_v50  ;;  %v2443_v10 = vmul.f32 %v5931_v46, %v5941_v43  ;;  %v5979_v45 = vmul.f32 %v5935_v7, %v5941_v43 }
 0x672   :  { %v5983_v53 = vrot.slane %v5819_v36, %v7620_v50  ;;  %v5987_v20 = vrot.slane %v5830_v9, %v7620_v50  ;;  %v5991_v27 = vmul.f32 %v5945_v39, %v5941_v43  ;;  %v2498_v59 = vmul.f32 %v5949_v63, %v5785_v31  ;;  %v6010_v43 = vpop.eup %3444 }
 0x673   :  { %7621 = vst [vmem:[#allocation73_spill] sm:$0xff] %v5967_v16  ;;  %7622 = vst [vmem:[#allocation22_spill] sm:$0xff] %v5971_v42  ;;  %v5997_v60 = vrot.slane %v5803_v11, %v7627_v12  ;;  %v6001_v44 = vrot.slane %v5808_v5, %v7627_v12  ;;  %v2768_v26 = vadd.f32 %v2496_v37, %v2440_v1  ;;  %v6018_v1 = vpop.permute.xlu0 %2565 }
 0x674   :  { %7623 = vst [vmem:[#allocation74_spill] sm:$0xff] %v5979_v45  ;;  %7624 = vst [vmem:[#allocation26_spill] sm:$0xff] %v5983_v53  ;;  %v2132_v56 = vpop.permute.xlu1 %2131  ;;  %v2499_v45 = vmul.f32 %v5957_v52, %v5785_v31  ;;  %v2769_v38 = vadd.f32 %v2497_v29, %v2441_v6  ;;  %v2552_v4 = vmul.f32 %v5967_v16, %v5787_v23 }
 0x675   :  { %7625 = vst [vmem:[#allocation34_spill] sm:$0xff] %v5987_v20  ;;  %7626 = vst [vmem:[#allocation21_spill] sm:$0xff] %v5991_v27  ;;  %v2142_v19 = vadd.f32 %v2132_v56, %v5806_v13  ;;  %v6008_v27 = vrot.slane %v5819_v36, %v7627_v12  ;;  %v2143_v62 = vadd.f32 %v2132_v56, %v5811_v35 }
 0x676   :  { %7628 = vst [vmem:[#allocation44_spill] sm:$0xff] %v5997_v60  ;;  %7629 = vst [vmem:[#allocation45_spill] sm:$0xff] %v6001_v44  ;;  %v2553_v3 = vmul.f32 %v5971_v42, %v5787_v23  ;;  %v2144_v31 = vadd.f32 %v2132_v56, %v5814_v17  ;;  %v2554_v13 = vmul.f32 %v5983_v53, %v5787_v23 }
 0x677   :  { %7630 = vst [vmem:[#allocation117_spill] sm:$0xff] %v6008_v27  ;;  %7631 = vst [vmem:[#allocation111_spill] sm:$0xff] %v6010_v43  ;;  %v2555_v37 = vmul.f32 %v5987_v20, %v5787_v23  ;;  %v6026_v6 = vrot.slane %v5830_v9, %v7627_v12  ;;  %v2145_v35 = vadd.f32 %v2132_v56, %v5817_v8  ;;  %3446 = vtanh.f32 %v2142_v19 }
 0x678   :  { %7632 = vst [vmem:[#allocation112_spill] sm:$0xff] %v6018_v1  ;;  %v6031_v29 = vrot.slane %v5844_v33, %v7627_v12  ;;  %v2608_v17 = vmul.f32 %v5997_v60, %v6018_v1  ;;  %v2609_v43 = vmul.f32 %v6001_v44, %v6018_v1  ;;  %v2146_v53 = vadd.f32 %v2132_v56, %v5822_v28 }
 0x679   :  { %v6040_v23 = vrot.slane %v5858_v58, %v7627_v12  ;;  %v2610_v8 = vmul.f32 %v6008_v27, %v6018_v1  ;;  %v2147_v20 = vadd.f32 %v2132_v56, %v5825_v57  ;;  %3448 = vtanh.f32 %v2143_v62  ;;  %v6067_v57 = vpop.permute.xlu1 %2393 }
 0x67a   :  { %v2611_v42 = vmul.f32 %v6026_v6, %v6018_v1  ;;  %v2784_v60 = vadd.f32 %v2608_v17, %v2552_v4  ;;  %v6047_v16 = vadd.f32 %v2498_v59, %v2442_v32  ;;  %v2148_v44 = vadd.f32 %v2132_v56, %v5828_v55  ;;  %7638 = vst [vmem:[#allocation30_spill] sm:$0xff] %v6067_v57  ;;  %v7646_v32 = vld [vmem:[#allocation15_spill] sm:$0xff] }
 0x67b   :  { %3450 = vtanh.f32 %v2144_v31  ;;  %v2785_v28 = vadd.f32 %v2609_v43, %v2553_v3  ;;  %v6050_v19 = vadd.f32 %v2499_v45, %v2443_v10  ;;  %v2149_v12 = vadd.f32 %v2132_v56, %v5861_v21  ;;  %v7642_v45 = vld [vmem:[#allocation14_spill] sm:$0xff] }
 0x67c   :  { %7633 = vst [vmem:[#allocation49_spill] sm:$0xff] %v6047_v16  ;;  %3452 = vtanh.f32 %v2145_v35  ;;  %v6055_v27 = vmul.f32 %v6031_v29, %v6018_v1  ;;  %v6059_v62 = vmul.f32 %v6040_v23, %v6018_v1  ;;  %v6061_v59 = vadd.f32 %v2610_v8, %v2554_v13 }
 0x67d   :  { %7634 = vst [vmem:[#allocation115_spill] sm:$0xff] %v6050_v19  ;;  %3454 = vtanh.f32 %v2146_v53  ;;  %v6065_v31 = vrot.slane %v5973_v47, %v7607_v18  ;;  %v6069_v55 = vadd.f32 %v2611_v42, %v2555_v37  ;;  %v6071_v3 = vadd.f32 %v2784_v60, %v2768_v26  ;;  %v6109_v60 = vpop.permute.xlu0 %2281 }
 0x67e   :  { %7635 = vst [vmem:[#allocation50_spill] sm:$0xff] %v6055_v27  ;;  %7636 = vst [vmem:[#allocation116_spill] sm:$0xff] %v6059_v62  ;;  %3456 = vtanh.f32 %v2147_v20  ;;  %v6075_v4 = vmul.f32 %v5865_v49, %v6067_v57  ;;  %v6077_v21 = vadd.f32 %v2785_v28, %v2769_v38  ;;  %v6081_v53 = vmul.f32 %v5881_v15, %v6067_v57 }
 0x67f   :  { %7637 = vst [vmem:[#allocation48_spill] sm:$0xff] %v6061_v59  ;;  %7639 = vst [vmem:[#allocation99_spill] sm:$0xff] %v6069_v55  ;;  %3458 = vtanh.f32 %v2148_v44  ;;  %v2291_v10 = vrot.slane %v5803_v11, %v7642_v45  ;;  %v6087_v20 = vmul.f32 %v5923_v54, %v6067_v57  ;;  %v6091_v26 = vmul.f32 %v5931_v46, %v6067_v57 }
 0x680   :  { %7640 = vst [vmem:[#allocation101_spill] sm:$0xff] %v6071_v3  ;;  %7641 = vst [vmem:[#allocation102_spill] sm:$0xff] %v6077_v21  ;;  %3460 = vtanh.f32 %v2149_v12  ;;  %v6095_v49 = vmul.f32 %v5935_v7, %v6067_v57  ;;  %v6099_v38 = vmul.f32 %v5945_v39, %v6067_v57  ;;  %v6103_v15 = vmul.f32 %v6065_v31, %v6067_v57 }
 0x681   :  { %v2295_v54 = vrot.slane %v5808_v5, %v7642_v45  ;;  %v2299_v44 = vrot.slane %v5819_v36, %v7642_v45  ;;  %7645 = vst [vmem:[#allocation60_spill] sm:$0xff] %v6109_v60  ;;  %v2208_v46 = vmul.f32 %v5834_v25, %v5789_v14  ;;  %v2209_v7 = vmul.f32 %v5838_v0, %v5789_v14  ;;  %v6180_v27 = vpop.permute.xlu0 %2449 }
 0x682   :  { %7643 = vst [vmem:[#allocation103_spill] sm:$0xff] %v6099_v38  ;;  %7644 = vst [vmem:[#allocation40_spill] sm:$0xff] %v6103_v15  ;;  %v2210_v12 = vmul.f32 %v5848_v41, %v5789_v14  ;;  %v2303_v56 = vrot.slane %v5830_v9, %v7642_v45  ;;  %v6121_v43 = vrot.slane %v5844_v33, %v7642_v45  ;;  %v6158_v38 = vpop.permute.xlu1 %2505 }
 0x683   :  { %v6125_v39 = vrot.slane %v5858_v58, %v7642_v45  ;;  %v6129_v25 = vrot.slane %v5973_v47, %v7642_v45  ;;  %v2320_v0 = vmul.f32 %v2291_v10, %v6109_v60  ;;  %v2347_v41 = vrot.slane %v5803_v11, %v7646_v32  ;;  %7647 = vst [vmem:[#allocation118_spill] sm:$0xff] %v6158_v38 }
 0x684   :  { %v2351_v42 = vrot.slane %v5808_v5, %v7646_v32  ;;  %v6138_v13 = vrot.slane %v5819_v36, %v7646_v32  ;;  %v6142_v37 = vrot.slane %v5830_v9, %v7646_v32  ;;  %v2321_v35 = vmul.f32 %v2295_v54, %v6109_v60  ;;  %v6151_v28 = vpop.eup %3446  ;;  %7650 = vst [vmem:[#allocation27_spill] sm:$0xff] %v6180_v27 }
 0x685   :  { %v2322_v17 = vmul.f32 %v2299_v44, %v6109_v60  ;;  %v2328_v8 = vmul.f32 %v2291_v10, %v5781_v40  ;;  %v6149_v11 = vrot.slane %v5844_v33, %v7646_v32  ;;  %v2323_v5 = vmul.f32 %v2303_v56, %v6109_v60 }
 0x686   :  { %v2376_v36 = vmul.f32 %v2347_v41, %v5793_v24  ;;  %v2377_v15 = vmul.f32 %v2351_v42, %v5793_v24  ;;  %v2378_v9 = vmul.f32 %v6138_v13, %v5793_v24  ;;  %v6160_v57 = vpop.eup %3448  ;;  %v2324_v10 = vmul.f32 %v6121_v43, %v6109_v60 }
 0x687   :  { %v6166_v14 = vmul.f32 %v6125_v39, %v6109_v60  ;;  %v6170_v21 = vmul.f32 %v6129_v25, %v6109_v60  ;;  %v2329_v3 = vmul.f32 %v2295_v54, %v5781_v40  ;;  %v2379_v19 = vmul.f32 %v6142_v37, %v5793_v24 }
 0x688   :  { %v6173_v55 = vpop.eup %3450  ;;  %v2728_v59 = vadd.f32 %v5900_v22, %v2208_v46  ;;  %v2729_v16 = vadd.f32 %v5903_v2, %v2209_v7  ;;  %v2730_v62 = vadd.f32 %v5906_v30, %v2210_v12  ;;  %v2384_v54 = vmul.f32 %v2347_v41, %v5783_v34 }
 0x689   :  { %7648 = vst [vmem:[#allocation119_spill] sm:$0xff] %v6166_v14  ;;  %7649 = vst [vmem:[#allocation120_spill] sm:$0xff] %v6170_v21  ;;  %v6182_v14 = vpop.eup %3452  ;;  %v2380_v21 = vmul.f32 %v6149_v11, %v5793_v24  ;;  %v2385_v60 = vmul.f32 %v2351_v42, %v5783_v34  ;;  %v6190_v1 = vrot.slane %v5844_v33, %v7608_v51 }
 0x68a   :  { %v6192_v22 = vpop.eup %3454  ;;  %v2744_v2 = vadd.f32 %v2376_v36, %v2320_v0  ;;  %v2745_v46 = vadd.f32 %v2377_v15, %v2321_v35  ;;  %v2746_v30 = vadd.f32 %v2378_v9, %v2322_v17  ;;  %v6196_v7 = vrot.slane %v5858_v58, %v7608_v51  ;;  %v6222_v9 = vpop.permute.xlu1 %2561 }
 0x68b   :  { %v6198_v12 = vpop.eup %3456  ;;  %v6201_v24 = vmul.f32 %v2299_v44, %v5781_v40  ;;  %v6205_v41 = vrot.slane %v5973_v47, %v7608_v51  ;;  %v2488_v42 = vmul.f32 %v5869_v61, %v6180_v27  ;;  %v2489_v15 = vmul.f32 %v5885_v48, %v6180_v27  ;;  %7656 = vst [vmem:[#allocation61_spill] sm:$0xff] %v6222_v9 }
 0x68c   :  { %7651 = vst [vmem:[#allocation35_spill] sm:$0xff] %v6198_v12  ;;  %v6211_v0 = vpop.eup %3458  ;;  %v6214_v35 = vmul.f32 %v2303_v56, %v5781_v40  ;;  %v6216_v17 = vadd.f32 %v2379_v19, %v2323_v5  ;;  %v2490_v44 = vmul.f32 %v5949_v63, %v6180_v27  ;;  %v2491_v36 = vmul.f32 %v5957_v52, %v6180_v27 }
 0x68d   :  { %7652 = vst [vmem:[#allocation62_spill] sm:$0xff] %v6201_v24  ;;  %7653 = vst [vmem:[#allocation75_spill] sm:$0xff] %v6211_v0  ;;  %v6224_v24 = vpop.eup %3460  ;;  %v6226_v61 = vadd.f32 %v2380_v21, %v2324_v10  ;;  %v6228_v48 = vadd.f32 %v2384_v54, %v2328_v8  ;;  %v6230_v0 = vadd.f32 %v2385_v60, %v2329_v3 }
 0x68e   :  { %7654 = vst [vmem:[#allocation108_spill] sm:$0xff] %v6214_v35  ;;  %7655 = vst [vmem:[#allocation63_spill] sm:$0xff] %v6216_v17  ;;  %v2492_v19 = vmul.f32 %v6190_v1, %v6180_v27  ;;  %v6234_v56 = vadd.f32 %v2744_v2, %v2728_v59  ;;  %v6236_v5 = vadd.f32 %v2745_v46, %v2729_v16  ;;  %v6271_v2 = vpop.permute.xlu0 %2621  ;;  %v7670_v46 = vld [vmem:[#allocation44_spill] sm:$0xff]  ;;  %v7675_v17 = vld [vmem:[#allocation34_spill] sm:$0xff] }
 0x68f   :  { %7657 = vst [vmem:[#allocation100_spill] sm:$0xff] %v6224_v24  ;;  %7658 = vst [vmem:[#allocation107_spill] sm:$0xff] %v6226_v61  ;;  %v6238_v63 = vadd.f32 %v2746_v30, %v2730_v62  ;;  %v6242_v52 = vmul.f32 %v6196_v7, %v6180_v27  ;;  %v6246_v21 = vmul.f32 %v6205_v41, %v6180_v27  ;;  %v6285_v61 = vpop.permute.xlu1 %2677 }
 0x690   :  { %7659 = vst [vmem:[#allocation98_spill] sm:$0xff] %v6228_v48  ;;  %7660 = vst [vmem:[#allocation28_spill] sm:$0xff] %v6230_v0  ;;  %v2760_v3 = vadd.f32 %v2488_v42, %v6075_v4  ;;  %v2761_v60 = vadd.f32 %v2489_v15, %v6081_v53  ;;  %v6252_v59 = vrot.slane %v5844_v33, %v7620_v50  ;;  %v7668_v53 = vld [vmem:[#allocation73_spill] sm:$0xff]  ;;  %v7671_v42 = vld [vmem:[#allocation22_spill] sm:$0xff] }
 0x691   :  { %7661 = vst [vmem:[#allocation80_spill] sm:$0xff] %v6236_v5  ;;  %7662 = vst [vmem:[#allocation29_spill] sm:$0xff] %v6238_v63  ;;  %v2762_v16 = vadd.f32 %v2490_v44, %v6087_v20  ;;  %v6256_v62 = vadd.f32 %v2491_v36, %v6091_v26  ;;  %v6260_v8 = vrot.slane %v5858_v58, %v7620_v50  ;;  %v7669_v20 = vld [vmem:[#allocation12_spill] sm:$0xff]  ;;  %v7674_v63 = vld [vmem:[#allocation26_spill] sm:$0xff] }
 0x692   :  { %7663 = vst [vmem:[#allocation42_spill] sm:$0xff] %v6242_v52  ;;  %7664 = vst [vmem:[#allocation24_spill] sm:$0xff] %v6246_v21  ;;  %v6264_v10 = vrot.slane %v5973_v47, %v7620_v50  ;;  %v6267_v4 = vadd.f32 %v2492_v19, %v6095_v49  ;;  %v2544_v54 = vmul.f32 %v7668_v53, %v6158_v38  ;;  %v7672_v49 = vld [vmem:[#allocation45_spill] sm:$0xff]  ;;  %v7679_v21 = vld [vmem:[#allocation19_spill] sm:$0xff]  ;;  %v6322_v12 = vpop.permute.xlu0 %2673 }
 0x693   :  { %7665 = vst [vmem:[#allocation54_spill] sm:$0xff] %v6256_v62  ;;  %v2627_v26 = vrot.slane %v6151_v28, %v7669_v20  ;;  %v2600_v30 = vmul.f32 %v7670_v46, %v6222_v9  ;;  %v2545_v15 = vmul.f32 %v7671_v42, %v6158_v38  ;;  %v2631_v44 = vrot.slane %v6160_v57, %v7669_v20  ;;  %v7673_v19 = vld [vmem:[#allocation117_spill] sm:$0xff] }
 0x694   :  { %7666 = vst [vmem:[#allocation46_spill] sm:$0xff] %v6264_v10  ;;  %7667 = vst [vmem:[#allocation87_spill] sm:$0xff] %v6267_v4  ;;  %v2601_v36 = vmul.f32 %v7672_v49, %v6222_v9  ;;  %v2602_v53 = vmul.f32 %v7673_v19, %v6222_v9  ;;  %v2546_v4 = vmul.f32 %v7674_v63, %v6158_v38  ;;  %v7680_v48 = vld [vmem:[#allocation13_spill] sm:$0xff] }
 0x695   :  { %v2547_v46 = vmul.f32 %v7675_v17, %v6158_v38  ;;  %v2548_v42 = vmul.f32 %v6252_v59, %v6158_v38  ;;  %v2635_v62 = vrot.slane %v6173_v55, %v7669_v20  ;;  %v6297_v49 = vmul.f32 %v6260_v8, %v6158_v38  ;;  %7681 = vst [vmem:[#allocation58_spill] sm:$0xff] %v6322_v12 }
 0x696   :  { %v6301_v19 = vmul.f32 %v6264_v10, %v6158_v38  ;;  %v6305_v63 = vrot.slane %v6182_v14, %v7669_v20  ;;  %v6309_v17 = vrot.slane %v5973_v47, %v7679_v21  ;;  %v2664_v52 = vmul.f32 %v2627_v26, %v6271_v2 }
 0x697   :  { %7676 = vst [vmem:[#allocation55_spill] sm:$0xff] %v6297_v49  ;;  %v2603_v27 = vmul.f32 %v6026_v6, %v6222_v9  ;;  %v2604_v49 = vmul.f32 %v6031_v29, %v6222_v9  ;;  %v2776_v5 = vadd.f32 %v2600_v30, %v2544_v54  ;;  %v2665_v38 = vmul.f32 %v2631_v44, %v6271_v2 }
 0x698   :  { %7677 = vst [vmem:[#allocation57_spill] sm:$0xff] %v6301_v19  ;;  %7678 = vst [vmem:[#allocation31_spill] sm:$0xff] %v6305_v63  ;;  %v2777_v19 = vadd.f32 %v2601_v36, %v2545_v15  ;;  %v2778_v0 = vadd.f32 %v2602_v53, %v2546_v4  ;;  %v2683_v35 = vrot.slane %v6151_v28, %v7680_v48 }
 0x699   :  { %v6320_v24 = vmul.f32 %v2635_v62, %v6271_v2  ;;  %v2687_v10 = vrot.slane %v6160_v57, %v7680_v48  ;;  %v2691_v6 = vrot.slane %v6173_v55, %v7680_v48  ;;  %v2695_v29 = vrot.slane %v6182_v14, %v7680_v48  ;;  %v6346_v55 = vpop.permute.xlu1 %2617 }
 0x69a   :  { %v6332_v4 = vmul.f32 %v6305_v63, %v6271_v2  ;;  %v6336_v28 = vmul.f32 %v6040_v23, %v6222_v9  ;;  %v6340_v54 = vmul.f32 %v6309_v17, %v6222_v9  ;;  %v6344_v57 = vrot.slane %v6192_v22, %v7680_v48  ;;  %7684 = vst [vmem:[#allocation94_spill] sm:$0xff] %v6346_v55 }
 0x69b   :  { %v6348_v30 = vadd.f32 %v2603_v27, %v2547_v46  ;;  %v6350_v14 = vadd.f32 %v2604_v49, %v2548_v42  ;;  %v2824_v15 = vadd.f32 %v2776_v5, %v2760_v3  ;;  %v2720_v36 = vmul.f32 %v2683_v35, %v6285_v61 }
 0x69c   :  { %7682 = vst [vmem:[#allocation93_spill] sm:$0xff] %v6336_v28  ;;  %7683 = vst [vmem:[#allocation88_spill] sm:$0xff] %v6340_v54  ;;  %v6353_v53 = vadd.f32 %v2777_v19, %v2761_v60  ;;  %v6355_v23 = vadd.f32 %v2778_v0, %v2762_v16  ;;  %v2712_v28 = vmul.f32 %v2683_v35, %v6322_v12 }
 0x69d   :  { %7685 = vst [vmem:[#allocation32_spill] sm:$0xff] %v6348_v30  ;;  %7686 = vst [vmem:[#allocation105_spill] sm:$0xff] %v6350_v14  ;;  %v2721_v54 = vmul.f32 %v2687_v10, %v6285_v61  ;;  %v2713_v9 = vmul.f32 %v2687_v10, %v6322_v12  ;;  %v6361_v63 = vmul.f32 %v2691_v6, %v6322_v12 }
 0x69e   :  { %7687 = vst [vmem:[#allocation33_spill] sm:$0xff] %v6355_v23  ;;  %v6364_v27 = vmul.f32 %v2695_v29, %v6322_v12  ;;  %v2656_v5 = vmul.f32 %v2627_v26, %v6346_v55  ;;  %v6369_v3 = vmul.f32 %v6344_v57, %v6322_v12  ;;  %v6372_v0 = vmul.f32 %v2691_v6, %v6285_v61  ;;  %v7712_v12 = vld [vmem:[#allocation66_spill] sm:$0xff] }
 0x69f   :  { %7688 = vst [vmem:[#allocation106_spill] sm:$0xff] %v6361_v63  ;;  %v2657_v35 = vmul.f32 %v2631_v44, %v6346_v55  ;;  %v6377_v60 = vrot.slane %v5844_v33, %v7669_v20  ;;  %v6380_v16 = vmul.f32 %v2695_v29, %v6285_v61  ;;  %v6382_v10 = vadd.f32 %v2720_v36, %v2664_v52  ;;  %v7695_v33 = vld [vmem:[#allocation111_spill] sm:$0xff] }
 0x6a0   :  { %7689 = vst [vmem:[#allocation97_spill] sm:$0xff] %v6364_v27  ;;  %7690 = vst [vmem:[#allocation39_spill] sm:$0xff] %v6369_v3  ;;  %v6386_v26 = vrot.slane %v5858_v58, %v7669_v20  ;;  %v6390_v46 = vrot.slane %v5973_v47, %v7669_v20  ;;  %v6392_v42 = vadd.f32 %v2721_v54, %v2665_v38  ;;  %v7703_v54 = vld [vmem:[#allocation38_spill] sm:$0xff] }
 0x6a1   :  { %7691 = vst [vmem:[#allocation78_spill] sm:$0xff] %v6377_v60  ;;  %v6396_v44 = vrot.slane %v6192_v22, %v7669_v20  ;;  %v6400_v49 = vrot.slane %v7695_v33, %v7669_v20  ;;  %v6404_v52 = vrot.slane %v5973_v47, %v7680_v48  ;;  %v6407_v19 = vmul.f32 %v2635_v62, %v6346_v55 }
 0x6a2   :  { %7692 = vst [vmem:[#allocation79_spill] sm:$0xff] %v6386_v26  ;;  %7693 = vst [vmem:[#allocation84_spill] sm:$0xff] %v6390_v46  ;;  %v6409_v6 = vadd.f32 %v2712_v28, %v2656_v5  ;;  %v6412_v38 = vadd.f32 %v2824_v15, %v6234_v56  ;;  %v6416_v22 = vrot.slane %v7695_v33, %v7680_v48  ;;  %v7705_v15 = vld [vmem:[#allocation53_spill] sm:$0xff] }
 0x6a3   :  { %7694 = vst [vmem:[#allocation89_spill] sm:$0xff] %v6396_v44  ;;  %7696 = vst [vmem:[#allocation95_spill] sm:$0xff] %v6400_v49  ;;  %v6418_v29 = vadd.f32 %v2713_v9, %v2657_v35  ;;  %v2220_v36 = vmul.f32 %v6377_v60, %v7703_v54  ;;  %v2221_v23 = vmul.f32 %v6386_v26, %v7703_v54  ;;  %v7729_v60 = vld [vmem:[#allocation62_spill] sm:$0xff] }
 0x6a4   :  { %7697 = vst [vmem:[#allocation113_spill] sm:$0xff] %v6404_v52  ;;  %7698 = vst [vmem:[#allocation85_spill] sm:$0xff] %v6407_v19  ;;  %v6426_v62 = vrot.slane %v7695_v33, %v7642_v45  ;;  %v2222_v56 = vmul.f32 %v6390_v46, %v7703_v54  ;;  %v2223_v28 = vmul.f32 %v6400_v49, %v7703_v54  ;;  %v7728_v49 = vld [vmem:[#allocation68_spill] sm:$0xff] }
 0x6a5   :  { %7699 = vst [vmem:[#allocation90_spill] sm:$0xff] %v6409_v6  ;;  %7700 = vst [vmem:[#allocation82_spill] sm:$0xff] %v6412_v38  ;;  %v2278_v9 = vmul.f32 %v6404_v52, %v7705_v15  ;;  %v2279_v5 = vmul.f32 %v6416_v22, %v7705_v15  ;;  %v2332_v35 = vmul.f32 %v6121_v43, %v5781_v40 }
 0x6a6   :  { %7701 = vst [vmem:[#allocation96_spill] sm:$0xff] %v6416_v22  ;;  %7702 = vst [vmem:[#allocation114_spill] sm:$0xff] %v6418_v29  ;;  %v2333_v14 = vmul.f32 %v6125_v39, %v5781_v40  ;;  %v6442_v45 = vrot.slane %v5858_v58, %v7646_v32  ;;  %v6446_v30 = vrot.slane %v5973_v47, %v7646_v32  ;;  %v7731_v29 = vld [vmem:[#allocation74_spill] sm:$0xff] }
 0x6a7   :  { %7704 = vst [vmem:[#allocation83_spill] sm:$0xff] %v6426_v62  ;;  %v2334_v54 = vmul.f32 %v6129_v25, %v5781_v40  ;;  %v2335_v15 = vmul.f32 %v6426_v62, %v5781_v40  ;;  %v6454_v43 = vrot.slane %v7695_v33, %v7646_v32  ;;  %v2386_v39 = vmul.f32 %v6138_v13, %v5783_v34  ;;  %v7710_v13 = vld [vmem:[#allocation65_spill] sm:$0xff] }
 0x6a8   :  { %7706 = vst [vmem:[#allocation91_spill] sm:$0xff] %v6442_v45  ;;  %7707 = vst [vmem:[#allocation41_spill] sm:$0xff] %v6446_v30  ;;  %v2387_v58 = vmul.f32 %v6142_v37, %v5783_v34  ;;  %v2388_v47 = vmul.f32 %v6149_v11, %v5783_v34  ;;  %v2389_v3 = vmul.f32 %v6442_v45, %v5783_v34 }
 0x6a9   :  { %7708 = vst [vmem:[#allocation92_spill] sm:$0xff] %v6454_v43  ;;  %v6466_v25 = vrot.slane %v7695_v33, %v7607_v18  ;;  %v2390_v40 = vmul.f32 %v6446_v30, %v5783_v34  ;;  %v2391_v32 = vmul.f32 %v6454_v43, %v5783_v34  ;;  %v2446_v27 = vmul.f32 %v6065_v31, %v7710_v13  ;;  %v7714_v31 = vld [vmem:[#allocation67_spill] sm:$0xff] }
 0x6aa   :  { %v6476_v37 = vrot.slane %v7695_v33, %v7608_v51  ;;  %v2500_v18 = vmul.f32 %v6190_v1, %v7712_v12  ;;  %v2501_v45 = vmul.f32 %v6196_v7, %v7712_v12  ;;  %v6486_v30 = vrot.slane %v7695_v33, %v7620_v50  ;;  %v7716_v7 = vld [vmem:[#allocation46_spill] sm:$0xff] }
 0x6ab   :  { %7709 = vst [vmem:[#allocation36_spill] sm:$0xff] %v6466_v25  ;;  %v2447_v11 = vmul.f32 %v6466_v25, %v7710_v13  ;;  %v2502_v34 = vmul.f32 %v6205_v41, %v7712_v12  ;;  %v2556_v43 = vmul.f32 %v6252_v59, %v7714_v31  ;;  %v6496_v13 = vrot.slane %v7695_v33, %v7679_v21  ;;  %v7717_v25 = vld [vmem:[#allocation35_spill] sm:$0xff]  ;;  %v7722_v33 = vld [vmem:[#allocation100_spill] sm:$0xff] }
 0x6ac   :  { %7711 = vst [vmem:[#allocation86_spill] sm:$0xff] %v6476_v37  ;;  %7713 = vst [vmem:[#allocation37_spill] sm:$0xff] %v6486_v30  ;;  %v2503_v51 = vmul.f32 %v6476_v37, %v7712_v12  ;;  %v2557_v1 = vmul.f32 %v6260_v8, %v7714_v31  ;;  %v2558_v50 = vmul.f32 %v7716_v7, %v7714_v31  ;;  %v7719_v41 = vld [vmem:[#allocation75_spill] sm:$0xff]  ;;  %v7721_v37 = vld [vmem:[#allocation112_spill] sm:$0xff] }
 0x6ad   :  { %7715 = vst [vmem:[#allocation25_spill] sm:$0xff] %v6496_v13  ;;  %v6504_v62 = vrot.slane %v7717_v25, %v7669_v20  ;;  %v6508_v12 = vrot.slane %v7719_v41, %v7669_v20  ;;  %v2559_v59 = vmul.f32 %v6486_v30, %v7714_v31  ;;  %v2614_v21 = vmul.f32 %v6309_v17, %v7721_v37 }
 0x6ae   :  { %v2615_v8 = vmul.f32 %v6496_v13, %v7721_v37  ;;  %v6518_v7 = vrot.slane %v7722_v33, %v7669_v20  ;;  %v2668_v22 = vmul.f32 %v6396_v44, %v6271_v2  ;;  %v6524_v52 = vrot.slane %v7717_v25, %v7680_v48 }
 0x6af   :  { %7718 = vst [vmem:[#allocation43_spill] sm:$0xff] %v6504_v62  ;;  %7720 = vst [vmem:[#allocation52_spill] sm:$0xff] %v6508_v12  ;;  %v6528_v31 = vrot.slane %v7719_v41, %v7680_v48  ;;  %v6532_v17 = vrot.slane %v7722_v33, %v7680_v48  ;;  %v2669_v37 = vmul.f32 %v6504_v62, %v6271_v2  ;;  %v7727_v33 = vld [vmem:[#allocation64_spill] sm:$0xff] }
 0x6b0   :  { %7723 = vst [vmem:[#allocation56_spill] sm:$0xff] %v6518_v7  ;;  %7724 = vst [vmem:[#allocation70_spill] sm:$0xff] %v6524_v52  ;;  %v2670_v20 = vmul.f32 %v6508_v12, %v6271_v2  ;;  %v2671_v13 = vmul.f32 %v6518_v7, %v6271_v2  ;;  %v2724_v25 = vmul.f32 %v6344_v57, %v6285_v61  ;;  %v7730_v7 = vld [vmem:[#allocation108_spill] sm:$0xff] }
 0x6b1   :  { %7725 = vst [vmem:[#allocation23_spill] sm:$0xff] %v6528_v31  ;;  %7726 = vst [vmem:[#allocation109_spill] sm:$0xff] %v6532_v17  ;;  %v2725_v41 = vmul.f32 %v6524_v52, %v6285_v61  ;;  %v2726_v30 = vmul.f32 %v6528_v31, %v6285_v61  ;;  %v2727_v48 = vmul.f32 %v6532_v17, %v6285_v61  ;;  %v7732_v31 = vld [vmem:[#allocation21_spill] sm:$0xff]  ;;  %v7733_v17 = vld [vmem:[#allocation50_spill] sm:$0xff] }
 0x6b2   :  { %v2740_v62 = vadd.f32 %v7727_v33, %v2220_v36  ;;  %v2741_v46 = vadd.f32 %v7728_v49, %v2221_v23  ;;  %v2742_v12 = vadd.f32 %v2278_v9, %v2222_v56  ;;  %v2743_v26 = vadd.f32 %v2279_v5, %v2223_v28  ;;  %v7734_v33 = vld [vmem:[#allocation116_spill] sm:$0xff]  ;;  %v7735_v9 = vld [vmem:[#allocation71_spill] sm:$0xff] }
 0x6b3   :  { %v2754_v2 = vadd.f32 %v2386_v39, %v7729_v60  ;;  %v2755_v63 = vadd.f32 %v2387_v58, %v7730_v7  ;;  %v2756_v57 = vadd.f32 %v2388_v47, %v2332_v35  ;;  %v2757_v19 = vadd.f32 %v2389_v3, %v2333_v14  ;;  %v7737_v35 = vld [vmem:[#allocation81_spill] sm:$0xff] }
 0x6b4   :  { %v2758_v44 = vadd.f32 %v2390_v40, %v2334_v54  ;;  %v2759_v52 = vadd.f32 %v2391_v32, %v2335_v15  ;;  %v2772_v38 = vadd.f32 %v2500_v18, %v7731_v29  ;;  %v2773_v6 = vadd.f32 %v2501_v45, %v7732_v31  ;;  %v7736_v29 = vld [vmem:[#allocation98_spill] sm:$0xff]  ;;  %v7739_v54 = vld [vmem:[#allocation69_spill] sm:$0xff] }
 0x6b5   :  { %v2774_v55 = vadd.f32 %v2502_v34, %v2446_v27  ;;  %v2775_v61 = vadd.f32 %v2503_v51, %v2447_v11  ;;  %v2788_v36 = vadd.f32 %v7733_v17, %v2556_v43  ;;  %v2789_v23 = vadd.f32 %v7734_v33, %v2557_v1  ;;  %v7738_v27 = vld [vmem:[#allocation28_spill] sm:$0xff]  ;;  %v7745_v1 = vld [vmem:[#allocation101_spill] sm:$0xff] }
 0x6b6   :  { %v2790_v49 = vadd.f32 %v2614_v21, %v2558_v50  ;;  %v2791_v56 = vadd.f32 %v2615_v8, %v2559_v59  ;;  %v2802_v60 = vadd.f32 %v6372_v0, %v6320_v24  ;;  %v2803_v14 = vadd.f32 %v6380_v16, %v6332_v4  ;;  %v7740_v43 = vld [vmem:[#allocation72_spill] sm:$0xff]  ;;  %v7741_v24 = vld [vmem:[#allocation49_spill] sm:$0xff]  ;;  %v7743_v4 = vld [vmem:[#allocation115_spill] sm:$0xff]  ;;  %v2878_v59 = vpop.permute.xlu1 %2877 }
 0x6b7   :  { %v2804_v3 = vadd.f32 %v2724_v25, %v2668_v22  ;;  %v2807_v28 = vadd.f32 %v2727_v48, %v2671_v13  ;;  %v2816_v5 = vadd.f32 %v7736_v29, %v7735_v9  ;;  %v2817_v45 = vadd.f32 %v7738_v27, %v7737_v35  ;;  %v7742_v0 = vld [vmem:[#allocation48_spill] sm:$0xff]  ;;  %v7744_v16 = vld [vmem:[#allocation99_spill] sm:$0xff]  ;;  %v7752_v9 = vld [vmem:[#allocation114_spill] sm:$0xff] }
 0x6b8   :  { %v2818_v15 = vadd.f32 %v2754_v2, %v7739_v54  ;;  %v2819_v39 = vadd.f32 %v2755_v63, %v7740_v43  ;;  %v2820_v58 = vadd.f32 %v2756_v57, %v2740_v62  ;;  %v2821_v47 = vadd.f32 %v2757_v19, %v2741_v46  ;;  %v7746_v63 = vld [vmem:[#allocation102_spill] sm:$0xff]  ;;  %v7747_v48 = vld [vmem:[#allocation80_spill] sm:$0xff]  ;;  %v7753_v35 = vld [vmem:[#allocation89_spill] sm:$0xff] }
 0x6b9   :  { %v2822_v40 = vadd.f32 %v2758_v44, %v2742_v12  ;;  %v2823_v32 = vadd.f32 %v2759_v52, %v2743_v26  ;;  %v2834_v11 = vadd.f32 %v7742_v0, %v7741_v24  ;;  %v2835_v22 = vadd.f32 %v7744_v16, %v7743_v4  ;;  %v7755_v54 = vld [vmem:[#allocation106_spill] sm:$0xff]  ;;  %v7756_v43 = vld [vmem:[#allocation20_spill] sm:$0xff] }
 0x6ba   :  { %v2836_v18 = vadd.f32 %v2788_v36, %v2772_v38  ;;  %v2837_v34 = vadd.f32 %v2789_v23, %v2773_v6  ;;  %v2838_v51 = vadd.f32 %v2790_v49, %v2774_v55  ;;  %v2839_v13 = vadd.f32 %v2791_v56, %v2775_v61  ;;  %v6588_v61 = vpop.permute.xlu1 %2873  ;;  %v7748_v56 = vld [vmem:[#allocation94_spill] sm:$0xff]  ;;  %v7757_v16 = vld [vmem:[#allocation104_spill] sm:$0xff] }
 0x6bb   :  { %v2848_v50 = vadd.f32 %v7745_v1, %v2816_v5  ;;  %v2805_v21 = vadd.f32 %v2725_v41, %v2669_v37  ;;  %v2806_v8 = vadd.f32 %v2726_v30, %v2670_v20  ;;  %v2849_v62 = vadd.f32 %v7746_v63, %v2817_v45  ;;  %v7754_v45 = vld [vmem:[#allocation85_spill] sm:$0xff]  ;;  %v7760_v1 = vld [vmem:[#allocation79_spill] sm:$0xff] }
 0x6bc   :  { %v2850_v46 = vadd.f32 %v2834_v11, %v2818_v15  ;;  %v2851_v44 = vadd.f32 %v2835_v22, %v2819_v39  ;;  %v2852_v26 = vadd.f32 %v2836_v18, %v2820_v58  ;;  %v2855_v52 = vadd.f32 %v2839_v13, %v2823_v32  ;;  %v7758_v22 = vld [vmem:[#allocation47_spill] sm:$0xff] }
 0x6bd   :  { %v2864_v19 = vadd.f32 %v2848_v50, %v6382_v10  ;;  %v2853_v12 = vadd.f32 %v2837_v34, %v2821_v47  ;;  %v2854_v7 = vadd.f32 %v2838_v51, %v2822_v40  ;;  %v2865_v38 = vadd.f32 %v2849_v62, %v6392_v42  ;;  %v7759_v51 = vld [vmem:[#allocation78_spill] sm:$0xff]  ;;  %v7762_v63 = vld [vmem:[#allocation95_spill] sm:$0xff] }
 0x6be   :  { %v2866_v6 = vadd.f32 %v2850_v46, %v2802_v60  ;;  %v2867_v55 = vadd.f32 %v2851_v44, %v2803_v14  ;;  %v2868_v31 = vadd.f32 %v2852_v26, %v2804_v3  ;;  %v2871_v17 = vadd.f32 %v2855_v52, %v2807_v28  ;;  %v7750_v14 = vld [vmem:[#allocation90_spill] sm:$0xff]  ;;  %v7763_v46 = vld [vmem:[#allocation51_spill] sm:$0xff]  ;;  %v7764_v44 = vld [vmem:[#allocation76_spill] sm:$0xff] }
 0x6bf   :  { %v6574_v25 = vadd.f32 %v2878_v59, %v2864_v19  ;;  %v2869_v37 = vadd.f32 %v2853_v12, %v2805_v21  ;;  %v2870_v30 = vadd.f32 %v2854_v7, %v2806_v8  ;;  %v6576_v20 = vadd.f32 %v2878_v59, %v2865_v38  ;;  %v7751_v3 = vld [vmem:[#allocation82_spill] sm:$0xff]  ;;  %v7765_v52 = vld [vmem:[#allocation113_spill] sm:$0xff]  ;;  %v7766_v7 = vld [vmem:[#allocation96_spill] sm:$0xff] }
 0x6c0   :  { %v6578_v41 = vadd.f32 %v2878_v59, %v2866_v6  ;;  %v2841_v2 = vadd.f32 %v6353_v53, %v7747_v48  ;;  %v6582_v10 = vadd.f32 %v2878_v59, %v2867_v55  ;;  %v6584_v57 = vadd.f32 %v2878_v59, %v2871_v17  ;;  %v7749_v53 = vld [vmem:[#allocation31_spill] sm:$0xff]  ;;  %v7767_v6 = vld [vmem:[#allocation60_spill] sm:$0xff]  ;;  %v7769_v17 = vld [vmem:[#allocation110_spill] sm:$0xff] }
 0x6c1   :  { %v2921_v42 = vsel %vm196_vm1, %v6574_v25, 0.0  ;;  %v6590_v36 = vadd.f32 %v2878_v59, %v2868_v31  ;;  %v6592_v33 = vadd.f32 %v2878_v59, %v2869_v37  ;;  %v6594_v23 = vadd.f32 %v2878_v59, %v2870_v30  ;;  %v7761_v59 = vld [vmem:[#allocation84_spill] sm:$0xff]  ;;  %v7768_v55 = vld [vmem:[#allocation83_spill] sm:$0xff]  ;;  %v7771_v48 = vld [vmem:[#allocation41_spill] sm:$0xff] }
 0x6c2   :  { %v2922_v49 = vsel %vm196_vm1, %v6576_v20, 0.0  ;;  %v2659_v60 = vmul.f32 %v7749_v53, %v7748_v56  ;;  %v2856_v28 = vadd.f32 %v7751_v3, %v7750_v14  ;;  %v2857_v29 = vadd.f32 %v2841_v2, %v7752_v9  ;;  %v7770_v37 = vld [vmem:[#allocation91_spill] sm:$0xff]  ;;  %v7773_v53 = vld [vmem:[#allocation30_spill] sm:$0xff]  ;;  %v7774_v14 = vld [vmem:[#allocation36_spill] sm:$0xff] }
 0x6c3   :  { %v2923_v5 = vadd.f32 %v2922_v49, %v2921_v42  ;;  %v2660_v27 = vmul.f32 %v7753_v35, %v7748_v56  ;;  %v6607_v15 = vadd.f32 %v7755_v54, %v7754_v45  ;;  %v6611_v39 = vmul.f32 %v7756_v43, %v6584_v57  ;;  %v7772_v42 = vld [vmem:[#allocation92_spill] sm:$0xff]  ;;  %v7776_v9 = vld [vmem:[#allocation86_spill] sm:$0xff]  ;;  %v7778_v45 = vld [vmem:[#allocation37_spill] sm:$0xff] }
 0x6c4   :  { %v2924_v58 = vsel %vm196_vm1, %v6578_v41, 0.0  ;;  %v6616_v47 = vadd.f32 %v6588_v61, %v2856_v28  ;;  %v6619_v40 = vadd.f32 %v6588_v61, %v2857_v29  ;;  %v2926_v24 = vsel %vm196_vm1, %v6582_v10, 0.0  ;;  %v7775_v28 = vld [vmem:[#allocation27_spill] sm:$0xff]  ;;  %v7777_v35 = vld [vmem:[#allocation118_spill] sm:$0xff] }
 0x6c5   :  { %v2925_v32 = vadd.f32 %v2924_v58, %v2923_v5  ;;  %v2928_v0 = vsel %vm196_vm1, %v6590_v36, 0.0  ;;  %v2930_v11 = vsel %vm196_vm1, %v6592_v33, 0.0  ;;  %v2932_v4 = vsel %vm196_vm1, %v6594_v23, 0.0  ;;  %v7779_v58 = vld [vmem:[#allocation61_spill] sm:$0xff] }
 0x6c6   :  { %v2211_v18 = vmul.f32 %v7758_v22, %v7757_v16  ;;  %v2212_v13 = vmul.f32 %v7759_v51, %v7757_v16  ;;  %v2213_v50 = vmul.f32 %v7760_v1, %v7757_v16  ;;  %v2214_v21 = vmul.f32 %v7761_v59, %v7757_v16  ;;  %v7782_v22 = vld [vmem:[#allocation52_spill] sm:$0xff]  ;;  %v7784_v59 = vld [vmem:[#allocation58_spill] sm:$0xff] }
 0x6c7   :  { %v2927_v34 = vadd.f32 %v2926_v24, %v2925_v32  ;;  %v2934_v8 = vsel %vm196_vm1, %v6611_v39, 0.0  ;;  %v2215_v62 = vmul.f32 %v7762_v63, %v7757_v16  ;;  %v2269_v26 = vmul.f32 %v7764_v44, %v7763_v46  ;;  %v7780_v32 = vld [vmem:[#allocation25_spill] sm:$0xff]  ;;  %v7783_v51 = vld [vmem:[#allocation56_spill] sm:$0xff]  ;;  %v7785_v63 = vld [vmem:[#allocation70_spill] sm:$0xff] }
 0x6c8   :  { %v2270_v19 = vmul.f32 %v7765_v52, %v7763_v46  ;;  %v2271_v38 = vmul.f32 %v7766_v7, %v7763_v46  ;;  %v2327_v31 = vmul.f32 %v7768_v55, %v7767_v6  ;;  %v2381_v30 = vmul.f32 %v7770_v37, %v7769_v17  ;;  %v7788_v6 = vld [vmem:[#allocation77_spill] sm:$0xff] }
 0x6c9   :  { %v2929_v12 = vadd.f32 %v2928_v0, %v2927_v34  ;;  %v2382_v2 = vmul.f32 %v7771_v48, %v7769_v17  ;;  %v2383_v49 = vmul.f32 %v7772_v42, %v7769_v17  ;;  %v2439_v3 = vmul.f32 %v7774_v14, %v7773_v53  ;;  %v7781_v0 = vld [vmem:[#allocation43_spill] sm:$0xff] }
 0x6ca   :  { %v2495_v29 = vmul.f32 %v7776_v9, %v7775_v28  ;;  %v2551_v54 = vmul.f32 %v7778_v45, %v7777_v35  ;;  %v2607_v24 = vmul.f32 %v7780_v32, %v7779_v58  ;;  %v2661_v16 = vmul.f32 %v7781_v0, %v7748_v56  ;;  %v7789_v17 = vld [vmem:[#allocation59_spill] sm:$0xff]  ;;  %v7791_v9 = vld [vmem:[#allocation120_spill] sm:$0xff]  ;;  %v7793_v58 = vld [vmem:[#allocation93_spill] sm:$0xff] }
 0x6cb   :  { %v2931_v5 = vadd.f32 %v2930_v11, %v2929_v12  ;;  %v2662_v34 = vmul.f32 %v7782_v22, %v7748_v56  ;;  %v2663_v1 = vmul.f32 %v7783_v51, %v7748_v56  ;;  %v2717_v46 = vmul.f32 %v7785_v63, %v7784_v59  ;;  %v7786_v11 = vld [vmem:[#allocation23_spill] sm:$0xff]  ;;  %v7787_v12 = vld [vmem:[#allocation109_spill] sm:$0xff]  ;;  %v7798_v63 = vld [vmem:[#allocation40_spill] sm:$0xff] }
 0x6cc   :  { %v2718_v44 = vmul.f32 %v7786_v11, %v7784_v59  ;;  %v2719_v7 = vmul.f32 %v7787_v12, %v7784_v59  ;;  %v2731_v55 = vadd.f32 %v7788_v6, %v2211_v18  ;;  %v2732_v37 = vadd.f32 %v7789_v17, %v2212_v13  ;;  %v7790_v14 = vld [vmem:[#allocation119_spill] sm:$0xff]  ;;  %v7794_v0 = vld [vmem:[#allocation57_spill] sm:$0xff]  ;;  %v7797_v59 = vld [vmem:[#allocation42_spill] sm:$0xff] }
 0x6cd   :  { %v2933_v52 = vadd.f32 %v2932_v4, %v2931_v5  ;;  %v2733_v48 = vadd.f32 %v2269_v26, %v2213_v50  ;;  %v2734_v42 = vadd.f32 %v2270_v19, %v2214_v21  ;;  %v2735_v53 = vadd.f32 %v2271_v38, %v2215_v62  ;;  %v7792_v45 = vld [vmem:[#allocation55_spill] sm:$0xff]  ;;  %v7795_v4 = vld [vmem:[#allocation88_spill] sm:$0xff]  ;;  %v7800_v26 = vld [vmem:[#allocation97_spill] sm:$0xff] }
 0x6ce   :  { %v2749_v28 = vadd.f32 %v2381_v30, %v7790_v14  ;;  %v2750_v35 = vadd.f32 %v2382_v2, %v7791_v9  ;;  %v2781_v32 = vadd.f32 %v7793_v58, %v7792_v45  ;;  %v2782_v5 = vadd.f32 %v7795_v4, %v7794_v0  ;;  %v7796_v51 = vld [vmem:[#allocation103_spill] sm:$0xff]  ;;  %v7799_v13 = vld [vmem:[#allocation24_spill] sm:$0xff]  ;;  %v7802_v30 = vld [vmem:[#allocation54_spill] sm:$0xff] }
 0x6cf   :  { %v2935_v56 = vadd.f32 %v2934_v8, %v2933_v52  ;;  %v2751_v22 = vadd.f32 %v2383_v49, %v2327_v31  ;;  %v2765_v18 = vadd.f32 %v7797_v59, %v7796_v51  ;;  %v2766_v50 = vadd.f32 %v7799_v13, %v7798_v63  ;;  %v7801_v19 = vld [vmem:[#allocation39_spill] sm:$0xff]  ;;  %v7803_v2 = vld [vmem:[#allocation32_spill] sm:$0xff]  ;;  %v7806_v49 = vld [vmem:[#allocation105_spill] sm:$0xff] }
 0x6d0   :  { %v2783_v21 = vadd.f32 %v2607_v24, %v2551_v54  ;;  %v2767_v62 = vadd.f32 %v2495_v29, %v2439_v3  ;;  %v2795_v8 = vadd.f32 %v7800_v26, %v2659_v60  ;;  %v2796_v38 = vadd.f32 %v7801_v19, %v2660_v27  ;;  %v7804_v12 = vld [vmem:[#allocation63_spill] sm:$0xff]  ;;  %v7807_v14 = vld [vmem:[#allocation29_spill] sm:$0xff] }
 0x6d1   :  { %2936 = vadd.xlane.f32.xlu0 %v2935_v56  ;;  %v2827_v11 = vadd.f32 %v7803_v2, %v7802_v30  ;;  %v2797_v52 = vadd.f32 %v2717_v46, %v2661_v16  ;;  %v2811_v6 = vadd.f32 %v7804_v12, %v2731_v55  ;;  %v7805_v31 = vld [vmem:[#allocation87_spill] sm:$0xff]  ;;  %v7808_v9 = vld [vmem:[#allocation33_spill] sm:$0xff]  ;;  %v2799_v58 = vadd.f32 %v2719_v7, %v2663_v1 }
 0x6d2   :  { %v2828_v17 = vadd.f32 %v7806_v49, %v7805_v31  ;;  %v2842_v45 = vadd.f32 %v7808_v9, %v7807_v14  ;;  %v7809_v54 = vld [vmem:[#allocation107_spill] sm:$0xff]  ;;  %v2829_v3 = vadd.f32 %v2781_v32, %v2765_v18  ;;  %v2830_v29 = vadd.f32 %v2782_v5, %v2766_v50 }
 0x6d3   :  { %v2812_v24 = vadd.f32 %v7809_v54, %v2732_v37  ;;  %v2831_v60 = vadd.f32 %v2783_v21, %v2767_v62  ;;  %v2843_v56 = vadd.f32 %v2827_v11, %v2811_v6  ;;  %v2912_v16 = vadd.f32 %v6619_v40, %v6616_v47 }
 0x6d4   :  { %v2858_v27 = vadd.f32 %v2842_v45, %v6607_v15  ;;  %v2813_v46 = vadd.f32 %v2749_v28, %v2733_v48  ;;  %v2814_v55 = vadd.f32 %v2750_v35, %v2734_v42  ;;  %v2946_v0 = vmul.f32 %v6574_v25, %v6574_v25 }
 0x6d5   :  { %v2947_v4 = vmul.f32 %v6576_v20, %v6576_v20  ;;  %v2815_v1 = vadd.f32 %v2751_v22, %v2735_v53  ;;  %v2844_v7 = vadd.f32 %v2828_v17, %v2812_v24  ;;  %v2859_v37 = vadd.f32 %v2843_v56, %v2795_v8 }
 0x6d6   :  { %v6705_v32 = vadd.f32 %v6588_v61, %v2858_v27  ;;  %v2798_v5 = vadd.f32 %v2718_v44, %v2662_v34  ;;  %v2845_v51 = vadd.f32 %v2829_v3, %v2813_v46  ;;  %v2846_v15 = vadd.f32 %v2830_v29, %v2814_v55 }
 0x6d7   :  { %v2948_v59 = vmul.f32 %v6578_v41, %v6578_v41  ;;  %v2847_v48 = vadd.f32 %v2831_v60, %v2815_v1  ;;  %v2860_v42 = vadd.f32 %v2844_v7, %v2796_v38  ;;  %v6710_v28 = vadd.f32 %v6588_v61, %v2859_v37 }
 0x6d8   :  { %v2913_v35 = vadd.f32 %v2912_v16, %v6705_v32  ;;  %v2861_v18 = vadd.f32 %v2845_v51, %v2797_v52  ;;  %v2949_v53 = vmul.f32 %v6582_v10, %v6582_v10  ;;  %v2963_v22 = vsel %vm196_vm1, %v2946_v0, 0.0 }
 0x6d9   :  { %v2964_v34 = vsel %vm196_vm1, %v2947_v4, 0.0  ;;  %v2863_v44 = vadd.f32 %v2847_v48, %v2799_v58  ;;  %v6718_v63 = vadd.f32 %v6588_v61, %v2860_v42  ;;  %v2862_v21 = vadd.f32 %v2846_v15, %v2798_v5 }
 0x6da   :  { %v2914_v13 = vadd.f32 %v2913_v35, %v6710_v28  ;;  %v2965_v50 = vadd.f32 %v2964_v34, %v2963_v22  ;;  %v6722_v62 = vadd.f32 %v6588_v61, %v2861_v18  ;;  %v2950_v26 = vmul.f32 %v6590_v36, %v6590_v36 }
 0x6db   :  { %v2966_v8 = vsel %vm196_vm1, %v2948_v59, 0.0  ;;  %v6728_v19 = vadd.f32 %v6588_v61, %v2863_v44  ;;  %v2938_v2 = vmul.f32 %v6616_v47, %v6616_v47  ;;  %v2951_v11 = vmul.f32 %v6592_v33, %v6592_v33 }
 0x6dc   :  { %v2915_v38 = vadd.f32 %v2914_v13, %v6718_v63  ;;  %v2967_v30 = vadd.f32 %v2966_v8, %v2965_v50  ;;  %v2968_v52 = vsel %vm196_vm1, %v2949_v53, 0.0  ;;  %v2939_v12 = vmul.f32 %v6619_v40, %v6619_v40 }
 0x6dd   :  { %v6739_v6 = vadd.f32 %v6588_v61, %v2862_v21  ;;  %v2952_v17 = vmul.f32 %v6594_v23, %v6594_v23  ;;  %v2970_v14 = vsel %vm196_vm1, %v2950_v26, 0.0  ;;  %v2940_v9 = vmul.f32 %v6705_v32, %v6705_v32 }
 0x6de   :  { %v2916_v31 = vadd.f32 %v2915_v38, %v6722_v62  ;;  %v2969_v49 = vadd.f32 %v2968_v52, %v2967_v30  ;;  %v2954_v45 = vadd.f32 %v2939_v12, %v2938_v2  ;;  %v2903_v58 = vmul.f32 %v7756_v43, %v6728_v19 }
 0x6df   :  { %v2953_v61 = vmul.f32 %v6611_v39, %v6611_v39  ;;  %v2972_v3 = vsel %vm196_vm1, %v2951_v11, 0.0  ;;  %v2941_v29 = vmul.f32 %v6710_v28, %v6710_v28  ;;  %v2974_v16 = vsel %vm196_vm1, %v2952_v17, 0.0  ;;  %v3502_v11 = vld [vmem:[#allocation5 + $0x38] sm:$0x3] }
 0x6e0   :  { %v2917_v54 = vadd.f32 %v2916_v31, %v6739_v6  ;;  %v2971_v24 = vadd.f32 %v2970_v14, %v2969_v49  ;;  %v2955_v60 = vadd.f32 %v2954_v45, %v2940_v9  ;;  %v2942_v46 = vmul.f32 %v6718_v63, %v6718_v63  ;;  %v3503_v49 = vld [vmem:[#allocation5 + $0x30] sm:$0xff] }
 0x6e1   :  { %v2976_v0 = vsel %vm196_vm1, %v2953_v61, 0.0  ;;  %v2943_v39 = vmul.f32 %v6722_v62, %v6722_v62  ;;  %v2944_v7 = vmul.f32 %v6739_v6, %v6739_v6  ;;  %v2945_v5 = vmul.f32 %v2903_v58, %v2903_v58 }
 0x6e2   :  { %v2918_v56 = vadd.f32 %v2917_v54, %v2903_v58  ;;  %v2973_v27 = vadd.f32 %v2972_v3, %v2971_v24  ;;  %v2956_v43 = vadd.f32 %v2955_v60, %v2941_v29  ;;  %v3587_v59 = vmov 11  }
 0x6e3   :  { %3347 = vset.pattern.permute.xlu1 %v3587_v59  ;;  %v3588_v30 = vmov 12   ;;  %v3589_v24 = vmov 13   ;;  %v3590_v61 = vmov 14  }
 0x6e4   :  { %2919 = vadd.xlane.f32.xlu1 %v2918_v56  ;;  %v2975_v55 = vadd.f32 %v2974_v16, %v2973_v27  ;;  %v2957_v4 = vadd.f32 %v2956_v43, %v2942_v46  ;;  %3348 = vset.pattern.permute.xlu0 %v3588_v30 }
 0x6e6   :  { %v2977_v1 = vadd.f32 %v2976_v0, %v2975_v55  ;;  %v2958_v37 = vadd.f32 %v2957_v4, %v2943_v39 }
 0x6e8   :  { %2978 = vadd.xlane.f32.xlu0 %v2977_v1  ;;  %v2959_v51 = vadd.f32 %v2958_v37, %v2944_v7 }
 0x6ea   :  { %v2960_v15 = vadd.f32 %v2959_v51, %v2945_v5 }
 0x6ec   :  { %2961 = vadd.xlane.f32.xlu0 %v2960_v15 }
 0x75a   :  { %v2937_v48 = vpop.xlane.xlu0 %2936 }
 0x75b   :  { %v2981_v42 = vmul.f32 0.001, %v2937_v48 }
 0x75d   :  { %v2985_v53 = vmul.f32 %v2981_v42, %v2981_v42 }
 0x76d   :  { %v2920_v35 = vpop.xlane.xlu1 %2919 }
 0x76e   :  { %v2980_v34 = vmul.f32 0.001, %v2920_v35 }
 0x770   :  { %v2984_v21 = vmul.f32 %v2980_v34, %v2980_v34 }
 0x771   :  { %v2979_v18 = vpop.xlane.xlu0 %2978 }
 0x772   :  { %v2983_v22 = vmul.f32 0.001, %v2979_v18 }
 0x774   :  { %v2987_v44 = vsub.f32 %v2983_v22, %v2985_v53 }
 0x775   :  { %v2962_v50 = vpop.xlane.xlu0 %2961 }
 0x776   :  { %v2989_v13 = vadd.f32 1e-06, %v2987_v44  ;;  %v2982_v26 = vmul.f32 0.001, %v2962_v50 }
 0x778   :  { %3462 = vrsqrt.f32 %v2989_v13  ;;  %v2986_v8 = vsub.f32 %v2982_v26, %v2984_v21 }
 0x77a   :  { %v2988_v38 = vadd.f32 1e-06, %v2986_v8 }
 0x77c   :  { %3464 = vrsqrt.f32 %v2988_v38 }
 0x785   :  { %v3463_v2 = vpop.eup %3462 }
 0x786   :  { %v2993_v52 = vmul.f32 %v3502_v11, %v3463_v2 }
 0x788   :  { %v2995_v12 = vmul.f32 %v2993_v52, %v2981_v42 }
 0x789   :  { %v3465_v31 = vpop.eup %3464 }
 0x78a   :  { %3000 = vrot.lane.b32.xlu1 %v2995_v12, %s3578_s0  ;;  %v2992_v17 = vmul.f32 %v3503_v49, %v3465_v31 }
 0x78c   :  { %v2994_v14 = vmul.f32 %v2992_v17, %v2980_v34 }
 0x78e   :  { %3013 = vperm.xlu1 %3347, %v2993_v52   ;;  %2998 = vrot.lane.b32.xlu0 %v2994_v14, %s3578_s0 }
 0x792   :  { %3008 = vperm.xlu1 %3347, %v2992_v17  }
 0x796   :  { %3349 = vset.pattern.permute.xlu1 %v3588_v30 }
 0x7fc   :  { %v3001_v9 = vpop.permute.xlu1 %3000 }
 0x7fd   :  { %v3005_v45 = vsub.f32 %v3502_v11, %v3001_v9 }
 0x7ff   :  { %3039 = vperm.xlu0 %3348, %v3005_v45   ;;  %v7810_v45 = vld [vmem:[#allocation11_spill] sm:$0xff] }
 0x800   :  { %v2999_v58 = vpop.permute.xlu0 %2998 }
 0x801   :  { %v3004_v54 = vsub.f32 %v3503_v49, %v2999_v58 }
 0x803   :  { %3351 = vset.pattern.permute.xlu0 %v3589_v24  ;;  %3034 = vperm.xlu1 %3349, %v3004_v54  }
 0x804   :  { %3075 = vperm.xlu0 %3351, %v3503_v49  }
 0x807   :  { %3350 = vset.pattern.permute.xlu1 %v3589_v24 }
 0x808   :  { %3353 = vset.pattern.permute.xlu0 %v3590_v61  ;;  %3079 = vperm.xlu1 %3350, %v3502_v11  }
 0x809   :  { %v3014_v3 = vpop.permute.xlu1 %3013 }
 0x80a   :  { %v3024_v29 = vmul.f32 %v3014_v3, %v6574_v25  ;;  %v3025_v60 = vmul.f32 %v3014_v3, %v6576_v20  ;;  %v3026_v56 = vmul.f32 %v3014_v3, %v6578_v41  ;;  %v3027_v27 = vmul.f32 %v3014_v3, %v6582_v10 }
 0x80b   :  { %v3028_v46 = vmul.f32 %v3014_v3, %v6590_v36  ;;  %v3029_v4 = vmul.f32 %v3014_v3, %v6592_v33  ;;  %v3030_v7 = vmul.f32 %v3014_v3, %v6594_v23  ;;  %v3031_v25 = vmul.f32 %v3014_v3, %v6584_v57 }
 0x80c   :  { %3352 = vset.pattern.permute.xlu1 %v3590_v61 }
 0x80d   :  { %3163 = vperm.xlu1 %3352, %v3503_v49   ;;  %v3009_v43 = vpop.permute.xlu1 %3008 }
 0x80e   :  { %v3016_v41 = vmul.f32 %v3009_v43, %v6616_v47  ;;  %v3017_v5 = vmul.f32 %v3009_v43, %v6619_v40  ;;  %v3018_v33 = vmul.f32 %v3009_v43, %v6705_v32  ;;  %v3019_v23 = vmul.f32 %v3009_v43, %v6710_v28 }
 0x80f   :  { %v3020_v57 = vmul.f32 %v3009_v43, %v6718_v63  ;;  %v3021_v47 = vmul.f32 %v3009_v43, %v6722_v62  ;;  %v3022_v40 = vmul.f32 %v3009_v43, %v6739_v6  ;;  %v3023_v32 = vmul.f32 %v3009_v43, %v6728_v19 }
 0x810   :  { %v3591_v62 = vmov 1966171168  }
 0x811   :  { %v3187_v34 = vunpack.c.l.s4 %v3591_v62 }
 0x813   :  { %v3188_v19 = vunpack.c.0.s8 %v3187_v34 }
 0x815   :  { %v6782_v58 = vsub.s32 %v3188_v19, %v7810_v45 }
 0x87a   :  { %v3040_v16 = vpop.permute.xlu0 %3039 }
 0x87b   :  { %v3050_v55 = vadd.f32 %v3040_v16, %v3024_v29  ;;  %v3051_v0 = vadd.f32 %v3040_v16, %v3025_v60  ;;  %v3052_v39 = vadd.f32 %v3040_v16, %v3026_v56  ;;  %v3053_v1 = vadd.f32 %v3040_v16, %v3027_v27 }
 0x87c   :  { %v3054_v37 = vadd.f32 %v3040_v16, %v3028_v46  ;;  %v3055_v20 = vadd.f32 %v3040_v16, %v3029_v4  ;;  %v3056_v10 = vadd.f32 %v3040_v16, %v3030_v7  ;;  %v3057_v51 = vadd.f32 %v3040_v16, %v3031_v25 }
 0x87d   :  { %3466 = vtanh.f32 %v3050_v55 }
 0x87e   :  { %3468 = vtanh.f32 %v3051_v0  ;;  %v3035_v36 = vpop.permute.xlu1 %3034 }
 0x87f   :  { %3470 = vtanh.f32 %v3052_v39  ;;  %v3042_v15 = vadd.f32 %v3035_v36, %v3016_v41  ;;  %v3043_v59 = vadd.f32 %v3035_v36, %v3017_v5  ;;  %v3044_v48 = vadd.f32 %v3035_v36, %v3018_v33  ;;  %v3076_v30 = vpop.permute.xlu0 %3075 }
 0x880   :  { %3472 = vtanh.f32 %v3053_v1  ;;  %v3045_v42 = vadd.f32 %v3035_v36, %v3019_v23  ;;  %v3046_v35 = vadd.f32 %v3035_v36, %v3020_v57  ;;  %v3047_v18 = vadd.f32 %v3035_v36, %v3021_v47 }
 0x881   :  { %3474 = vtanh.f32 %v3054_v37  ;;  %v3048_v53 = vadd.f32 %v3035_v36, %v3022_v40  ;;  %v3049_v28 = vadd.f32 %v3035_v36, %v3023_v32 }
 0x882   :  { %3476 = vtanh.f32 %v3055_v20 }
 0x883   :  { %3478 = vtanh.f32 %v3056_v10  ;;  %v3080_v13 = vpop.permute.xlu1 %3079 }
 0x884   :  { %3480 = vtanh.f32 %v3057_v51 }
 0x885   :  { %3482 = vtanh.f32 %v3042_v15 }
 0x886   :  { %3484 = vtanh.f32 %v3043_v59 }
 0x887   :  { %3486 = vtanh.f32 %v3044_v48 }
 0x888   :  { %3488 = vtanh.f32 %v3045_v42 }
 0x889   :  { %3490 = vtanh.f32 %v3046_v35 }
 0x88a   :  { %v3467_v63 = vpop.eup %3466  ;;  %3492 = vtanh.f32 %v3047_v18 }
 0x88b   :  { %v3469_v22 = vpop.eup %3468  ;;  %3494 = vtanh.f32 %v3048_v53  ;;  %v3090_v8 = vmul.f32 %v3467_v63, %v3080_v13 }
 0x88c   :  { %v3471_v44 = vpop.eup %3470  ;;  %3496 = vtanh.f32 %v3049_v28  ;;  %v3091_v38 = vmul.f32 %v3469_v22, %v3080_v13 }
 0x88d   :  { %v3473_v6 = vpop.eup %3472  ;;  %v3092_v11 = vmul.f32 %v3471_v44, %v3080_v13  ;;  %v3098_v3 = vsel %vm196_vm1, %v3090_v8, 0.0 }
 0x88e   :  { %v3475_v50 = vpop.eup %3474  ;;  %v3093_v52 = vmul.f32 %v3473_v6, %v3080_v13  ;;  %v3106_v29 = vsel %vm196_vm1, %v3091_v38, 0.0 }
 0x88f   :  { %v3477_v21 = vpop.eup %3476  ;;  %v3094_v31 = vmul.f32 %v3475_v50, %v3080_v13  ;;  %v3114_v16 = vsel %vm196_vm1, %v3092_v11, 0.0 }
 0x890   :  { %v3479_v26 = vpop.eup %3478  ;;  %v3095_v49 = vmul.f32 %v3477_v21, %v3080_v13  ;;  %v3122_v46 = vsel %vm196_vm1, %v3093_v52, 0.0  ;;  %v3164_v52 = vpop.permute.xlu1 %3163 }
 0x891   :  { %v3481_v2 = vpop.eup %3480  ;;  %v3096_v14 = vmul.f32 %v3479_v26, %v3080_v13  ;;  %v3130_v39 = vsel %vm196_vm1, %v3094_v31, 0.0 }
 0x892   :  { %v3483_v12 = vpop.eup %3482  ;;  %v3097_v24 = vmul.f32 %v3481_v2, %v3080_v13  ;;  %v3138_v4 = vsel %vm196_vm1, %v3095_v49, 0.0 }
 0x893   :  { %v3485_v17 = vpop.eup %3484  ;;  %v3082_v9 = vmul.f32 %v3483_v12, %v3076_v30  ;;  %v3146_v20 = vsel %vm196_vm1, %v3096_v14, 0.0 }
 0x894   :  { %v3487_v54 = vpop.eup %3486  ;;  %v3083_v61 = vmul.f32 %v3485_v17, %v3076_v30  ;;  %v3154_v51 = vsel %vm196_vm1, %v3097_v24, 0.0 }
 0x895   :  { %v3489_v60 = vpop.eup %3488  ;;  %v3084_v56 = vmul.f32 %v3487_v54, %v3076_v30  ;;  %v3099_v27 = vadd.f32 %v3098_v3, %v3082_v9 }
 0x896   :  { %v3491_v43 = vpop.eup %3490  ;;  %v3085_v55 = vmul.f32 %v3489_v60, %v3076_v30  ;;  %v3107_v0 = vadd.f32 %v3106_v29, %v3083_v61 }
 0x897   :  { %v3493_v1 = vpop.eup %3492  ;;  %v3086_v7 = vmul.f32 %v3491_v43, %v3076_v30  ;;  %v3100_v37 = vrot.slane %v3099_v27, 4  ;;  %v3115_v25 = vadd.f32 %v3114_v16, %v3084_v56 }
 0x898   :  { %v3495_v41 = vpop.eup %3494  ;;  %v3087_v10 = vmul.f32 %v3493_v1, %v3076_v30  ;;  %v3108_v36 = vrot.slane %v3107_v0, 4  ;;  %v3123_v5 = vadd.f32 %v3122_v46, %v3085_v55 }
 0x899   :  { %v3497_v33 = vpop.eup %3496  ;;  %v3088_v15 = vmul.f32 %v3495_v41, %v3076_v30  ;;  %v3101_v23 = vadd.f32 %v3100_v37, %v3099_v27  ;;  %v3116_v59 = vrot.slane %v3115_v25, 4  ;;  %v3131_v57 = vadd.f32 %v3130_v39, %v3086_v7 }
 0x89a   :  { %v3089_v48 = vmul.f32 %v3497_v33, %v3076_v30  ;;  %v3109_v47 = vadd.f32 %v3108_v36, %v3107_v0  ;;  %v3124_v42 = vrot.slane %v3123_v5, 4  ;;  %v3139_v40 = vadd.f32 %v3138_v4, %v3087_v10 }
 0x89b   :  { %v3117_v35 = vadd.f32 %v3116_v59, %v3115_v25  ;;  %v3132_v32 = vrot.slane %v3131_v57, 4  ;;  %v3147_v18 = vadd.f32 %v3146_v20, %v3088_v15  ;;  %v3102_v53 = vrot.slane %v3101_v23, 2 }
 0x89c   :  { %v3125_v28 = vadd.f32 %v3124_v42, %v3123_v5  ;;  %v3140_v63 = vrot.slane %v3139_v40, 4  ;;  %v3155_v22 = vadd.f32 %v3154_v51, %v3089_v48  ;;  %v3110_v62 = vrot.slane %v3109_v47, 2 }
 0x89d   :  { %v3133_v34 = vadd.f32 %v3132_v32, %v3131_v57  ;;  %v3148_v44 = vrot.slane %v3147_v18, 4  ;;  %v3103_v6 = vadd.f32 %v3102_v53, %v3101_v23  ;;  %v3118_v13 = vrot.slane %v3117_v35, 2 }
 0x89e   :  { %v3141_v50 = vadd.f32 %v3140_v63, %v3139_v40  ;;  %v3156_v21 = vrot.slane %v3155_v22, 4  ;;  %v3111_v19 = vadd.f32 %v3110_v62, %v3109_v47  ;;  %v3126_v26 = vrot.slane %v3125_v28, 2 }
 0x89f   :  { %v3149_v8 = vadd.f32 %v3148_v44, %v3147_v18  ;;  %v3104_v38 = vrot.slane %v3103_v6, 1  ;;  %v3119_v30 = vadd.f32 %v3118_v13, %v3117_v35  ;;  %v3134_v2 = vrot.slane %v3133_v34, 2 }
 0x8a0   :  { %v3157_v11 = vadd.f32 %v3156_v21, %v3155_v22  ;;  %v3112_v12 = vrot.slane %v3111_v19, 1  ;;  %v3127_v31 = vadd.f32 %v3126_v26, %v3125_v28  ;;  %v3142_v49 = vrot.slane %v3141_v50, 2 }
 0x8a1   :  { %v3105_v17 = vadd.f32 %v3104_v38, %v3103_v6  ;;  %v3120_v14 = vrot.slane %v3119_v30, 1  ;;  %v3135_v9 = vadd.f32 %v3134_v2, %v3133_v34  ;;  %v3150_v45 = vrot.slane %v3149_v8, 2 }
 0x8a2   :  { %v3113_v54 = vadd.f32 %v3112_v12, %v3111_v19  ;;  %v3128_v24 = vrot.slane %v3127_v31, 1  ;;  %v3143_v61 = vadd.f32 %v3142_v49, %v3141_v50  ;;  %v3158_v3 = vrot.slane %v3157_v11, 2 }
 0x8a3   :  { %v3121_v29 = vadd.f32 %v3120_v14, %v3119_v30  ;;  %v3136_v60 = vrot.slane %v3135_v9, 1  ;;  %v3151_v56 = vadd.f32 %v3150_v45, %v3149_v8  ;;  %v3166_v27 = vadd.f32 %v3164_v52, %v3105_v17 }
 0x8a4   :  { %v3129_v16 = vadd.f32 %v3128_v24, %v3127_v31  ;;  %v3144_v46 = vrot.slane %v3143_v61, 1  ;;  %v3159_v43 = vadd.f32 %v3158_v3, %v3157_v11  ;;  %v3167_v55 = vadd.f32 %v3164_v52, %v3113_v54 }
 0x8a5   :  { %v3137_v0 = vadd.f32 %v3136_v60, %v3135_v9  ;;  %v3152_v39 = vrot.slane %v3151_v56, 1  ;;  %v3168_v4 = vadd.f32 %v3164_v52, %v3121_v29 }
 0x8a6   :  { %v3145_v1 = vadd.f32 %v3144_v46, %v3143_v61  ;;  %v3160_v7 = vrot.slane %v3159_v43, 1  ;;  %v3169_v37 = vadd.f32 %v3164_v52, %v3129_v16  ;;  %v3182_v25 = vcombine.low %v3166_v27, %v3167_v55 }
 0x8a7   :  { %v3153_v20 = vadd.f32 %v3152_v39, %v3151_v56  ;;  %v3170_v41 = vadd.f32 %v3164_v52, %v3137_v0 }
 0x8a8   :  { %v3161_v10 = vadd.f32 %v3160_v7, %v3159_v43  ;;  %v3171_v36 = vadd.f32 %v3164_v52, %v3145_v1  ;;  %v3183_v5 = vcombine.low %v3168_v4, %v3169_v37  ;;  %v3192_v51 = vrot.slane %v3182_v25, %v6782_v58 }
 0x8a9   :  { %v3172_v33 = vadd.f32 %v3164_v52, %v3153_v20 }
 0x8aa   :  { %v3173_v15 = vadd.f32 %v3164_v52, %v3161_v10  ;;  %v3184_v23 = vcombine.low %v3170_v41, %v3171_v36  ;;  %v3199_v59 = vrot.slane %v3183_v5, %v6782_v58 }
 0x8ac   :  { %v3185_v57 = vcombine.low %v3172_v33, %v3173_v15  ;;  %v3206_v48 = vrot.slane %v3184_v23, %v6782_v58  ;;  %v3214_v47 = vcombine.low %v3192_v51, %v3199_v59 }
 0x8ae   :  { %v3213_v42 = vrot.slane %v3185_v57, %v6782_v58  ;;  %v3222_v35 = vrot.slane %v3214_v47, %v6782_v58 }
 0x8b0   :  { %v3215_v40 = vcombine.low %v3206_v48, %v3213_v42 }
 0x8b2   :  { %v3229_v32 = vrot.slane %v3215_v40, %v6782_v58 }
 0x8b4   :  { %v3230_v18 = vcombine.low %v3222_v35, %v3229_v32 }
 0x8b6   :  { %3232 = vst [vmem:[#allocation7] sm:$0xff] %v3230_v18 }
 0x8b7   :  { %3555 = shalt.err (!%p3552_p0)
}
 0x8b8   :  { %3242 = dma.vmem_to_hbm [thread:$0]  %s3240_s21, 128, %s6803_s2, [#allocation4]  }
 0x8b9   :  { %3568 = dma.done.wait [#allocation4], 128  }
 0x8ba   :  { %3569 = vsyncadd [#allocation4], 4294967168 }
 0x8bb   :  { %3246 = vsyncpa [#allocation3], 1 }
 0x8bc   :  { %3247 = vsyncpa [#allocation6], 1 }
 0x8bd   :  { %3248 = vsyncpa [#allocation4], 1 }

</bundles_post_ra>
